<compile_context>
chip_gen: v7x
topology: tpu7x:2x2x1
jax: 0.10.0
libtpu: 0.0.40
codegen_flags: <defaults>
</compile_context>

<pallas_src>
import functools

import jax
import jax.numpy as jnp
from jax.experimental import pallas as pl
from jax.experimental.pallas import tpu as pltpu

_LANE = 128


# ----------------------------------------------------------------------------
# Kernel: conv3x3 -> BN -> ReLU -> conv3x3 -> BN -> +identity -> ReLU
# (one batch element per grid step, channels pre-padded to a lane multiple)
# ----------------------------------------------------------------------------
def _basic_block_kernel(x_ref, w1_ref, s1_ref, b1_ref, w2_ref, s2_ref, b2_ref,
                        out_ref, pad_ref, *, H, W, compute_dtype):
    Cp = pad_ref.shape[-1]                      # lane-padded channel count

    # ---- build spatially padded input in VMEM (halo = 0, done in-kernel) ----
    pad_ref[...] = jnp.zeros_like(pad_ref)
    pad_ref[1:1 + H, 1:1 + W, :] = x_ref[0].astype(pad_ref.dtype)

    def conv3x3(w_ref):
        # 9 shifted K=128 matmuls accumulated in f32 vregs (no ref round-trips).
        acc = jnp.zeros((H * W, Cp), jnp.float32)
        for k in range(9):
            dh, dw = divmod(k, 3)
            patch = pad_ref[dh:dh + H, dw:dw + W, :].reshape(H * W, Cp)
            acc = acc + jnp.dot(patch.astype(compute_dtype), w_ref[k],
                                preferred_element_type=jnp.float32)
        return acc

    # ---- stage 1: conv1 -> folded BN1 -> ReLU (stays in VMEM) ---------------
    h = jnp.maximum(conv3x3(w1_ref) * s1_ref[0, :] + b1_ref[0, :], 0.0)

    # Re-pad the intermediate into the same scratch (halo is still zero).
    pad_ref[1:1 + H, 1:1 + W, :] = h.reshape(H, W, Cp)

    # ---- stage 2: conv2 -> folded BN2 -> +identity -> ReLU ------------------
    y = conv3x3(w2_ref) * s2_ref[0, :] + b2_ref[0, :]
    y = y + x_ref[0].reshape(H * W, Cp).astype(jnp.float32)      # residual
    out_ref[0] = jnp.maximum(y, 0.0).reshape(H, W, Cp).astype(out_ref.dtype)


# ----------------------------------------------------------------------------
# Wrapper
# ----------------------------------------------------------------------------
def _fold_bn(gamma, beta, mean, var, eps=1e-5):
    inv = gamma / jnp.sqrt(var + eps)
    return inv, beta - mean * inv


def _pad_last(a, target):
    return jnp.pad(a, [(0, 0)] * (a.ndim - 1) + [(0, target - a.shape[-1])])


def basic_block_forward(x_nchw, params, *, compute_dtype=jnp.float32):
    """Fused BasicBlock forward (stride=1, downsample=None). NCHW in/out."""
    x = jnp.transpose(x_nchw, (0, 2, 3, 1))                      # NCHW -> NHWC
    N, H, W, C = x.shape
    Cp = ((C + _LANE - 1) // _LANE) * _LANE                      # lane-pad channels

    xp = _pad_last(x, Cp)                                        # zero padded channels

    def prep_w(w):                                               # (3,3,C,C) -> (9,Cp,Cp)
        w = jnp.pad(w, ((0, 0), (0, 0), (0, Cp - C), (0, Cp - C)))
        return w.reshape(9, Cp, Cp).astype(compute_dtype)

    s1, b1 = _fold_bn(params["bn1_gamma"], params["bn1_beta"],
                      params["bn1_mean"], params["bn1_var"])
    s2, b2 = _fold_bn(params["bn2_gamma"], params["bn2_beta"],
                      params["bn2_mean"], params["bn2_var"])
    vec = lambda v: _pad_last(v.astype(jnp.float32), Cp).reshape(1, Cp)

    out_p = pl.pallas_call(
        functools.partial(_basic_block_kernel, H=H, W=W,
                          compute_dtype=compute_dtype),
        out_shape=jax.ShapeDtypeStruct((N, H, W, Cp), x.dtype),
        grid=(N,),
        in_specs=[
            pl.BlockSpec((1, H, W, Cp), lambda n: (n, 0, 0, 0)),   # x (identity)
            pl.BlockSpec((9, Cp, Cp), lambda n: (0, 0, 0)),        # w1
            pl.BlockSpec((1, Cp), lambda n: (0, 0)),               # bn1 scale
            pl.BlockSpec((1, Cp), lambda n: (0, 0)),               # bn1 bias
            pl.BlockSpec((9, Cp, Cp), lambda n: (0, 0, 0)),        # w2
            pl.BlockSpec((1, Cp), lambda n: (0, 0)),               # bn2 scale
            pl.BlockSpec((1, Cp), lambda n: (0, 0)),               # bn2 bias
        ],
        out_specs=pl.BlockSpec((1, H, W, Cp), lambda n: (n, 0, 0, 0)),
        scratch_shapes=[pltpu.VMEM((H + 2, W + 2, Cp), jnp.float32)],
        compiler_params=pltpu.CompilerParams(
            dimension_semantics=("parallel",)),
    )(xp, prep_w(params["w1"]), vec(s1), vec(b1),
      prep_w(params["w2"]), vec(s2), vec(b2))

    out = out_p[..., :C]                                         # drop padded channels
    return jnp.transpose(out, (0, 3, 1, 2))                      # NHWC -> NCHW


# ----------------------------------------------------------------------------
# Pure-JAX reference (for validation)
# ----------------------------------------------------------------------------
def basic_block_reference(x_nchw, params):
    def conv3x3(x, w_hwio):
        return jax.lax.conv_general_dilated(
            x, w_hwio, window_strides=(1, 1), padding="SAME",
            dimension_numbers=("NCHW", "HWIO", "NCHW"))

    def bn(x, g, b, m, v, eps=1e-5):
        g = g[None, :, None, None]; b = b[None, :, None, None]
        m = m[None, :, None, None]; v = v[None, :, None, None]
        return (x - m) / jnp.sqrt(v + eps) * g + b

    out = jax.nn.relu(bn(conv3x3(x_nchw, params["w1"]),
                         params["bn1_gamma"], params["bn1_beta"],
                         params["bn1_mean"], params["bn1_var"]))
    out = bn(conv3x3(out, params["w2"]),
             params["bn2_gamma"], params["bn2_beta"],
             params["bn2_mean"], params["bn2_var"])
    out = out + x_nchw
    return jax.nn.relu(out)


# ----------------------------------------------------------------------------
# Main
# ----------------------------------------------------------------------------
if __name__ == "__main__":
    N, C, H, W = 2, 4, 16, 16                                    # in == out channels
    key = jax.random.PRNGKey(0)
    k = jax.random.split(key, 10)

    # Deterministic synthetic parameters (conv weights stored HWIO = (3,3,Cin,Cout)).
    params = {
        "w1": (jax.random.normal(k[0], (3, 3, C, C), jnp.float32) * 0.1),
        "w2": (jax.random.normal(k[1], (3, 3, C, C), jnp.float32) * 0.1),
        "bn1_gamma": 1.0 + 0.1 * jax.random.normal(k[2], (C,), jnp.float32),
        "bn1_beta": 0.1 * jax.random.normal(k[3], (C,), jnp.float32),
        "bn1_mean": 0.1 * jax.random.normal(k[4], (C,), jnp.float32),
        "bn1_var": 1.0 + 0.1 * jax.random.uniform(k[5], (C,), jnp.float32),
        "bn2_gamma": 1.0 + 0.1 * jax.random.normal(k[6], (C,), jnp.float32),
        "bn2_beta": 0.1 * jax.random.normal(k[7], (C,), jnp.float32),
        "bn2_mean": 0.1 * jax.random.normal(k[8], (C,), jnp.float32),
        "bn2_var": 1.0 + 0.1 * jax.random.uniform(k[9], (C,), jnp.float32),
    }

    x = jax.random.normal(jax.random.PRNGKey(42), (N, C, H, W), jnp.float32)
    ref = jax.block_until_ready(basic_block_reference(x, params))

    # f32 path (exact check against the reference).
    out = jax.block_until_ready(basic_block_forward(x, params))
    assert out.shape == (N, C, H, W)
    assert jnp.allclose(out, ref, rtol=1e-4, atol=1e-4), "f32 mismatch vs reference"

    # bf16 MXU-operand path (v6e/v7x recommendation); elementwise math stays f32.
    out_bf16 = jax.block_until_ready(
        basic_block_forward(x, params, compute_dtype=jnp.bfloat16))
    assert out_bf16.shape == (N, C, H, W)
    assert jnp.allclose(out_bf16, ref, rtol=5e-2, atol=5e-2), "bf16 mismatch vs reference"

    print("KERNEL_OK")
</pallas_src>

<mosaic_0001>
module attributes {stable_mosaic.version = 11 : i64} {
  func.func @_basic_block_kernel(%arg0: i32, %arg1: memref<1x16x16x128xf32, #tpu.memory_space<vmem>>, %arg2: memref<9x128x128xf32, #tpu.memory_space<vmem>>, %arg3: memref<1x128xf32, #tpu.memory_space<vmem>>, %arg4: memref<1x128xf32, #tpu.memory_space<vmem>>, %arg5: memref<9x128x128xf32, #tpu.memory_space<vmem>>, %arg6: memref<1x128xf32, #tpu.memory_space<vmem>>, %arg7: memref<1x128xf32, #tpu.memory_space<vmem>>, %arg8: memref<1x16x16x128xf32, #tpu.memory_space<vmem>>, %arg9: memref<18x18x128xf32, #tpu.memory_space<vmem>>) attributes {dimension_semantics = [#tpu.dimension_semantics<parallel>], iteration_bounds = array<i64: 2>, scalar_prefetch = 0 : i64, scratch_operands = 1 : i64, tpu.core_type = #tpu.core_type<tc>, window_params = [{transform_indices = @transform_0, window_bounds = array<i64: 1, 16, 16, 128>}, {pipeline_mode = #tpu.pipeline_mode<synchronous>, transform_indices = @transform_1, window_bounds = array<i64: 9, 128, 128>}, {pipeline_mode = #tpu.pipeline_mode<synchronous>, transform_indices = @transform_2, window_bounds = array<i64: 1, 128>}, {pipeline_mode = #tpu.pipeline_mode<synchronous>, transform_indices = @transform_3, window_bounds = array<i64: 1, 128>}, {pipeline_mode = #tpu.pipeline_mode<synchronous>, transform_indices = @transform_4, window_bounds = array<i64: 9, 128, 128>}, {pipeline_mode = #tpu.pipeline_mode<synchronous>, transform_indices = @transform_5, window_bounds = array<i64: 1, 128>}, {pipeline_mode = #tpu.pipeline_mode<synchronous>, transform_indices = @transform_6, window_bounds = array<i64: 1, 128>}, {transform_indices = @transform_7, window_bounds = array<i64: 1, 16, 16, 128>}]} {
    %cst = arith.constant 0.000000e+00 : f32
    %0 = vector.broadcast %cst : f32 to vector<18x18x128xf32>
    %c0 = arith.constant 0 : index
    %c0_0 = arith.constant 0 : index
    %c0_1 = arith.constant 0 : index
    %1 = vector.load %arg9[%c0, %c0_0, %c0_1] : memref<18x18x128xf32, #tpu.memory_space<vmem>>, vector<18x18x128xf32>
    tpu.vector_store %arg9[%c0, %c0_0, %c0_1], %0 {strides = array<i32>} : memref<18x18x128xf32, #tpu.memory_space<vmem>>, vector<18x18x128xf32>,
    %c0_2 = arith.constant 0 : index
    %c0_3 = arith.constant 0 : index
    %c0_4 = arith.constant 0 : index
    %c0_5 = arith.constant 0 : index
    %2 = vector.load %arg1[%c0_2, %c0_3, %c0_4, %c0_5] : memref<1x16x16x128xf32, #tpu.memory_space<vmem>>, vector<1x16x16x128xf32>
    %3 = vector.shape_cast %2 : vector<1x16x16x128xf32> to vector<16x16x128xf32>
    %c1 = arith.constant 1 : index
    %c1_6 = arith.constant 1 : index
    %c0_7 = arith.constant 0 : index
    %4 = vector.load %arg9[%c1, %c1_6, %c0_7] : memref<18x18x128xf32, #tpu.memory_space<vmem>>, vector<16x16x128xf32>
    tpu.vector_store %arg9[%c1, %c1_6, %c0_7], %3 {strides = array<i32>} : memref<18x18x128xf32, #tpu.memory_space<vmem>>, vector<16x16x128xf32>,
    %cst_8 = arith.constant 0.000000e+00 : f32
    %5 = vector.broadcast %cst_8 : f32 to vector<256x128xf32>
    %c0_9 = arith.constant 0 : index
    %c0_10 = arith.constant 0 : index
    %c0_11 = arith.constant 0 : index
    %6 = vector.load %arg9[%c0_9, %c0_10, %c0_11] : memref<18x18x128xf32, #tpu.memory_space<vmem>>, vector<16x16x128xf32>
    %7 = vector.shape_cast %6 : vector<16x16x128xf32> to vector<256x128xf32>
    %c0_12 = arith.constant 0 : index
    %c0_13 = arith.constant 0 : index
    %c0_14 = arith.constant 0 : index
    %8 = vector.load %arg2[%c0_12, %c0_13, %c0_14] : memref<9x128x128xf32, #tpu.memory_space<vmem>>, vector<1x128x128xf32>
    %9 = vector.shape_cast %8 : vector<1x128x128xf32> to vector<128x128xf32>
    %cst_15 = arith.constant dense<0.000000e+00> : vector<256x128xf32>
    %10 = tpu.matmul %7, %9, %cst_15 {dimension_numbers = #tpu.dot_dimension_numbers<[1], [0], [0], [1], [0, 0, 1, 1], [], []>} : vector<256x128xf32>, vector<128x128xf32>, vector<256x128xf32> -> vector<256x128xf32>
    %11 = arith.addf %5, %10 : vector<256x128xf32>
    %c0_16 = arith.constant 0 : index
    %c1_17 = arith.constant 1 : index
    %c0_18 = arith.constant 0 : index
    %12 = vector.load %arg9[%c0_16, %c1_17, %c0_18] : memref<18x18x128xf32, #tpu.memory_space<vmem>>, vector<16x16x128xf32>
    %13 = vector.shape_cast %12 : vector<16x16x128xf32> to vector<256x128xf32>
    %c1_19 = arith.constant 1 : index
    %c0_20 = arith.constant 0 : index
    %c0_21 = arith.constant 0 : index
    %14 = vector.load %arg2[%c1_19, %c0_20, %c0_21] : memref<9x128x128xf32, #tpu.memory_space<vmem>>, vector<1x128x128xf32>
    %15 = vector.shape_cast %14 : vector<1x128x128xf32> to vector<128x128xf32>
    %cst_22 = arith.constant dense<0.000000e+00> : vector<256x128xf32>
    %16 = tpu.matmul %13, %15, %cst_22 {dimension_numbers = #tpu.dot_dimension_numbers<[1], [0], [0], [1], [0, 0, 1, 1], [], []>} : vector<256x128xf32>, vector<128x128xf32>, vector<256x128xf32> -> vector<256x128xf32>
    %17 = arith.addf %11, %16 : vector<256x128xf32>
    %c0_23 = arith.constant 0 : index
    %c2 = arith.constant 2 : index
    %c0_24 = arith.constant 0 : index
    %18 = vector.load %arg9[%c0_23, %c2, %c0_24] : memref<18x18x128xf32, #tpu.memory_space<vmem>>, vector<16x16x128xf32>
    %19 = vector.shape_cast %18 : vector<16x16x128xf32> to vector<256x128xf32>
    %c2_25 = arith.constant 2 : index
    %c0_26 = arith.constant 0 : index
    %c0_27 = arith.constant 0 : index
    %20 = vector.load %arg2[%c2_25, %c0_26, %c0_27] : memref<9x128x128xf32, #tpu.memory_space<vmem>>, vector<1x128x128xf32>
    %21 = vector.shape_cast %20 : vector<1x128x128xf32> to vector<128x128xf32>
    %cst_28 = arith.constant dense<0.000000e+00> : vector<256x128xf32>
    %22 = tpu.matmul %19, %21, %cst_28 {dimension_numbers = #tpu.dot_dimension_numbers<[1], [0], [0], [1], [0, 0, 1, 1], [], []>} : vector<256x128xf32>, vector<128x128xf32>, vector<256x128xf32> -> vector<256x128xf32>
    %23 = arith.addf %17, %22 : vector<256x128xf32>
    %c1_29 = arith.constant 1 : index
    %c0_30 = arith.constant 0 : index
    %c0_31 = arith.constant 0 : index
    %24 = vector.load %arg9[%c1_29, %c0_30, %c0_31] : memref<18x18x128xf32, #tpu.memory_space<vmem>>, vector<16x16x128xf32>
    %25 = vector.shape_cast %24 : vector<16x16x128xf32> to vector<256x128xf32>
    %c3 = arith.constant 3 : index
    %c0_32 = arith.constant 0 : index
    %c0_33 = arith.constant 0 : index
    %26 = vector.load %arg2[%c3, %c0_32, %c0_33] : memref<9x128x128xf32, #tpu.memory_space<vmem>>, vector<1x128x128xf32>
    %27 = vector.shape_cast %26 : vector<1x128x128xf32> to vector<128x128xf32>
    %cst_34 = arith.constant dense<0.000000e+00> : vector<256x128xf32>
    %28 = tpu.matmul %25, %27, %cst_34 {dimension_numbers = #tpu.dot_dimension_numbers<[1], [0], [0], [1], [0, 0, 1, 1], [], []>} : vector<256x128xf32>, vector<128x128xf32>, vector<256x128xf32> -> vector<256x128xf32>
    %29 = arith.addf %23, %28 : vector<256x128xf32>
    %c1_35 = arith.constant 1 : index
    %c1_36 = arith.constant 1 : index
    %c0_37 = arith.constant 0 : index
    %30 = vector.load %arg9[%c1_35, %c1_36, %c0_37] : memref<18x18x128xf32, #tpu.memory_space<vmem>>, vector<16x16x128xf32>
    %31 = vector.shape_cast %30 : vector<16x16x128xf32> to vector<256x128xf32>
    %c4 = arith.constant 4 : index
    %c0_38 = arith.constant 0 : index
    %c0_39 = arith.constant 0 : index
    %32 = vector.load %arg2[%c4, %c0_38, %c0_39] : memref<9x128x128xf32, #tpu.memory_space<vmem>>, vector<1x128x128xf32>
    %33 = vector.shape_cast %32 : vector<1x128x128xf32> to vector<128x128xf32>
    %cst_40 = arith.constant dense<0.000000e+00> : vector<256x128xf32>
    %34 = tpu.matmul %31, %33, %cst_40 {dimension_numbers = #tpu.dot_dimension_numbers<[1], [0], [0], [1], [0, 0, 1, 1], [], []>} : vector<256x128xf32>, vector<128x128xf32>, vector<256x128xf32> -> vector<256x128xf32>
    %35 = arith.addf %29, %34 : vector<256x128xf32>
    %c1_41 = arith.constant 1 : index
    %c2_42 = arith.constant 2 : index
    %c0_43 = arith.constant 0 : index
    %36 = vector.load %arg9[%c1_41, %c2_42, %c0_43] : memref<18x18x128xf32, #tpu.memory_space<vmem>>, vector<16x16x128xf32>
    %37 = vector.shape_cast %36 : vector<16x16x128xf32> to vector<256x128xf32>
    %c5 = arith.constant 5 : index
    %c0_44 = arith.constant 0 : index
    %c0_45 = arith.constant 0 : index
    %38 = vector.load %arg2[%c5, %c0_44, %c0_45] : memref<9x128x128xf32, #tpu.memory_space<vmem>>, vector<1x128x128xf32>
    %39 = vector.shape_cast %38 : vector<1x128x128xf32> to vector<128x128xf32>
    %cst_46 = arith.constant dense<0.000000e+00> : vector<256x128xf32>
    %40 = tpu.matmul %37, %39, %cst_46 {dimension_numbers = #tpu.dot_dimension_numbers<[1], [0], [0], [1], [0, 0, 1, 1], [], []>} : vector<256x128xf32>, vector<128x128xf32>, vector<256x128xf32> -> vector<256x128xf32>
    %41 = arith.addf %35, %40 : vector<256x128xf32>
    %c2_47 = arith.constant 2 : index
    %c0_48 = arith.constant 0 : index
    %c0_49 = arith.constant 0 : index
    %42 = vector.load %arg9[%c2_47, %c0_48, %c0_49] : memref<18x18x128xf32, #tpu.memory_space<vmem>>, vector<16x16x128xf32>
    %43 = vector.shape_cast %42 : vector<16x16x128xf32> to vector<256x128xf32>
    %c6 = arith.constant 6 : index
    %c0_50 = arith.constant 0 : index
    %c0_51 = arith.constant 0 : index
    %44 = vector.load %arg2[%c6, %c0_50, %c0_51] : memref<9x128x128xf32, #tpu.memory_space<vmem>>, vector<1x128x128xf32>
    %45 = vector.shape_cast %44 : vector<1x128x128xf32> to vector<128x128xf32>
    %cst_52 = arith.constant dense<0.000000e+00> : vector<256x128xf32>
    %46 = tpu.matmul %43, %45, %cst_52 {dimension_numbers = #tpu.dot_dimension_numbers<[1], [0], [0], [1], [0, 0, 1, 1], [], []>} : vector<256x128xf32>, vector<128x128xf32>, vector<256x128xf32> -> vector<256x128xf32>
    %47 = arith.addf %41, %46 : vector<256x128xf32>
    %c2_53 = arith.constant 2 : index
    %c1_54 = arith.constant 1 : index
    %c0_55 = arith.constant 0 : index
    %48 = vector.load %arg9[%c2_53, %c1_54, %c0_55] : memref<18x18x128xf32, #tpu.memory_space<vmem>>, vector<16x16x128xf32>
    %49 = vector.shape_cast %48 : vector<16x16x128xf32> to vector<256x128xf32>
    %c7 = arith.constant 7 : index
    %c0_56 = arith.constant 0 : index
    %c0_57 = arith.constant 0 : index
    %50 = vector.load %arg2[%c7, %c0_56, %c0_57] : memref<9x128x128xf32, #tpu.memory_space<vmem>>, vector<1x128x128xf32>
    %51 = vector.shape_cast %50 : vector<1x128x128xf32> to vector<128x128xf32>
    %cst_58 = arith.constant dense<0.000000e+00> : vector<256x128xf32>
    %52 = tpu.matmul %49, %51, %cst_58 {dimension_numbers = #tpu.dot_dimension_numbers<[1], [0], [0], [1], [0, 0, 1, 1], [], []>} : vector<256x128xf32>, vector<128x128xf32>, vector<256x128xf32> -> vector<256x128xf32>
    %53 = arith.addf %47, %52 : vector<256x128xf32>
    %c2_59 = arith.constant 2 : index
    %c2_60 = arith.constant 2 : index
    %c0_61 = arith.constant 0 : index
    %54 = vector.load %arg9[%c2_59, %c2_60, %c0_61] : memref<18x18x128xf32, #tpu.memory_space<vmem>>, vector<16x16x128xf32>
    %55 = vector.shape_cast %54 : vector<16x16x128xf32> to vector<256x128xf32>
    %c8 = arith.constant 8 : index
    %c0_62 = arith.constant 0 : index
    %c0_63 = arith.constant 0 : index
    %56 = vector.load %arg2[%c8, %c0_62, %c0_63] : memref<9x128x128xf32, #tpu.memory_space<vmem>>, vector<1x128x128xf32>
    %57 = vector.shape_cast %56 : vector<1x128x128xf32> to vector<128x128xf32>
    %cst_64 = arith.constant dense<0.000000e+00> : vector<256x128xf32>
    %58 = tpu.matmul %55, %57, %cst_64 {dimension_numbers = #tpu.dot_dimension_numbers<[1], [0], [0], [1], [0, 0, 1, 1], [], []>} : vector<256x128xf32>, vector<128x128xf32>, vector<256x128xf32> -> vector<256x128xf32>
    %59 = arith.addf %53, %58 : vector<256x128xf32>
    %c0_65 = arith.constant 0 : index
    %c0_66 = arith.constant 0 : index
    %60 = vector.load %arg3[%c0_65, %c0_66] : memref<1x128xf32, #tpu.memory_space<vmem>>, vector<1x128xf32>
    %61 = vector.shape_cast %60 : vector<1x128xf32> to vector<128xf32>
    %62 = vector.shape_cast %61 : vector<128xf32> to vector<1x128xf32>
    %63 = vector.broadcast %62 : vector<1x128xf32> to vector<256x128xf32>
    %64 = arith.mulf %59, %63 : vector<256x128xf32>
    %c0_67 = arith.constant 0 : index
    %c0_68 = arith.constant 0 : index
    %65 = vector.load %arg4[%c0_67, %c0_68] : memref<1x128xf32, #tpu.memory_space<vmem>>, vector<1x128xf32>
    %66 = vector.shape_cast %65 : vector<1x128xf32> to vector<128xf32>
    %67 = vector.shape_cast %66 : vector<128xf32> to vector<1x128xf32>
    %68 = vector.broadcast %67 : vector<1x128xf32> to vector<256x128xf32>
    %69 = arith.addf %64, %68 : vector<256x128xf32>
    %cst_69 = arith.constant 0.000000e+00 : f32
    %70 = vector.broadcast %cst_69 : f32 to vector<256x128xf32>
    %71 = arith.maximumf %69, %70 : vector<256x128xf32>
    %72 = vector.shape_cast %71 : vector<256x128xf32> to vector<16x16x128xf32>
    %c1_70 = arith.constant 1 : index
    %c1_71 = arith.constant 1 : index
    %c0_72 = arith.constant 0 : index
    %73 = vector.load %arg9[%c1_70, %c1_71, %c0_72] : memref<18x18x128xf32, #tpu.memory_space<vmem>>, vector<16x16x128xf32>
    tpu.vector_store %arg9[%c1_70, %c1_71, %c0_72], %72 {strides = array<i32>} : memref<18x18x128xf32, #tpu.memory_space<vmem>>, vector<16x16x128xf32>,
    %cst_73 = arith.constant 0.000000e+00 : f32
    %74 = vector.broadcast %cst_73 : f32 to vector<256x128xf32>
    %c0_74 = arith.constant 0 : index
    %c0_75 = arith.constant 0 : index
    %c0_76 = arith.constant 0 : index
    %75 = vector.load %arg9[%c0_74, %c0_75, %c0_76] : memref<18x18x128xf32, #tpu.memory_space<vmem>>, vector<16x16x128xf32>
    %76 = vector.shape_cast %75 : vector<16x16x128xf32> to vector<256x128xf32>
    %c0_77 = arith.constant 0 : index
    %c0_78 = arith.constant 0 : index
    %c0_79 = arith.constant 0 : index
    %77 = vector.load %arg5[%c0_77, %c0_78, %c0_79] : memref<9x128x128xf32, #tpu.memory_space<vmem>>, vector<1x128x128xf32>
    %78 = vector.shape_cast %77 : vector<1x128x128xf32> to vector<128x128xf32>
    %cst_80 = arith.constant dense<0.000000e+00> : vector<256x128xf32>
    %79 = tpu.matmul %76, %78, %cst_80 {dimension_numbers = #tpu.dot_dimension_numbers<[1], [0], [0], [1], [0, 0, 1, 1], [], []>} : vector<256x128xf32>, vector<128x128xf32>, vector<256x128xf32> -> vector<256x128xf32>
    %80 = arith.addf %74, %79 : vector<256x128xf32>
    %c0_81 = arith.constant 0 : index
    %c1_82 = arith.constant 1 : index
    %c0_83 = arith.constant 0 : index
    %81 = vector.load %arg9[%c0_81, %c1_82, %c0_83] : memref<18x18x128xf32, #tpu.memory_space<vmem>>, vector<16x16x128xf32>
    %82 = vector.shape_cast %81 : vector<16x16x128xf32> to vector<256x128xf32>
    %c1_84 = arith.constant 1 : index
    %c0_85 = arith.constant 0 : index
    %c0_86 = arith.constant 0 : index
    %83 = vector.load %arg5[%c1_84, %c0_85, %c0_86] : memref<9x128x128xf32, #tpu.memory_space<vmem>>, vector<1x128x128xf32>
    %84 = vector.shape_cast %83 : vector<1x128x128xf32> to vector<128x128xf32>
    %cst_87 = arith.constant dense<0.000000e+00> : vector<256x128xf32>
    %85 = tpu.matmul %82, %84, %cst_87 {dimension_numbers = #tpu.dot_dimension_numbers<[1], [0], [0], [1], [0, 0, 1, 1], [], []>} : vector<256x128xf32>, vector<128x128xf32>, vector<256x128xf32> -> vector<256x128xf32>
    %86 = arith.addf %80, %85 : vector<256x128xf32>
    %c0_88 = arith.constant 0 : index
    %c2_89 = arith.constant 2 : index
    %c0_90 = arith.constant 0 : index
    %87 = vector.load %arg9[%c0_88, %c2_89, %c0_90] : memref<18x18x128xf32, #tpu.memory_space<vmem>>, vector<16x16x128xf32>
    %88 = vector.shape_cast %87 : vector<16x16x128xf32> to vector<256x128xf32>
    %c2_91 = arith.constant 2 : index
    %c0_92 = arith.constant 0 : index
    %c0_93 = arith.constant 0 : index
    %89 = vector.load %arg5[%c2_91, %c0_92, %c0_93] : memref<9x128x128xf32, #tpu.memory_space<vmem>>, vector<1x128x128xf32>
    %90 = vector.shape_cast %89 : vector<1x128x128xf32> to vector<128x128xf32>
    %cst_94 = arith.constant dense<0.000000e+00> : vector<256x128xf32>
    %91 = tpu.matmul %88, %90, %cst_94 {dimension_numbers = #tpu.dot_dimension_numbers<[1], [0], [0], [1], [0, 0, 1, 1], [], []>} : vector<256x128xf32>, vector<128x128xf32>, vector<256x128xf32> -> vector<256x128xf32>
    %92 = arith.addf %86, %91 : vector<256x128xf32>
    %c1_95 = arith.constant 1 : index
    %c0_96 = arith.constant 0 : index
    %c0_97 = arith.constant 0 : index
    %93 = vector.load %arg9[%c1_95, %c0_96, %c0_97] : memref<18x18x128xf32, #tpu.memory_space<vmem>>, vector<16x16x128xf32>
    %94 = vector.shape_cast %93 : vector<16x16x128xf32> to vector<256x128xf32>
    %c3_98 = arith.constant 3 : index
    %c0_99 = arith.constant 0 : index
    %c0_100 = arith.constant 0 : index
    %95 = vector.load %arg5[%c3_98, %c0_99, %c0_100] : memref<9x128x128xf32, #tpu.memory_space<vmem>>, vector<1x128x128xf32>
    %96 = vector.shape_cast %95 : vector<1x128x128xf32> to vector<128x128xf32>
    %cst_101 = arith.constant dense<0.000000e+00> : vector<256x128xf32>
    %97 = tpu.matmul %94, %96, %cst_101 {dimension_numbers = #tpu.dot_dimension_numbers<[1], [0], [0], [1], [0, 0, 1, 1], [], []>} : vector<256x128xf32>, vector<128x128xf32>, vector<256x128xf32> -> vector<256x128xf32>
    %98 = arith.addf %92, %97 : vector<256x128xf32>
    %c1_102 = arith.constant 1 : index
    %c1_103 = arith.constant 1 : index
    %c0_104 = arith.constant 0 : index
    %99 = vector.load %arg9[%c1_102, %c1_103, %c0_104] : memref<18x18x128xf32, #tpu.memory_space<vmem>>, vector<16x16x128xf32>
    %100 = vector.shape_cast %99 : vector<16x16x128xf32> to vector<256x128xf32>
    %c4_105 = arith.constant 4 : index
    %c0_106 = arith.constant 0 : index
    %c0_107 = arith.constant 0 : index
    %101 = vector.load %arg5[%c4_105, %c0_106, %c0_107] : memref<9x128x128xf32, #tpu.memory_space<vmem>>, vector<1x128x128xf32>
    %102 = vector.shape_cast %101 : vector<1x128x128xf32> to vector<128x128xf32>
    %cst_108 = arith.constant dense<0.000000e+00> : vector<256x128xf32>
    %103 = tpu.matmul %100, %102, %cst_108 {dimension_numbers = #tpu.dot_dimension_numbers<[1], [0], [0], [1], [0, 0, 1, 1], [], []>} : vector<256x128xf32>, vector<128x128xf32>, vector<256x128xf32> -> vector<256x128xf32>
    %104 = arith.addf %98, %103 : vector<256x128xf32>
    %c1_109 = arith.constant 1 : index
    %c2_110 = arith.constant 2 : index
    %c0_111 = arith.constant 0 : index
    %105 = vector.load %arg9[%c1_109, %c2_110, %c0_111] : memref<18x18x128xf32, #tpu.memory_space<vmem>>, vector<16x16x128xf32>
    %106 = vector.shape_cast %105 : vector<16x16x128xf32> to vector<256x128xf32>
    %c5_112 = arith.constant 5 : index
    %c0_113 = arith.constant 0 : index
    %c0_114 = arith.constant 0 : index
    %107 = vector.load %arg5[%c5_112, %c0_113, %c0_114] : memref<9x128x128xf32, #tpu.memory_space<vmem>>, vector<1x128x128xf32>
    %108 = vector.shape_cast %107 : vector<1x128x128xf32> to vector<128x128xf32>
    %cst_115 = arith.constant dense<0.000000e+00> : vector<256x128xf32>
    %109 = tpu.matmul %106, %108, %cst_115 {dimension_numbers = #tpu.dot_dimension_numbers<[1], [0], [0], [1], [0, 0, 1, 1], [], []>} : vector<256x128xf32>, vector<128x128xf32>, vector<256x128xf32> -> vector<256x128xf32>
    %110 = arith.addf %104, %109 : vector<256x128xf32>
    %c2_116 = arith.constant 2 : index
    %c0_117 = arith.constant 0 : index
    %c0_118 = arith.constant 0 : index
    %111 = vector.load %arg9[%c2_116, %c0_117, %c0_118] : memref<18x18x128xf32, #tpu.memory_space<vmem>>, vector<16x16x128xf32>
    %112 = vector.shape_cast %111 : vector<16x16x128xf32> to vector<256x128xf32>
    %c6_119 = arith.constant 6 : index
    %c0_120 = arith.constant 0 : index
    %c0_121 = arith.constant 0 : index
    %113 = vector.load %arg5[%c6_119, %c0_120, %c0_121] : memref<9x128x128xf32, #tpu.memory_space<vmem>>, vector<1x128x128xf32>
    %114 = vector.shape_cast %113 : vector<1x128x128xf32> to vector<128x128xf32>
    %cst_122 = arith.constant dense<0.000000e+00> : vector<256x128xf32>
    %115 = tpu.matmul %112, %114, %cst_122 {dimension_numbers = #tpu.dot_dimension_numbers<[1], [0], [0], [1], [0, 0, 1, 1], [], []>} : vector<256x128xf32>, vector<128x128xf32>, vector<256x128xf32> -> vector<256x128xf32>
    %116 = arith.addf %110, %115 : vector<256x128xf32>
    %c2_123 = arith.constant 2 : index
    %c1_124 = arith.constant 1 : index
    %c0_125 = arith.constant 0 : index
    %117 = vector.load %arg9[%c2_123, %c1_124, %c0_125] : memref<18x18x128xf32, #tpu.memory_space<vmem>>, vector<16x16x128xf32>
    %118 = vector.shape_cast %117 : vector<16x16x128xf32> to vector<256x128xf32>
    %c7_126 = arith.constant 7 : index
    %c0_127 = arith.constant 0 : index
    %c0_128 = arith.constant 0 : index
    %119 = vector.load %arg5[%c7_126, %c0_127, %c0_128] : memref<9x128x128xf32, #tpu.memory_space<vmem>>, vector<1x128x128xf32>
    %120 = vector.shape_cast %119 : vector<1x128x128xf32> to vector<128x128xf32>
    %cst_129 = arith.constant dense<0.000000e+00> : vector<256x128xf32>
    %121 = tpu.matmul %118, %120, %cst_129 {dimension_numbers = #tpu.dot_dimension_numbers<[1], [0], [0], [1], [0, 0, 1, 1], [], []>} : vector<256x128xf32>, vector<128x128xf32>, vector<256x128xf32> -> vector<256x128xf32>
    %122 = arith.addf %116, %121 : vector<256x128xf32>
    %c2_130 = arith.constant 2 : index
    %c2_131 = arith.constant 2 : index
    %c0_132 = arith.constant 0 : index
    %123 = vector.load %arg9[%c2_130, %c2_131, %c0_132] : memref<18x18x128xf32, #tpu.memory_space<vmem>>, vector<16x16x128xf32>
    %124 = vector.shape_cast %123 : vector<16x16x128xf32> to vector<256x128xf32>
    %c8_133 = arith.constant 8 : index
    %c0_134 = arith.constant 0 : index
    %c0_135 = arith.constant 0 : index
    %125 = vector.load %arg5[%c8_133, %c0_134, %c0_135] : memref<9x128x128xf32, #tpu.memory_space<vmem>>, vector<1x128x128xf32>
    %126 = vector.shape_cast %125 : vector<1x128x128xf32> to vector<128x128xf32>
    %cst_136 = arith.constant dense<0.000000e+00> : vector<256x128xf32>
    %127 = tpu.matmul %124, %126, %cst_136 {dimension_numbers = #tpu.dot_dimension_numbers<[1], [0], [0], [1], [0, 0, 1, 1], [], []>} : vector<256x128xf32>, vector<128x128xf32>, vector<256x128xf32> -> vector<256x128xf32>
    %128 = arith.addf %122, %127 : vector<256x128xf32>
    %c0_137 = arith.constant 0 : index
    %c0_138 = arith.constant 0 : index
    %129 = vector.load %arg6[%c0_137, %c0_138] : memref<1x128xf32, #tpu.memory_space<vmem>>, vector<1x128xf32>
    %130 = vector.shape_cast %129 : vector<1x128xf32> to vector<128xf32>
    %131 = vector.shape_cast %130 : vector<128xf32> to vector<1x128xf32>
    %132 = vector.broadcast %131 : vector<1x128xf32> to vector<256x128xf32>
    %133 = arith.mulf %128, %132 : vector<256x128xf32>
    %c0_139 = arith.constant 0 : index
    %c0_140 = arith.constant 0 : index
    %134 = vector.load %arg7[%c0_139, %c0_140] : memref<1x128xf32, #tpu.memory_space<vmem>>, vector<1x128xf32>
    %135 = vector.shape_cast %134 : vector<1x128xf32> to vector<128xf32>
    %136 = vector.shape_cast %135 : vector<128xf32> to vector<1x128xf32>
    %137 = vector.broadcast %136 : vector<1x128xf32> to vector<256x128xf32>
    %138 = arith.addf %133, %137 : vector<256x128xf32>
    %c0_141 = arith.constant 0 : index
    %c0_142 = arith.constant 0 : index
    %c0_143 = arith.constant 0 : index
    %c0_144 = arith.constant 0 : index
    %139 = vector.load %arg1[%c0_141, %c0_142, %c0_143, %c0_144] : memref<1x16x16x128xf32, #tpu.memory_space<vmem>>, vector<1x16x16x128xf32>
    %140 = vector.shape_cast %139 : vector<1x16x16x128xf32> to vector<16x16x128xf32>
    %141 = vector.shape_cast %140 : vector<16x16x128xf32> to vector<256x128xf32>
    %142 = arith.addf %138, %141 : vector<256x128xf32>
    %cst_145 = arith.constant 0.000000e+00 : f32
    %143 = vector.broadcast %cst_145 : f32 to vector<256x128xf32>
    %144 = arith.maximumf %142, %143 : vector<256x128xf32>
    %145 = vector.shape_cast %144 : vector<256x128xf32> to vector<16x16x128xf32>
    %c0_146 = arith.constant 0 : index
    %c0_147 = arith.constant 0 : index
    %c0_148 = arith.constant 0 : index
    %c0_149 = arith.constant 0 : index
    %146 = vector.load %arg8[%c0_146, %c0_147, %c0_148, %c0_149] : memref<1x16x16x128xf32, #tpu.memory_space<vmem>>, vector<1x16x16x128xf32>
    %147 = vector.shape_cast %146 : vector<1x16x16x128xf32> to vector<16x16x128xf32>
    %148 = vector.shape_cast %145 : vector<16x16x128xf32> to vector<1x16x16x128xf32>
    tpu.vector_store %arg8[%c0_146, %c0_147, %c0_148, %c0_149], %148 {strides = array<i32>} : memref<1x16x16x128xf32, #tpu.memory_space<vmem>>, vector<1x16x16x128xf32>,
    return
  }
  func.func @transform_0(%arg0: i32) -> (i32, i32, i32, i32) {
    %c0_i32 = arith.constant 0 : i32
    %c0_i32_0 = arith.constant 0 : i32
    %c0_i32_1 = arith.constant 0 : i32
    %c0_i32_2 = arith.constant 0 : i32
    return %arg0, %c0_i32, %c0_i32_0, %c0_i32_1 : i32, i32, i32, i32
  }
  func.func @transform_1(%arg0: i32) -> (i32, i32, i32) {
    %c0_i32 = arith.constant 0 : i32
    %c0_i32_0 = arith.constant 0 : i32
    %c0_i32_1 = arith.constant 0 : i32
    %c0_i32_2 = arith.constant 0 : i32
    return %c0_i32, %c0_i32_0, %c0_i32_1 : i32, i32, i32
  }
  func.func @transform_2(%arg0: i32) -> (i32, i32) {
    %c0_i32 = arith.constant 0 : i32
    %c0_i32_0 = arith.constant 0 : i32
    %c0_i32_1 = arith.constant 0 : i32
    return %c0_i32, %c0_i32_0 : i32, i32
  }
  func.func @transform_3(%arg0: i32) -> (i32, i32) {
    %c0_i32 = arith.constant 0 : i32
    %c0_i32_0 = arith.constant 0 : i32
    %c0_i32_1 = arith.constant 0 : i32
    return %c0_i32, %c0_i32_0 : i32, i32
  }
  func.func @transform_4(%arg0: i32) -> (i32, i32, i32) {
    %c0_i32 = arith.constant 0 : i32
    %c0_i32_0 = arith.constant 0 : i32
    %c0_i32_1 = arith.constant 0 : i32
    %c0_i32_2 = arith.constant 0 : i32
    return %c0_i32, %c0_i32_0, %c0_i32_1 : i32, i32, i32
  }
  func.func @transform_5(%arg0: i32) -> (i32, i32) {
    %c0_i32 = arith.constant 0 : i32
    %c0_i32_0 = arith.constant 0 : i32
    %c0_i32_1 = arith.constant 0 : i32
    return %c0_i32, %c0_i32_0 : i32, i32
  }
  func.func @transform_6(%arg0: i32) -> (i32, i32) {
    %c0_i32 = arith.constant 0 : i32
    %c0_i32_0 = arith.constant 0 : i32
    %c0_i32_1 = arith.constant 0 : i32
    return %c0_i32, %c0_i32_0 : i32, i32
  }
  func.func @transform_7(%arg0: i32) -> (i32, i32, i32, i32) {
    %c0_i32 = arith.constant 0 : i32
    %c0_i32_0 = arith.constant 0 : i32
    %c0_i32_1 = arith.constant 0 : i32
    %c0_i32_2 = arith.constant 0 : i32
    return %arg0, %c0_i32, %c0_i32_0, %c0_i32_1 : i32, i32, i32, i32
  }
}

</mosaic_0001>

<bundles_post_ra>
// kernel: tpu_custom_call.1
= control target key start
LH: loop header
LB: loop body
LE: loop exit
PB: predicated region body
PF: predicated region fallthrough
CT: control target
= control target key end

     0   :  { %12 = vsyncpa [#allocation4], 0  ;;  %s11405_s0 = inlined_call_operand.hbm [shape: f32[2,16,16,128], index: 0, kind: input, shape index: {}]   ;;  %s11406_s1 = inlined_call_operand.hbm [shape: f32[9,128,128], index: 1, kind: input, shape index: {}]   ;;  %s11407_s2 = inlined_call_operand.vmem [shape: f32[1,128], index: 2, kind: input, shape index: {}]   ;;  %s11408_s3 = inlined_call_operand.vmem [shape: f32[1,128], index: 3, kind: input, shape index: {}]   ;;  %s11409_s4 = inlined_call_operand.hbm [shape: f32[9,128,128], index: 4, kind: input, shape index: {}]   ;;  %s11410_s5 = inlined_call_operand.vmem [shape: f32[1,128], index: 5, kind: input, shape index: {}]   ;;  %s11411_s6 = inlined_call_operand.vmem [shape: f32[1,128], index: 6, kind: input, shape index: {}]   ;;  %s11412_s7 = inlined_call_operand.hbm [shape: f32[2,16,16,128], index: 7, kind: output, shape index: {}]  }
   0x1   :  { %14 = vsyncpa [#allocation4 + $0x1], 0 }
   0x2   :  { %15 = vsyncpa [#allocation7], 0 }
   0x3   :  { %16 = vsyncpa [#allocation5], 0 }
   0x4   :  { %18 = vsyncpa [#allocation5 + $0x1], 0  ;;  %s9977_s24 = smov 0   ;;  %s9979_s25 = smov 0  }
   0x5   :  { %s9981_s26 = smov 0   ;;  %s9983_s27 = smov 0  }
   0x6 LB: > { %s9998_s28 = sadd.s32 4294967295, %s9926_s27   ;;  %s6278_s29 = sadd.s32 4294967294, %s9926_s27   ;;  %s9926_s27 = sphi %s9983_s27, %s11654_s27   ;;  %s9922_s26 = sphi %s9981_s26, %s11653_s26   ;;  %s9918_s25 = sphi %s9979_s25, %s11652_s25   ;;  %s9914_s24 = sphi %s9977_s24, %s11651_s24  }
   0x7   : > { %p44_p0 = scmp.ne.s32.totalorder %s9918_s25, %s9914_s24  ;;  %p11413_p1 = scmp.eq.s32.totalorder %s9998_s28, 0 }
   0x8   : > { %p200_p3 = scmp.eq.s32.totalorder %s6278_s29, 1  ;;  %p6279_p5 = scmp.ge.s32.totalorder %s9926_s27, 1 }
   0x9   : > { %p10007_p4 = por %p11413_p1, %p44_p0  ;;  %p207_p7 = scmp.lt.s32.totalorder %s9926_s27, 3 }
   0xa   : > { %p10012_p6 = por %p200_p3, %p44_p0  ;;  %s9928_s10 = smov [#allocation6]  }
   0xb   : > { %s11491_s30 = scalar_select %p10007_p4, 1, 0 }
   0xc   : > { %s11492_s8 = scalar_select %p10012_p6, 1, 0 }
   0xd   : > { %p10017_p8 = pnand %p6279_p5, %p207_p7  ;;  %s219_s11 = sshll.u32 %s9928_s10, 4  ;;  %s10021_s11 = int_to_ptr.vmem [resolvable:$true] %s219_s11 }
   0xe   : > { %s9929_s13 = smov [#allocation8]   ;;  %s9770_s17 = scalar_lea.hbm %s11406_s1, 18432 }
   0xf   : > { %p9706_p9 = pneg %p10017_p8  ;;  %s238_s14 = sshll.u32 %s9929_s13, 4  ;;  %s10032_s14 = int_to_ptr.vmem [resolvable:$true] %s238_s14 }
  0x10   : > { %p9771_p12 = scmp.ne.s32.totalorder %s11406_s1, %s9770_s17  ;;  %p9777_p5 = scmp.lt.u32.totalorder %s9770_s17, %s11406_s1 }
  0x11   : > { %p10028_p11 = pnand %p9706_p9, %p11413_p1 }
  0x13   : > { %p9772_p13 = pneg %p10028_p11 }
  0x15   : > { %p9773_p0 = pnand %p9772_p13, %p9771_p12 }
  0x17   : > { %p9774_p3 = pneg %p9773_p0 }
  0x19   : > { %p9779_p7 = pnand %p9777_p5, %p9774_p3 }
  0x1b   : > { %9782 = shalt.err (!%p9779_p7)
}
  0x1c   : > { %s9783_s22 = scalar_lea.vmem %s10021_s11, 18432  ;;  %p9791_p2 = scmp.lt.s32.totalorder %s10021_s11, %s10021_s11 }
  0x1d   : > { %p9784_p9 = scmp.ne.s32.totalorder %s10021_s11, %s9783_s22  ;;  %p9792_p12 = scmp.lt.s32.totalorder %s9783_s22, %s9783_s22 }
  0x1f   : > { %p9786_p10 = pnand %p9784_p9, %p9772_p13  ;;  %p9793_p0 = por %p9792_p12, %p9791_p2 }
  0x21   : > { %p9787_p1 = pneg %p9786_p10 }
  0x23   : > { %p9794_p6 = pnand %p9793_p0, %p9787_p1 }
  0x25   : > { %9797 = shalt.err (!%p9794_p6)
}
  0x26   : > { %s11414_s23 = smov 128   ;;  %s9931_s29 = smov 8  }
  0x27   : > { %9709 = dma.hbm_to_vmem [thread:$0]  (!%p10028_p11), %s11406_s1, 18432, %s10021_s11, [#allocation7], %s11414_s23, %s11414_s23, %s9931_s29  }
  0x28   : > { %s9798_s17 = scalar_lea.hbm %s11409_s4, 18432 }
  0x29   : > { %p9799_p1 = scmp.ne.s32.totalorder %s11409_s4, %s9798_s17  ;;  %p9805_p10 = scmp.lt.u32.totalorder %s9798_s17, %s11409_s4 }
  0x2b   : > { %p9801_p2 = pnand %p9799_p1, %p9772_p13 }
  0x2d   : > { %p9802_p6 = pneg %p9801_p2 }
  0x2f   : > { %p9807_p3 = pnand %p9805_p10, %p9802_p6 }
  0x31   : > { %9810 = shalt.err (!%p9807_p3)
}
  0x32   : > { %s9811_s11 = scalar_lea.vmem %s10032_s14, 18432  ;;  %p9819_p12 = scmp.lt.s32.totalorder %s10032_s14, %s10032_s14 }
  0x33   : > { %p9812_p5 = scmp.ne.s32.totalorder %s10032_s14, %s9811_s11  ;;  %p9820_p0 = scmp.lt.s32.totalorder %s9811_s11, %s9811_s11 }
  0x35   : > { %p9814_p7 = pnand %p9812_p5, %p9772_p13  ;;  %p9821_p1 = por %p9820_p0, %p9819_p12 }
  0x37   : > { %p9815_p9 = pneg %p9814_p7 }
  0x39   : > { %p9822_p2 = pnand %p9821_p1, %p9815_p9 }
  0x3b   : > { %9825 = shalt.err (!%p9822_p2)
}
  0x3c   : > { %9712 = dma.hbm_to_vmem [thread:$0]  (!%p10028_p11), %s11409_s4, 18432, %s10032_s14, [#allocation7], %s11414_s23, %s11414_s23, %s9931_s29  }
  0x3d   : > { %s10093_s12 = sadd.s32 1, %s9926_s27   ;;  %s31_s13 = sadd.s32 1, %s9922_s26 }
  0x3e   : > { %s28_s15 = ssub.s32 %s9926_s27, %s10093_s12  ;;  %p38_p13 = scmp.ne.s32.totalorder %s9922_s26, %s9918_s25 }
  0x3f   : > { %p29_p6 = scmp.eq.s32.totalorder %s28_s15, 0  ;;  %p39_p10 = scmp.eq.s32.totalorder %s9926_s27, 0 }
  0x40   : > { %p11495_p3 = scmp.eq.s32.totalorder %s9998_s28, 1  ;;  %p9723_p7 = scmp.lt.s32.totalorder %s9926_s27, 2 }
  0x41   : > { %s10109_s17 = scalar_select %p29_p6, %s9922_s26, %s31_s13  }
  0x42   : > { %p10103_p5 = por %p11495_p3, %p38_p13  ;;  %p40_p9 = por %p39_p10, %p38_p13 }
  0x43   : > { %s258_s18 = sand.u32 1, %s9922_s26   ;;  %s6300_s14 = sshll.u32 %s9926_s27, 12 }
  0x44   : > { %s11496_s16 = scalar_select %p10103_p5, 1, 0 }
  0x45   : > { %s6283_s19 = sshll.u32 %s258_s18, 8  ;;  %s10116_s11 = scalar_lea.hbm %s11405_s0, %s6300_s14 }
  0x46   : > { %s262_s22 = scalar_lea.vmem [#allocation3], %s6283_s19  ;;  %p10120_p11 = pnand %p9723_p7, %p40_p9 }
  0x47   : > { %s269_s10 = sshll.u32 %s262_s22, 4  ;;  %s10124_s15 = scalar_lea.sflag [#allocation4], %s258_s18  ;;  %s10118_s10 = int_to_ptr.vmem [resolvable:$true] %s269_s10 }
  0x48   : > { %s9826_s23 = scalar_lea.hbm %s10116_s11, 4096  ;;  %p9828_p0 = pneg %p10120_p11 }
  0x49   : > { %p9827_p12 = scmp.ne.s32.totalorder %s10116_s11, %s9826_s23  ;;  %s9831_s20 = scalar_lea.hbm %s11405_s0, 8192 }
  0x4a   : > { %p9832_p13 = scmp.lt.u32.totalorder %s10116_s11, %s11405_s0  ;;  %p9833_p6 = scmp.lt.u32.totalorder %s9831_s20, %s9826_s23 }
  0x4b   : > { %p9829_p1 = pnand %p9828_p0, %p9827_p12  ;;  %p9835_p3 = scmp.lt.u32.totalorder %s9826_s23, %s10116_s11 }
  0x4c   : > { %p9834_p10 = por %p9833_p6, %p9832_p13 }
  0x4d   : > { %p9830_p2 = pneg %p9829_p1 }
  0x4e   : > { %p9836_p7 = por %p9835_p3, %p9834_p10 }
  0x50   : > { %p9837_p9 = pnand %p9836_p7, %p9830_p2 }
  0x52   : > { %9840 = shalt.err (!%p9837_p9)
}
  0x53   : > { %s9841_s18 = scalar_lea.vmem %s10118_s10, 4096  ;;  %s9932_s19 = smov [#allocation3]  }
  0x54   : > { %p9842_p12 = scmp.ne.s32.totalorder %s10118_s10, %s9841_s18  ;;  %s9846_s14 = sshll.u32 %s9932_s19, 4  ;;  %s9847_s14 = int_to_ptr.vmem [resolvable:$false] %s9846_s14 }
  0x55   : > { %s9848_s21 = scalar_lea.vmem %s9847_s14, 8192  ;;  %p9849_p4 = scmp.lt.s32.totalorder %s10118_s10, %s9847_s14 }
  0x56   : > { %p9844_p1 = pnand %p9842_p12, %p9828_p0  ;;  %p9850_p13 = scmp.lt.s32.totalorder %s9848_s21, %s9841_s18 }
  0x58   : > { %p9845_p5 = pneg %p9844_p1  ;;  %p9851_p6 = por %p9850_p13, %p9849_p4 }
  0x5a   : > { %p9852_p10 = pnand %p9851_p6, %p9845_p5 }
  0x5c   : > { %9855 = shalt.err (!%p9852_p10)
}
  0x5d   : > { %s11498_s23 = smov 128   ;;  %281 = sbr.rel (%p10017_p8) target bundleno = 1678 (0x68e), region = 48 }
  0x5e   : > { %9716 = dma.hbm_to_vmem [thread:$0]  (!%p10120_p11), %s10116_s11, 4096, %s10118_s10, %s10124_s15, %s11498_s23, %s11498_s23, %s9931_s29  }
  0x64   : > { %s10158_s20 = sand.u32 1, %s9918_s25   ;;  %p11499_p4 = scmp.ne.s32.totalorder %s11491_s30, 0 }
  0x65   : > { %s6287_s22 = sshll.u32 %s10158_s20, 8  ;;  %s284_s18 = scalar_lea.sflag [#allocation4], %s10158_s20 }
  0x66   : > { %s10164_s13 = scalar_lea.vmem [#allocation3], %s6287_s22 }
  0x67   : > { %9901 = dma.done.wait (%p11499_p4), %s284_s18, 4096  }
  0x68   : > { %9903 = vsyncadd (%p11499_p4), %s284_s18, 4294963200  ;;  %p11500_p5 = scmp.eq.s32.totalorder %s9998_s28, 0 }
  0x6a   : > { %9905 = dma.done.wait (%p11500_p5), [#allocation7], 36864   ;;  %p11501_p8 = pmov %p11500_p5 }
  0x6b   : > { %v9933_v0 = vmov 0.0   ;;  %v526_v1 = vld [vmem:[#allocation6 + $0x80] sm:$0xff]  ;;  %v527_v2 = vld [vmem:[#allocation6 + $0x88] sm:$0xff]  ;;  %v528_v3 = vld [vmem:[#allocation6 + $0x90] sm:$0xff]  ;;  %s11236_s21 = scalar_lea.vmem [#allocation9], %s6287_s22  ;;  %s6301_s23 = sshll.u32 %s9998_s28, 12 }
  0x6c   : > { %9907 = vsyncadd (%p11501_p8), [#allocation7], 4294930432  ;;  %326 = vst [vmem:[#allocation2] sm:$0xff] %v9933_v0  ;;  %v8606_v4 = vpack.c.bf16 %v527_v2, %v526_v1  ;;  %v529_v5 = vld [vmem:[#allocation6 + $0x98] sm:$0xff]  ;;  %v530_v7 = vld [vmem:[#allocation6 + $0xa0] sm:$0xff]  ;;  %s6186_s22 = sshll.u32 %s11236_s21, 4  ;;  %s11357_s9 = scalar_lea.hbm %s11412_s7, %s6301_s23  ;;  %s11359_s22 = int_to_ptr.vmem [resolvable:$true] %s6186_s22 }
  0x6d   : > { %327 = vst [vmem:[#allocation2 + $0x8] sm:$0xff] %v9933_v0  ;;  %328 = vst [vmem:[#allocation2 + $0x10] sm:$0x3] %v9933_v0  ;;  %v8610_v6 = vpack.c.bf16 %v529_v5, %v528_v3  ;;  %v531_v8 = vld [vmem:[#allocation6 + $0xa8] sm:$0xff]  ;;  %v532_v11 = vld [vmem:[#allocation6 + $0xb0] sm:$0xff]  ;;  %s6173_s28 = scalar_lea.sflag [#allocation5], %s10158_s20 }
  0x6e   : > { %329 = vst [vmem:[#allocation2 + $0x18] sm:$0xff] %v9933_v0  ;;  %330 = vst [vmem:[#allocation2 + $0x20] sm:$0xff] %v9933_v0  ;;  %8607 = vmatprep.subr.bf16.mxu0 %v8606_v4  ;;  %v8614_v9 = vpack.c.bf16 %v531_v8, %v530_v7  ;;  %v533_v12 = vld [vmem:[#allocation6 + $0xb8] sm:$0xff]  ;;  %v10229_v13 = vld [vmem:[%s10164_s13] sm:$0xff]  ;;  %p11648_p0 = scmp.ne.s32.totalorder %s11496_s16, 0  ;;  %s9934_s29 = smov [#allocation9]  }
  0x6f   : > { %331 = vst [vmem:[#allocation2 + $0x28] sm:$0x3] %v9933_v0  ;;  %332 = vst [vmem:[#allocation2 + $0x30] sm:$0xff] %v9933_v0  ;;  %8609 = vmatpush3.bf16.msra.mxu0 %v8606_v4  ;;  %v10233_v14 = vld [vmem:[%s10164_s13 + $0x8] sm:$0xff]  ;;  %v10236_v15 = vld [vmem:[%s10164_s13 + $0x10] sm:$0xff]  ;;  %v8618_v18 = vpack.c.bf16 %v533_v12, %v532_v11  ;;  %s9860_s11 = sshll.u32 %s9934_s29, 4  ;;  %s9861_s11 = int_to_ptr.vmem [resolvable:$false] %s9860_s11 }
  0x70   : > { %333 = vst [vmem:[#allocation2 + $0x38] sm:$0xff] %v9933_v0  ;;  %334 = vst [vmem:[#allocation2 + $0x40] sm:$0x3] %v9933_v0  ;;  %8611 = vmatprep.subr.bf16.mxu0 %v8610_v6  ;;  %v10239_v16 = vld [vmem:[%s10164_s13 + $0x18] sm:$0xff]  ;;  %v10245_v17 = vld [vmem:[%s10164_s13 + $0x20] sm:$0xff]  ;;  %s9862_s10 = scalar_lea.vmem %s9861_s11, 8192  ;;  %p9863_p7 = scmp.lt.s32.totalorder %s11359_s22, %s9861_s11 }
  0x71   : > { %335 = vst [vmem:[#allocation2 + $0x48] sm:$0xff] %v9933_v0  ;;  %336 = vst [vmem:[#allocation2 + $0x50] sm:$0xff] %v9933_v0  ;;  %v10249_v19 = vld [vmem:[%s10164_s13 + $0x28] sm:$0xff]  ;;  %v10252_v20 = vld [vmem:[%s10164_s13 + $0x30] sm:$0xff] }
  0x72   : > { %337 = vst [vmem:[#allocation2 + $0x58] sm:$0x3] %v9933_v0  ;;  %338 = vst [vmem:[#allocation2 + $0x60] sm:$0xff] %v9933_v0  ;;  %v10255_v21 = vld [vmem:[%s10164_s13 + $0x38] sm:$0xff]  ;;  %v534_v22 = vld [vmem:[#allocation6 + $0xc0] sm:$0xff] }
  0x73   : > { %339 = vst [vmem:[#allocation2 + $0x68] sm:$0xff] %v9933_v0  ;;  %340 = vst [vmem:[#allocation2 + $0x70] sm:$0x3] %v9933_v0  ;;  %8613 = vmatpush3.bf16.msra.mxu0 %v8610_v6  ;;  %v535_v23 = vld [vmem:[#allocation6 + $0xc8] sm:$0xff]  ;;  %v10261_v24 = vld [vmem:[%s10164_s13 + $0x40] sm:$0xff] }
  0x74   : > { %341 = vst [vmem:[#allocation2 + $0x78] sm:$0xff] %v9933_v0  ;;  %342 = vst [vmem:[#allocation2 + $0x80] sm:$0xff] %v9933_v0  ;;  %v493_v10 = vld [vmem:[#allocation2 + $0x1] sm:$0xff]  ;;  %8615 = vmatprep.subr.bf16.mxu0 %v8614_v9  ;;  %v10265_v25 = vld [vmem:[%s10164_s13 + $0x48] sm:$0xff]  ;;  %v8622_v29 = vpack.c.bf16 %v535_v23, %v534_v22 }
  0x75   : > { %343 = vst [vmem:[#allocation2 + $0x88] sm:$0x3] %v9933_v0  ;;  %344 = vst [vmem:[#allocation2 + $0x90] sm:$0xff] %v9933_v0  ;;  %7198 = vmatprep.mubr.f32.mxu0 %v493_v10  ;;  %v10268_v26 = vld [vmem:[%s10164_s13 + $0x50] sm:$0xff]  ;;  %v10271_v27 = vld [vmem:[%s10164_s13 + $0x58] sm:$0xff] }
  0x76   : > { %345 = vst [vmem:[#allocation2 + $0x98] sm:$0xff] %v9933_v0  ;;  %346 = vst [vmem:[#allocation2 + $0xa0] sm:$0x3] %v9933_v0  ;;  %v10277_v28 = vld [vmem:[%s10164_s13 + $0x60] sm:$0xff]  ;;  %v10281_v30 = vld [vmem:[%s10164_s13 + $0x68] sm:$0xff] }
  0x77   : > { %347 = vst [vmem:[#allocation2 + $0xa8] sm:$0xff] %v9933_v0  ;;  %348 = vst [vmem:[#allocation2 + $0xb0] sm:$0xff] %v9933_v0  ;;  %8617 = vmatpush3.bf16.msra.mxu0 %v8614_v9  ;;  %v10284_v31 = vld [vmem:[%s10164_s13 + $0x70] sm:$0xff]  ;;  %v10287_v32 = vld [vmem:[%s10164_s13 + $0x78] sm:$0xff] }
  0x78   : > { %349 = vst [vmem:[#allocation2 + $0xb8] sm:$0x3] %v9933_v0  ;;  %350 = vst [vmem:[#allocation2 + $0xc0] sm:$0xff] %v9933_v0  ;;  %8619 = vmatprep.subr.bf16.mxu0 %v8618_v18  ;;  %v536_v33 = vld [vmem:[#allocation6 + $0xd0] sm:$0xff]  ;;  %v537_v34 = vld [vmem:[#allocation6 + $0xd8] sm:$0xff] }
  0x79   : > { %351 = vst [vmem:[#allocation2 + $0xc8] sm:$0xff] %v9933_v0  ;;  %352 = vst [vmem:[#allocation2 + $0xd0] sm:$0x3] %v9933_v0  ;;  %v10293_v35 = vld [vmem:[%s10164_s13 + $0x80] sm:$0xff]  ;;  %v10297_v36 = vld [vmem:[%s10164_s13 + $0x88] sm:$0xff]  ;;  %v8626_v40 = vpack.c.bf16 %v537_v34, %v536_v33 }
  0x7a   : > { %353 = vst [vmem:[#allocation2 + $0xd8] sm:$0xff] %v9933_v0  ;;  %354 = vst [vmem:[#allocation2 + $0xe0] sm:$0xff] %v9933_v0  ;;  %v10300_v37 = vld [vmem:[%s10164_s13 + $0x90] sm:$0xff]  ;;  %v10303_v38 = vld [vmem:[%s10164_s13 + $0x98] sm:$0xff] }
  0x7b   : > { %355 = vst [vmem:[#allocation2 + $0xe8] sm:$0x3] %v9933_v0  ;;  %356 = vst [vmem:[#allocation2 + $0xf0] sm:$0xff] %v9933_v0  ;;  %8621 = vmatpush3.bf16.msra.mxu0 %v8618_v18  ;;  %v10309_v39 = vld [vmem:[%s10164_s13 + $0xa0] sm:$0xff]  ;;  %v10313_v41 = vld [vmem:[%s10164_s13 + $0xa8] sm:$0xff] }
  0x7c   : > { %357 = vst [vmem:[#allocation2 + $0xf8] sm:$0xff] %v9933_v0  ;;  %358 = vst [vmem:[#allocation2 + $0x100] sm:$0x3] %v9933_v0  ;;  %8623 = vmatprep.subr.bf16.mxu0 %v8622_v29  ;;  %v10316_v42 = vld [vmem:[%s10164_s13 + $0xb0] sm:$0xff]  ;;  %v10319_v43 = vld [vmem:[%s10164_s13 + $0xb8] sm:$0xff] }
  0x7d   : > { %359 = vst [vmem:[#allocation2 + $0x108] sm:$0xff] %v9933_v0  ;;  %360 = vst [vmem:[#allocation2 + $0x110] sm:$0xff] %v9933_v0  ;;  %v538_v44 = vld [vmem:[#allocation6 + $0xe0] sm:$0xff]  ;;  %v539_v45 = vld [vmem:[#allocation6 + $0xe8] sm:$0xff] }
  0x7e   : > { %361 = vst [vmem:[#allocation2 + $0x118] sm:$0x3] %v9933_v0  ;;  %362 = vst [vmem:[#allocation2 + $0x120] sm:$0xff] %v9933_v0  ;;  %v10325_v46 = vld [vmem:[%s10164_s13 + $0xc0] sm:$0xff]  ;;  %v10329_v47 = vld [vmem:[%s10164_s13 + $0xc8] sm:$0xff]  ;;  %v8630_v51 = vpack.c.bf16 %v539_v45, %v538_v44 }
  0x7f   : > { %363 = vst [vmem:[#allocation2 + $0x128] sm:$0xff] %v9933_v0  ;;  %364 = vst [vmem:[#allocation2 + $0x130] sm:$0x3] %v9933_v0  ;;  %v10332_v48 = vld [vmem:[%s10164_s13 + $0xd0] sm:$0xff]  ;;  %v10335_v49 = vld [vmem:[%s10164_s13 + $0xd8] sm:$0xff]  ;;  %8625 = vmatpush3.bf16.msra.mxu0 %v8622_v29 }
  0x80   : > { %365 = vst [vmem:[#allocation2 + $0x138] sm:$0xff] %v9933_v0  ;;  %366 = vst [vmem:[#allocation2 + $0x140] sm:$0xff] %v9933_v0  ;;  %v10341_v50 = vld [vmem:[%s10164_s13 + $0xe0] sm:$0xff]  ;;  %8627 = vmatprep.subr.bf16.mxu0 %v8626_v40  ;;  %v10345_v52 = vld [vmem:[%s10164_s13 + $0xe8] sm:$0xff] }
  0x81   : > { %367 = vst [vmem:[#allocation2 + $0x148] sm:$0x3] %v9933_v0  ;;  %368 = vst [vmem:[#allocation2 + $0x150] sm:$0xff] %v9933_v0  ;;  %v540_v53 = vld [vmem:[#allocation6 + $0xf0] sm:$0xff]  ;;  %v541_v54 = vld [vmem:[#allocation6 + $0xf8] sm:$0xff] }
  0x82   : > { %369 = vst [vmem:[#allocation2 + $0x158] sm:$0xff] %v9933_v0  ;;  %370 = vst [vmem:[#allocation2 + $0x160] sm:$0x3] %v9933_v0  ;;  %v8634_v55 = vpack.c.bf16 %v541_v54, %v540_v53  ;;  %v477_v56 = vld [vmem:[#allocation6] sm:$0xff]  ;;  %v478_v57 = vld [vmem:[#allocation6 + $0x8] sm:$0xff] }
  0x83   : > { %371 = vst [vmem:[#allocation2 + $0x168] sm:$0xff] %v9933_v0  ;;  %372 = vst [vmem:[#allocation2 + $0x170] sm:$0xff] %v9933_v0  ;;  %8629 = vmatpush3.bf16.msra.mxu0 %v8626_v40  ;;  %v8638_v58 = vpack.c.bf16 %v478_v57, %v477_v56  ;;  %v479_v59 = vld [vmem:[#allocation6 + $0x10] sm:$0xff]  ;;  %v480_v60 = vld [vmem:[#allocation6 + $0x18] sm:$0xff] }
  0x84   : > { %373 = vst [vmem:[#allocation2 + $0x178] sm:$0x3] %v9933_v0  ;;  %374 = vst [vmem:[#allocation2 + $0x180] sm:$0xff] %v9933_v0  ;;  %8631 = vmatprep.subr.bf16.mxu0 %v8630_v51  ;;  %v494_v61 = vld [vmem:[#allocation2 + $0x9] sm:$0xff]  ;;  %v8642_v62 = vpack.c.bf16 %v480_v60, %v479_v59  ;;  %v482_v1 = vld [vmem:[#allocation6 + $0x28] sm:$0xff] }
  0x85   : > { %375 = vst [vmem:[#allocation2 + $0x188] sm:$0xff] %v9933_v0  ;;  %376 = vst [vmem:[#allocation2 + $0x190] sm:$0x3] %v9933_v0  ;;  %v481_v63 = vld [vmem:[#allocation6 + $0x20] sm:$0xff]  ;;  %v483_v3 = vld [vmem:[#allocation6 + $0x30] sm:$0xff] }
  0x86   : > { %377 = vst [vmem:[#allocation2 + $0x198] sm:$0xff] %v9933_v0  ;;  %378 = vst [vmem:[#allocation2 + $0x1a0] sm:$0xff] %v9933_v0  ;;  %v8646_v2 = vpack.c.bf16 %v482_v1, %v481_v63  ;;  %v484_v4 = vld [vmem:[#allocation6 + $0x38] sm:$0xff]  ;;  %v485_v6 = vld [vmem:[#allocation6 + $0x40] sm:$0xff] }
  0x87   : > { %379 = vst [vmem:[#allocation2 + $0x1a8] sm:$0x3] %v9933_v0  ;;  %413 = vst [vmem:[#allocation2 + $0x19] sm:$0xff] %v10229_v13  ;;  %8633 = vmatpush3.bf16.msra.mxu0 %v8630_v51  ;;  %v8650_v5 = vpack.c.bf16 %v484_v4, %v483_v3  ;;  %v486_v7 = vld [vmem:[#allocation6 + $0x48] sm:$0xff]  ;;  %v487_v9 = vld [vmem:[#allocation6 + $0x50] sm:$0xff] }
  0x88   : > { %414 = vst [vmem:[#allocation2 + $0x21] sm:$0xff] %v10233_v14  ;;  %415 = vst [vmem:[#allocation2 + $0x31] sm:$0xff] %v10236_v15  ;;  %8635 = vmatprep.subr.bf16.mxu0 %v8634_v55  ;;  %v8654_v8 = vpack.c.bf16 %v486_v7, %v485_v6  ;;  %v488_v10 = vld [vmem:[#allocation6 + $0x58] sm:$0xff]  ;;  %v489_v12 = vld [vmem:[#allocation6 + $0x60] sm:$0xff] }
  0x89   : > { %416 = vst [vmem:[#allocation2 + $0x39] sm:$0xff] %v10239_v16  ;;  %417 = vst [vmem:[#allocation2 + $0x49] sm:$0xff] %v10245_v17  ;;  %v8658_v11 = vpack.c.bf16 %v488_v10, %v487_v9  ;;  %v490_v18 = vld [vmem:[#allocation6 + $0x68] sm:$0xff]  ;;  %v491_v23 = vld [vmem:[#allocation6 + $0x70] sm:$0xff] }
  0x8a   : > { %418 = vst [vmem:[#allocation2 + $0x51] sm:$0xff] %v10249_v19  ;;  %419 = vst [vmem:[#allocation2 + $0x61] sm:$0xff] %v10252_v20  ;;  %v8662_v22 = vpack.c.bf16 %v490_v18, %v489_v12  ;;  %v492_v29 = vld [vmem:[#allocation6 + $0x78] sm:$0xff]  ;;  %v1025_v34 = vld [vmem:[#allocation6 + $0x100] sm:$0xff] }
  0x8b   : > { %420 = vst [vmem:[#allocation2 + $0x69] sm:$0xff] %v10255_v21  ;;  %421 = vst [vmem:[#allocation2 + $0x79] sm:$0xff] %v10261_v24  ;;  %8637 = vmatpush3.bf16.msra.mxu0 %v8634_v55  ;;  %v8666_v33 = vpack.c.bf16 %v492_v29, %v491_v23  ;;  %v1026_v40 = vld [vmem:[#allocation6 + $0x108] sm:$0xff]  ;;  %v1027_v45 = vld [vmem:[#allocation6 + $0x110] sm:$0xff] }
  0x8c   : > { %422 = vst [vmem:[#allocation2 + $0x81] sm:$0xff] %v10265_v25  ;;  %423 = vst [vmem:[#allocation2 + $0x91] sm:$0xff] %v10268_v26  ;;  %8639 = vmatprep.subr.bf16.mxu0 %v8638_v58  ;;  %v8670_v44 = vpack.c.bf16 %v1026_v40, %v1025_v34  ;;  %v1028_v51 = vld [vmem:[#allocation6 + $0x118] sm:$0xff]  ;;  %v1029_v55 = vld [vmem:[#allocation6 + $0x120] sm:$0xff] }
  0x8d   : > { %424 = vst [vmem:[#allocation2 + $0x99] sm:$0xff] %v10271_v27  ;;  %425 = vst [vmem:[#allocation2 + $0xa9] sm:$0xff] %v10277_v28  ;;  %v8674_v54 = vpack.c.bf16 %v1028_v51, %v1027_v45  ;;  %v1030_v56 = vld [vmem:[#allocation6 + $0x128] sm:$0xff]  ;;  %v1031_v60 = vld [vmem:[#allocation6 + $0x130] sm:$0xff] }
  0x8e   : > { %426 = vst [vmem:[#allocation2 + $0xb1] sm:$0xff] %v10281_v30  ;;  %427 = vst [vmem:[#allocation2 + $0xc1] sm:$0xff] %v10284_v31  ;;  %7199 = vmatmul.mubr.f32.vlgmr.msra.gmra.mrb[0].mxu0 %v494_v61  ;;  %v10379_v53 = vld [vmem:[#allocation2 + $0x18] sm:$0xff]  ;;  %v8678_v59 = vpack.c.bf16 %v1030_v56, %v1029_v55  ;;  %v1032_v61 = vld [vmem:[#allocation6 + $0x138] sm:$0xff] }
  0x8f   : > { %428 = vst [vmem:[#allocation2 + $0xc9] sm:$0xff] %v10287_v32  ;;  %429 = vst [vmem:[#allocation2 + $0xd9] sm:$0xff] %v10293_v35  ;;  %8641 = vmatpush3.bf16.msra.mxu0 %v8638_v58  ;;  %7201 = vmatprep.mubr.f32.mxu0 %v10229_v13  ;;  %v10383_v57 = vld [vmem:[#allocation2 + $0x20] sm:$0xff]  ;;  %v10385_v58 = vld [vmem:[#allocation2 + $0x30] sm:$0xff] }
  0x90   : > { %430 = vst [vmem:[#allocation2 + $0xe1] sm:$0xff] %v10297_v36  ;;  %431 = vst [vmem:[#allocation2 + $0xf1] sm:$0xff] %v10300_v37  ;;  %8643 = vmatprep.subr.bf16.mxu0 %v8642_v62  ;;  %v10391_v63 = vld [vmem:[#allocation2 + $0x48] sm:$0xff]  ;;  %v1033_v1 = vld [vmem:[#allocation6 + $0x140] sm:$0xff] }
  0x91   : > { %432 = vst [vmem:[#allocation2 + $0xf9] sm:$0xff] %v10303_v38  ;;  %11502 = vst [vmem:[#allocation13_spill] sm:$0xff] %v10309_v39  ;;  %v10395_v3 = vld [vmem:[#allocation2 + $0x50] sm:$0xff]  ;;  %v10397_v4 = vld [vmem:[#allocation2 + $0x60] sm:$0xff] }
  0x92   : > { %433 = vst [vmem:[#allocation2 + $0x109] sm:$0xff] %v10309_v39  ;;  %11503 = vst [vmem:[#allocation14_spill] sm:$0xff] %v10313_v41  ;;  %7202 = vmatmul.mubr.f32.gmra.mrb[2].mxu0 %v10233_v14  ;;  %v1035_v6 = vld [vmem:[#allocation6 + $0x150] sm:$0xff]  ;;  %v1036_v7 = vld [vmem:[#allocation6 + $0x158] sm:$0xff] }
  0x93   : > { %11504 = vst [vmem:[#allocation15_spill] sm:$0xff] %v10316_v42  ;;  %11505 = vst [vmem:[#allocation16_spill] sm:$0xff] %v10319_v43  ;;  %7204 = vmatprep.mubr.f32.mxu0 %v10236_v15  ;;  %8645 = vmatpush3.bf16.msra.mxu0 %v8642_v62  ;;  %v10389_v62 = vld [vmem:[#allocation2 + $0x38] sm:$0xff]  ;;  %v8690_v10 = vpack.c.bf16 %v1036_v7, %v1035_v6  ;;  %v10407_v18 = vld [vmem:[#allocation2 + $0x80] sm:$0xff] }
  0x94   : > { %434 = vst [vmem:[#allocation2 + $0x111] sm:$0xff] %v10313_v41  ;;  %435 = vst [vmem:[#allocation2 + $0x121] sm:$0xff] %v10316_v42  ;;  %8647 = vmatprep.subr.bf16.mxu0 %v8646_v2  ;;  %v10403_v9 = vld [vmem:[#allocation2 + $0x78] sm:$0xff]  ;;  %v1039_v29 = vld [vmem:[#allocation6 + $0x170] sm:$0xff] }
  0x95   : > { %436 = vst [vmem:[#allocation2 + $0x129] sm:$0xff] %v10319_v43  ;;  %11506 = vst [vmem:[#allocation17_spill] sm:$0xff] %v10325_v46  ;;  %v1038_v12 = vld [vmem:[#allocation6 + $0x168] sm:$0xff]  ;;  %v10415_v40 = vld [vmem:[#allocation2 + $0xa8] sm:$0xff] }
  0x96   : > { %437 = vst [vmem:[#allocation2 + $0x139] sm:$0xff] %v10325_v46  ;;  %11507 = vst [vmem:[#allocation18_spill] sm:$0xff] %v10329_v47  ;;  %7205 = vmatmul.mubr.f32.gmra.mrb[4].mxu0 %v10239_v16  ;;  %v10413_v34 = vld [vmem:[#allocation2 + $0x98] sm:$0xff]  ;;  %v1331_v45 = vld [vmem:[#allocation6 + $0x180] sm:$0xff] }
  0x97   : > { %11508 = vst [vmem:[#allocation19_spill] sm:$0xff] %v10332_v48  ;;  %11509 = vst [vmem:[#allocation20_spill] sm:$0xff] %v10335_v49  ;;  %7207 = vmatprep.mubr.f32.mxu0 %v10245_v17  ;;  %8649 = vmatpush3.bf16.msra.mxu0 %v8646_v2  ;;  %v1034_v2 = vld [vmem:[#allocation6 + $0x148] sm:$0xff]  ;;  %v10421_v55 = vld [vmem:[#allocation2 + $0xc0] sm:$0xff] }
  0x98   : > { %438 = vst [vmem:[#allocation2 + $0x141] sm:$0xff] %v10329_v47  ;;  %439 = vst [vmem:[#allocation2 + $0x151] sm:$0xff] %v10332_v48  ;;  %8651 = vmatprep.subr.bf16.mxu0 %v8650_v5  ;;  %v1332_v51 = vld [vmem:[#allocation6 + $0x188] sm:$0xff] }
  0x99   : > { %440 = vst [vmem:[#allocation2 + $0x159] sm:$0xff] %v10335_v49  ;;  %11510 = vst [vmem:[#allocation21_spill] sm:$0xff] %v10341_v50  ;;  %v8702_v56 = vpack.c.bf16 %v1332_v51, %v1331_v45  ;;  %v992_v51 = vld [vmem:[#allocation2 + $0x2] sm:$0xff] }
  0x9a   : > { %441 = vst [vmem:[#allocation2 + $0x169] sm:$0xff] %v10341_v50  ;;  %11511 = vst [vmem:[#allocation22_spill] sm:$0xff] %v10345_v52  ;;  %7208 = vmatmul.mubr.f32.gmra.mrb[6].mxu0 %v10249_v19 }
  0x9b   : > { %442 = vst [vmem:[#allocation2 + $0x171] sm:$0xff] %v10345_v52  ;;  %7210 = vmatprep.mubr.f32.mxu0 %v10252_v20  ;;  %8653 = vmatpush3.bf16.msra.mxu0 %v8650_v5  ;;  %v8686_v5 = vpack.c.bf16 %v1034_v2, %v1033_v1  ;;  %v10437_v1 = vld [vmem:[#allocation2 + $0xf8] sm:$0xff]  ;;  %v10439_v2 = vld [vmem:[#allocation2 + $0x108] sm:$0xff]  ;;  %v10445_v6 = vld [vmem:[#allocation2 + $0x120] sm:$0xff] }
  0x9c   : > { %8655 = vmatprep.subr.bf16.mxu0 %v8654_v8  ;;  %v10449_v7 = vld [vmem:[#allocation2 + $0x128] sm:$0xff] }
  0x9e   : > { %7211 = vmatmul.mubr.f32.gmra.mrb[8].mxu0 %v10255_v21 }
  0x9f   : > { %7213 = vmatprep.mubr.f32.mxu0 %v10261_v24  ;;  %8657 = vmatpush3.bf16.msra.mxu0 %v8654_v8  ;;  %v10401_v8 = vld [vmem:[#allocation2 + $0x68] sm:$0xff] }
  0xa0   : > { %8659 = vmatprep.subr.bf16.mxu0 %v8658_v11 }
  0xa2   : > { %7214 = vmatmul.mubr.f32.gmra.mrb[10].mxu0 %v10265_v25  ;;  %v10475_v45 = vld [vmem:[#allocation2 + $0x170] sm:$0xff] }
  0xa3   : > { %7216 = vmatprep.mubr.f32.mxu0 %v10268_v26  ;;  %8661 = vmatpush3.bf16.msra.mxu0 %v8658_v11  ;;  %v1037_v11 = vld [vmem:[#allocation6 + $0x160] sm:$0xff] }
  0xa4   : > { %8663 = vmatprep.subr.bf16.mxu0 %v8662_v22  ;;  %v8694_v23 = vpack.c.bf16 %v1038_v12, %v1037_v11  ;;  %v10455_v11 = vld [vmem:[#allocation2 + $0x140] sm:$0xff]  ;;  %v10457_v12 = vld [vmem:[#allocation2 + $0x150] sm:$0xff] }
  0xa6   : > { %7217 = vmatmul.mubr.f32.gmra.mrb[12].mxu0 %v10271_v27 }
  0xa7   : > { %7219 = vmatprep.mubr.f32.mxu0 %v10277_v28  ;;  %8665 = vmatpush3.bf16.msra.mxu0 %v8662_v22  ;;  %v10409_v22 = vld [vmem:[#allocation2 + $0x90] sm:$0xff] }
  0xa8   : > { %8667 = vmatprep.subr.bf16.mxu0 %v8666_v33 }
  0xaa   : > { %7220 = vmatmul.mubr.f32.gmra.mrb[14].mxu0 %v10281_v30 }
  0xab   : > { %7222 = vmatprep.mubr.f32.mxu0 %v10284_v31  ;;  %8669 = vmatpush3.bf16.msra.mxu0 %v8666_v33  ;;  %v1040_v33 = vld [vmem:[#allocation6 + $0x178] sm:$0xff] }
  0xac   : > { %8671 = vmatprep.subr.bf16.mxu0 %v8670_v44 }
  0xae   : > { %7223 = vmatmul.mubr.f32.gmra.mrb[16].mxu0 %v10287_v32 }
  0xaf   : > { %7225 = vmatprep.mubr.f32.mxu0 %v10293_v35 }
  0xb2   : > { %7226 = vmatmul.mubr.f32.gmra.mrb[18].mxu0 %v10297_v36 }
  0xb3   : > { %7228 = vmatprep.mubr.f32.mxu0 %v10300_v37 }
  0xb6   : > { %7229 = vmatmul.mubr.f32.gmra.mrb[20].mxu0 %v10303_v38 }
  0xb7   : > { %7231 = vmatprep.mubr.f32.mxu0 %v10309_v39  ;;  %v1338_v39 = vld [vmem:[#allocation6 + $0x1b8] sm:$0xff] }
  0xba   : > { %7232 = vmatmul.mubr.f32.gmra.mrb[22].mxu0 %v10313_v41  ;;  %v1337_v41 = vld [vmem:[#allocation6 + $0x1b0] sm:$0xff] }
  0xbb   : > { %7234 = vmatprep.mubr.f32.mxu0 %v10316_v42 }
  0xbe   : > { %7235 = vmatmul.mubr.f32.gmra.mrb[24].mxu0 %v10319_v43  ;;  %v10483_v43 = vld [vmem:[#allocation2 + $0x32] sm:$0xff] }
  0xbf   : > { %7237 = vmatprep.mubr.f32.mxu0 %v10325_v46  ;;  %v10481_v46 = vld [vmem:[#allocation2 + $0x22] sm:$0xff]  ;;  %11516 = vst [vmem:[#allocation27_spill] sm:$0xff] %v10483_v43 }
  0xc0   : > { %11515 = vst [vmem:[#allocation26_spill] sm:$0xff] %v10481_v46 }
  0xc2   : > { %7238 = vmatmul.mubr.f32.gmra.mrb[26].mxu0 %v10329_v47  ;;  %v1336_v47 = vld [vmem:[#allocation6 + $0x1a8] sm:$0xff] }
  0xc3   : > { %7240 = vmatprep.mubr.f32.mxu0 %v10332_v48  ;;  %v1335_v48 = vld [vmem:[#allocation6 + $0x1a0] sm:$0xff] }
  0xc4   : > { %v8710_v42 = vpack.c.bf16 %v1336_v47, %v1335_v48  ;;  %v10493_v47 = vld [vmem:[#allocation2 + $0x52] sm:$0xff]  ;;  %v10495_v48 = vld [vmem:[#allocation2 + $0x62] sm:$0xff] }
  0xc5   : > { %11519 = vst [vmem:[#allocation30_spill] sm:$0xff] %v10493_v47  ;;  %11520 = vst [vmem:[#allocation31_spill] sm:$0xff] %v10495_v48 }
  0xc6   : > { %7241 = vmatmul.mubr.f32.gmra.mrb[28].mxu0 %v10335_v49 }
  0xc7   : > { %7243 = vmatprep.mubr.f32.mxu0 %v10341_v50  ;;  %v993_v50 = vld [vmem:[#allocation2 + $0xa] sm:$0xff] }
  0xca   : > { %7244 = vmatmul.mubr.f32.gmra.mrb[30].mxu0 %v10345_v52  ;;  %v1334_v52 = vld [vmem:[#allocation6 + $0x198] sm:$0xff] }
  0xcb   : > { %7278 = vmatprep.mubr.f32.mxu0 %v9933_v0 }
  0xce   : > { %7279 = vmatmul.mubr.f32.vlgmr.msra.gmra.mrb[0].mxu0 %v9933_v0  ;;  %v8682_v0 = vpack.c.bf16 %v1032_v61, %v1031_v60  ;;  %v10427_v60 = vld [vmem:[#allocation2 + $0xd8] sm:$0xff]  ;;  %v10431_v61 = vld [vmem:[#allocation2 + $0xe0] sm:$0xff] }
  0xcf   : > { %8673 = vmatpush3.bf16.msra.mxu0 %v8670_v44  ;;  %7281 = vmatprep.mubr.f32.mxu0 %v10379_v53  ;;  %v8698_v44 = vpack.c.bf16 %v1040_v33, %v1039_v29  ;;  %v10464_v29 = vld [vmem:[%s10164_s13 + $0xf8] sm:$0xff]  ;;  %v10469_v33 = vld [vmem:[#allocation2 + $0x158] sm:$0xff] }
  0xd0   : > { %8675 = vmatprep.subr.bf16.mxu0 %v8674_v54  ;;  %11513 = vst [vmem:[#allocation24_spill] sm:$0xff] %v10464_v29  ;;  %444 = vst [vmem:[#allocation2 + $0x189] sm:$0xff] %v10464_v29  ;;  %v10478_v29 = vld [vmem:[#allocation2 + $0x1a] sm:$0xff] }
  0xd1   : > { %11514 = vst [vmem:[#allocation25_spill] sm:$0xff] %v10478_v29 }
  0xd2   : > { %7282 = vmatmul.mubr.f32.gmra.mrb[2].mxu0 %v10383_v57 }
  0xd3   : > { %7284 = vmatprep.mubr.f32.mxu0 %v10385_v58  ;;  %8677 = vmatpush3.bf16.msra.mxu0 %v8674_v54  ;;  %v10419_v54 = vld [vmem:[#allocation2 + $0xb0] sm:$0xff] }
  0xd4   : > { %8679 = vmatprep.subr.bf16.mxu0 %v8678_v59 }
  0xd6   : > { %7285 = vmatmul.mubr.f32.gmra.mrb[4].mxu0 %v10389_v62 }
  0xd7   : > { %7287 = vmatprep.mubr.f32.mxu0 %v10391_v63  ;;  %8681 = vmatpush3.bf16.msra.mxu0 %v8678_v59  ;;  %v10425_v59 = vld [vmem:[#allocation2 + $0xc8] sm:$0xff] }
  0xd8   : > { %8683 = vmatprep.subr.bf16.mxu0 %v8682_v0 }
  0xda   : > { %7288 = vmatmul.mubr.f32.gmra.mrb[6].mxu0 %v10395_v3 }
  0xdb   : > { %7290 = vmatprep.mubr.f32.mxu0 %v10397_v4  ;;  %8685 = vmatpush3.bf16.msra.mxu0 %v8682_v0  ;;  %v10433_v0 = vld [vmem:[#allocation2 + $0xf0] sm:$0xff] }
  0xdc   : > { %8687 = vmatprep.subr.bf16.mxu0 %v8686_v5 }
  0xde   : > { %7291 = vmatmul.mubr.f32.gmra.mrb[8].mxu0 %v10401_v8 }
  0xdf   : > { %7293 = vmatprep.mubr.f32.mxu0 %v10403_v9  ;;  %8689 = vmatpush3.bf16.msra.mxu0 %v8686_v5  ;;  %v10443_v5 = vld [vmem:[#allocation2 + $0x110] sm:$0xff] }
  0xe0   : > { %8691 = vmatprep.subr.bf16.mxu0 %v8690_v10 }
  0xe2   : > { %7294 = vmatmul.mubr.f32.gmra.mrb[10].mxu0 %v10407_v18 }
  0xe3   : > { %7296 = vmatprep.mubr.f32.mxu0 %v10409_v22  ;;  %8693 = vmatpush3.bf16.msra.mxu0 %v8690_v10  ;;  %v10451_v10 = vld [vmem:[#allocation2 + $0x138] sm:$0xff] }
  0xe4   : > { %8695 = vmatprep.subr.bf16.mxu0 %v8694_v23 }
  0xe6   : > { %7297 = vmatmul.mubr.f32.gmra.mrb[12].mxu0 %v10413_v34 }
  0xe7   : > { %7299 = vmatprep.mubr.f32.mxu0 %v10415_v40  ;;  %8697 = vmatpush3.bf16.msra.mxu0 %v8694_v23  ;;  %v10460_v23 = vld [vmem:[%s10164_s13 + $0xf0] sm:$0xff] }
  0xe8   : > { %8699 = vmatprep.subr.bf16.mxu0 %v8698_v44  ;;  %11512 = vst [vmem:[#allocation23_spill] sm:$0xff] %v10460_v23  ;;  %443 = vst [vmem:[#allocation2 + $0x181] sm:$0xff] %v10460_v23  ;;  %v1333_v23 = vld [vmem:[#allocation6 + $0x190] sm:$0xff] }
  0xe9   : > { %v8706_v49 = vpack.c.bf16 %v1334_v52, %v1333_v23  ;;  %v10489_v52 = vld [vmem:[#allocation2 + $0x4a] sm:$0xff]  ;;  %v1340_v23 = vld [vmem:[#allocation6 + $0x1c8] sm:$0xff] }
  0xea   : > { %7300 = vmatmul.mubr.f32.gmra.mrb[14].mxu0 %v10419_v54  ;;  %11518 = vst [vmem:[#allocation29_spill] sm:$0xff] %v10489_v52 }
  0xeb   : > { %7302 = vmatprep.mubr.f32.mxu0 %v10421_v55  ;;  %8701 = vmatpush3.bf16.msra.mxu0 %v8698_v44  ;;  %v10471_v44 = vld [vmem:[#allocation2 + $0x168] sm:$0xff] }
  0xec   : > { %8703 = vmatprep.subr.bf16.mxu0 %v8702_v56 }
  0xee   : > { %7303 = vmatmul.mubr.f32.gmra.mrb[16].mxu0 %v10425_v59 }
  0xef   : > { %7305 = vmatprep.mubr.f32.mxu0 %v10427_v60 }
  0xf2   : > { %7306 = vmatmul.mubr.f32.gmra.mrb[18].mxu0 %v10431_v61 }
  0xf3   : > { %7308 = vmatprep.mubr.f32.mxu0 %v10433_v0 }
  0xf6   : > { %7309 = vmatmul.mubr.f32.gmra.mrb[20].mxu0 %v10437_v1 }
  0xf7   : > { %7311 = vmatprep.mubr.f32.mxu0 %v10439_v2 }
  0xfa   : > { %7312 = vmatmul.mubr.f32.gmra.mrb[22].mxu0 %v10443_v5 }
  0xfb   : > { %7314 = vmatprep.mubr.f32.mxu0 %v10445_v6 }
  0xfe   : > { %7315 = vmatmul.mubr.f32.gmra.mrb[24].mxu0 %v10449_v7 }
  0xff   : > { %7317 = vmatprep.mubr.f32.mxu0 %v10451_v10 }
 0x102   : > { %7318 = vmatmul.mubr.f32.gmra.mrb[26].mxu0 %v10455_v11 }
 0x103   : > { %7320 = vmatprep.mubr.f32.mxu0 %v10457_v12 }
 0x106   : > { %7321 = vmatmul.mubr.f32.gmra.mrb[28].mxu0 %v10469_v33 }
 0x107   : > { %7323 = vmatprep.mubr.f32.mxu0 %v10471_v44 }
 0x10a   : > { %7324 = vmatmul.mubr.f32.gmra.mrb[30].mxu0 %v10475_v45 }
 0x10b   : > { %7358 = vmatprep.mubr.f32.mxu0 %v992_v51  ;;  %v10487_v51 = vld [vmem:[#allocation2 + $0x3a] sm:$0xff] }
 0x10c   : > { %11517 = vst [vmem:[#allocation28_spill] sm:$0xff] %v10487_v51 }
 0x10e   : > { %7359 = vmatmul.mubr.f32.vlgmr.msra.gmra.mrb[0].mxu0 %v993_v50  ;;  %v8714_v50 = vpack.c.bf16 %v1338_v39, %v1337_v41  ;;  %v10499_v39 = vld [vmem:[#allocation2 + $0x6a] sm:$0xff]  ;;  %v10501_v41 = vld [vmem:[#allocation2 + $0x7a] sm:$0xff] }
 0x10f   : > { %8705 = vmatpush3.bf16.msra.mxu0 %v8702_v56  ;;  %7361 = vmatprep.mubr.f32.mxu0 %v10478_v29  ;;  %v1339_v56 = vld [vmem:[#allocation6 + $0x1c0] sm:$0xff]  ;;  %v1342_v29 = vld [vmem:[#allocation6 + $0x1d8] sm:$0xff]  ;;  %11521 = vst [vmem:[#allocation32_spill] sm:$0xff] %v10499_v39  ;;  %11522 = vst [vmem:[#allocation33_spill] sm:$0xff] %v10501_v41 }
 0x110   : > { %8707 = vmatprep.subr.bf16.mxu0 %v8706_v49 }
 0x112   : > { %7362 = vmatmul.mubr.f32.gmra.mrb[2].mxu0 %v10481_v46  ;;  %v1341_v46 = vld [vmem:[#allocation6 + $0x1d0] sm:$0xff] }
 0x113   : > { %7364 = vmatprep.mubr.f32.mxu0 %v10483_v43  ;;  %8709 = vmatpush3.bf16.msra.mxu0 %v8706_v49  ;;  %v8718_v43 = vpack.c.bf16 %v1340_v23, %v1339_v56  ;;  %v8722_v49 = vpack.c.bf16 %v1342_v29, %v1341_v46  ;;  %v10507_v56 = vld [vmem:[#allocation2 + $0x92] sm:$0xff]  ;;  %v10511_v46 = vld [vmem:[#allocation2 + $0x9a] sm:$0xff]  ;;  %v10513_v29 = vld [vmem:[#allocation2 + $0xaa] sm:$0xff] }
 0x114   : > { %8711 = vmatprep.subr.bf16.mxu0 %v8710_v42 }
 0x116   : > { %7365 = vmatmul.mubr.f32.gmra.mrb[4].mxu0 %v10487_v51  ;;  %v1344_v51 = vld [vmem:[#allocation6 + $0x1e8] sm:$0xff] }
 0x117   : > { %7367 = vmatprep.mubr.f32.mxu0 %v10489_v52  ;;  %8713 = vmatpush3.bf16.msra.mxu0 %v8710_v42  ;;  %v1343_v52 = vld [vmem:[#allocation6 + $0x1e0] sm:$0xff]  ;;  %v10505_v42 = vld [vmem:[#allocation2 + $0x82] sm:$0xff] }
 0x118   : > { %8715 = vmatprep.subr.bf16.mxu0 %v8714_v50  ;;  %v8726_v23 = vpack.c.bf16 %v1344_v51, %v1343_v52  ;;  %v10519_v51 = vld [vmem:[#allocation2 + $0xc2] sm:$0xff] }
 0x119   : > { %11524 = vst [vmem:[#allocation35_spill] sm:$0xff] %v10519_v51 }
 0x11a   : > { %7368 = vmatmul.mubr.f32.gmra.mrb[6].mxu0 %v10493_v47  ;;  %v1346_v47 = vld [vmem:[#allocation6 + $0x1f8] sm:$0xff] }
 0x11b   : > { %7370 = vmatprep.mubr.f32.mxu0 %v10495_v48  ;;  %8717 = vmatpush3.bf16.msra.mxu0 %v8714_v50  ;;  %v1345_v48 = vld [vmem:[#allocation6 + $0x1f0] sm:$0xff] }
 0x11c   : > { %8719 = vmatprep.subr.bf16.mxu0 %v8718_v43  ;;  %v8730_v50 = vpack.c.bf16 %v1346_v47, %v1345_v48  ;;  %v10525_v47 = vld [vmem:[#allocation2 + $0xda] sm:$0xff]  ;;  %v10529_v48 = vld [vmem:[#allocation2 + $0xe2] sm:$0xff] }
 0x11d   : > { %11526 = vst [vmem:[#allocation37_spill] sm:$0xff] %v10525_v47  ;;  %11527 = vst [vmem:[#allocation38_spill] sm:$0xff] %v10529_v48 }
 0x11e   : > { %7371 = vmatmul.mubr.f32.gmra.mrb[8].mxu0 %v10499_v39  ;;  %v1638_v39 = vld [vmem:[#allocation6 + $0x208] sm:$0xff] }
 0x11f   : > { %7373 = vmatprep.mubr.f32.mxu0 %v10501_v41  ;;  %8721 = vmatpush3.bf16.msra.mxu0 %v8718_v43  ;;  %v1637_v41 = vld [vmem:[#allocation6 + $0x200] sm:$0xff] }
 0x120   : > { %8723 = vmatprep.subr.bf16.mxu0 %v8722_v49  ;;  %v10517_v43 = vld [vmem:[#allocation2 + $0xb2] sm:$0xff]  ;;  %v8734_v52 = vpack.c.bf16 %v1638_v39, %v1637_v41  ;;  %v10535_v39 = vld [vmem:[#allocation2 + $0xfa] sm:$0xff]  ;;  %v10537_v41 = vld [vmem:[#allocation2 + $0x10a] sm:$0xff] }
 0x121   : > { %11523 = vst [vmem:[#allocation34_spill] sm:$0xff] %v10517_v43  ;;  %11529 = vst [vmem:[#allocation40_spill] sm:$0xff] %v10535_v39 }
 0x122   : > { %7374 = vmatmul.mubr.f32.gmra.mrb[10].mxu0 %v10505_v42  ;;  %11530 = vst [vmem:[#allocation41_spill] sm:$0xff] %v10537_v41 }
 0x123   : > { %7376 = vmatprep.mubr.f32.mxu0 %v10507_v56  ;;  %8725 = vmatpush3.bf16.msra.mxu0 %v8722_v49  ;;  %v10523_v49 = vld [vmem:[#allocation2 + $0xca] sm:$0xff] }
 0x124   : > { %8727 = vmatprep.subr.bf16.mxu0 %v8726_v23  ;;  %11525 = vst [vmem:[#allocation36_spill] sm:$0xff] %v10523_v49 }
 0x126   : > { %7377 = vmatmul.mubr.f32.gmra.mrb[12].mxu0 %v10511_v46 }
 0x127   : > { %7379 = vmatprep.mubr.f32.mxu0 %v10513_v29  ;;  %8729 = vmatpush3.bf16.msra.mxu0 %v8726_v23  ;;  %v10531_v23 = vld [vmem:[#allocation2 + $0xf2] sm:$0xff] }
 0x128   : > { %8731 = vmatprep.subr.bf16.mxu0 %v8730_v50  ;;  %11528 = vst [vmem:[#allocation39_spill] sm:$0xff] %v10531_v23 }
 0x12a   : > { %7380 = vmatmul.mubr.f32.gmra.mrb[14].mxu0 %v10517_v43  ;;  %v1642_v43 = vld [vmem:[#allocation6 + $0x228] sm:$0xff] }
 0x12b   : > { %7382 = vmatprep.mubr.f32.mxu0 %v10519_v51  ;;  %8733 = vmatpush3.bf16.msra.mxu0 %v8730_v50  ;;  %v10541_v50 = vld [vmem:[#allocation2 + $0x112] sm:$0xff] }
 0x12c   : > { %8735 = vmatprep.subr.bf16.mxu0 %v8734_v52  ;;  %11531 = vst [vmem:[#allocation42_spill] sm:$0xff] %v10541_v50 }
 0x12e   : > { %7383 = vmatmul.mubr.f32.gmra.mrb[16].mxu0 %v10523_v49  ;;  %v10543_v49 = vld [vmem:[#allocation2 + $0x122] sm:$0xff] }
 0x12f   : > { %7385 = vmatprep.mubr.f32.mxu0 %v10525_v47  ;;  %11532 = vst [vmem:[#allocation43_spill] sm:$0xff] %v10543_v49  ;;  %v10547_v47 = vld [vmem:[#allocation2 + $0x12a] sm:$0xff] }
 0x130   : > { %11533 = vst [vmem:[#allocation44_spill] sm:$0xff] %v10547_v47 }
 0x132   : > { %7386 = vmatmul.mubr.f32.gmra.mrb[18].mxu0 %v10529_v48  ;;  %v10549_v48 = vld [vmem:[#allocation2 + $0x13a] sm:$0xff] }
 0x133   : > { %7388 = vmatprep.mubr.f32.mxu0 %v10531_v23  ;;  %11534 = vst [vmem:[#allocation45_spill] sm:$0xff] %v10549_v48  ;;  %v10553_v23 = vld [vmem:[#allocation2 + $0x142] sm:$0xff] }
 0x134   : > { %11535 = vst [vmem:[#allocation46_spill] sm:$0xff] %v10553_v23 }
 0x136   : > { %7389 = vmatmul.mubr.f32.gmra.mrb[20].mxu0 %v10535_v39  ;;  %v10555_v39 = vld [vmem:[#allocation2 + $0x152] sm:$0xff] }
 0x137   : > { %7391 = vmatprep.mubr.f32.mxu0 %v10537_v41  ;;  %11536 = vst [vmem:[#allocation47_spill] sm:$0xff] %v10555_v39  ;;  %v10559_v41 = vld [vmem:[#allocation2 + $0x15a] sm:$0xff] }
 0x138   : > { %11537 = vst [vmem:[#allocation48_spill] sm:$0xff] %v10559_v41 }
 0x13a   : > { %7392 = vmatmul.mubr.f32.gmra.mrb[22].mxu0 %v10541_v50  ;;  %v10561_v50 = vld [vmem:[#allocation2 + $0x16a] sm:$0xff] }
 0x13b   : > { %7394 = vmatprep.mubr.f32.mxu0 %v10543_v49  ;;  %11538 = vst [vmem:[#allocation49_spill] sm:$0xff] %v10561_v50  ;;  %v10565_v49 = vld [vmem:[#allocation2 + $0x172] sm:$0xff] }
 0x13c   : > { %11539 = vst [vmem:[#allocation50_spill] sm:$0xff] %v10565_v49 }
 0x13e   : > { %7395 = vmatmul.mubr.f32.gmra.mrb[24].mxu0 %v10547_v47  ;;  %v1639_v47 = vld [vmem:[#allocation6 + $0x210] sm:$0xff] }
 0x13f   : > { %7397 = vmatprep.mubr.f32.mxu0 %v10549_v48  ;;  %v1640_v48 = vld [vmem:[#allocation6 + $0x218] sm:$0xff] }
 0x140   : > { %v8738_v51 = vpack.c.bf16 %v1640_v48, %v1639_v47  ;;  %v1646_v47 = vld [vmem:[#allocation6 + $0x248] sm:$0xff]  ;;  %v1649_v48 = vld [vmem:[#allocation6 + $0x260] sm:$0xff] }
 0x142   : > { %7398 = vmatmul.mubr.f32.gmra.mrb[26].mxu0 %v10553_v23  ;;  %v1641_v23 = vld [vmem:[#allocation6 + $0x220] sm:$0xff] }
 0x143   : > { %7400 = vmatprep.mubr.f32.mxu0 %v10555_v39  ;;  %v1643_v39 = vld [vmem:[#allocation6 + $0x230] sm:$0xff] }
 0x146   : > { %7401 = vmatmul.mubr.f32.gmra.mrb[28].mxu0 %v10559_v41  ;;  %v8742_v41 = vpack.c.bf16 %v1642_v43, %v1641_v23  ;;  %v1648_v43 = vld [vmem:[#allocation6 + $0x258] sm:$0xff]  ;;  %v1650_v23 = vld [vmem:[#allocation6 + $0x268] sm:$0xff] }
 0x147   : > { %7403 = vmatprep.mubr.f32.mxu0 %v10561_v50  ;;  %v1644_v50 = vld [vmem:[#allocation6 + $0x238] sm:$0xff] }
 0x14a   : > { %7404 = vmatmul.mubr.f32.gmra.mrb[30].mxu0 %v10565_v49  ;;  %v8746_v49 = vpack.c.bf16 %v1644_v50, %v1643_v39  ;;  %v8758_v39 = vpack.c.bf16 %v1650_v23, %v1649_v48  ;;  %v1652_v50 = vld [vmem:[#allocation6 + $0x278] sm:$0xff] }
 0x14b   : > { %7438 = vmatprep.mubr.f32.mxu0 %v10379_v53  ;;  %v1645_v53 = vld [vmem:[#allocation6 + $0x240] sm:$0xff]  ;;  %v1946_v48 = vld [vmem:[#allocation6 + $0x298] sm:$0xff] }
 0x14e   : > { %7439 = vmatmul.mubr.f32.vlgmr.msra.gmra.mrb[0].mxu0 %v10383_v57  ;;  %v8750_v57 = vpack.c.bf16 %v1646_v47, %v1645_v53  ;;  %v1943_v53 = vld [vmem:[#allocation6 + $0x280] sm:$0xff]  ;;  %v1944_v47 = vld [vmem:[#allocation6 + $0x288] sm:$0xff] }
 0x14f   : > { %8737 = vmatpush3.bf16.msra.mxu0 %v8734_v52  ;;  %7441 = vmatprep.mubr.f32.mxu0 %v10385_v58  ;;  %v1647_v52 = vld [vmem:[#allocation6 + $0x250] sm:$0xff] }
 0x150   : > { %8739 = vmatprep.subr.bf16.mxu0 %v8738_v51 }
 0x152   : > { %7442 = vmatmul.mubr.f32.gmra.mrb[2].mxu0 %v10389_v62 }
 0x153   : > { %7444 = vmatprep.mubr.f32.mxu0 %v10391_v63  ;;  %8741 = vmatpush3.bf16.msra.mxu0 %v8738_v51  ;;  %v8754_v51 = vpack.c.bf16 %v1648_v43, %v1647_v52  ;;  %v10597_v52 = vld [vmem:[#allocation2 + $0x180] sm:$0xff]  ;;  %v10601_v43 = vld [vmem:[#allocation2 + $0x188] sm:$0xff] }
 0x154   : > { %8743 = vmatprep.subr.bf16.mxu0 %v8742_v41 }
 0x156   : > { %7445 = vmatmul.mubr.f32.gmra.mrb[4].mxu0 %v10395_v3 }
 0x157   : > { %7447 = vmatprep.mubr.f32.mxu0 %v10397_v4  ;;  %8745 = vmatpush3.bf16.msra.mxu0 %v8742_v41  ;;  %v1651_v41 = vld [vmem:[#allocation6 + $0x270] sm:$0xff] }
 0x158   : > { %8747 = vmatprep.subr.bf16.mxu0 %v8746_v49 }
 0x15a   : > { %7448 = vmatmul.mubr.f32.gmra.mrb[6].mxu0 %v10401_v8 }
 0x15b   : > { %7450 = vmatprep.mubr.f32.mxu0 %v10403_v9  ;;  %8749 = vmatpush3.bf16.msra.mxu0 %v8746_v49  ;;  %v8762_v49 = vpack.c.bf16 %v1652_v50, %v1651_v41  ;;  %v1948_v41 = vld [vmem:[#allocation6 + $0x2a8] sm:$0xff] }
 0x15c   : > { %8751 = vmatprep.subr.bf16.mxu0 %v8750_v57 }
 0x15e   : > { %7451 = vmatmul.mubr.f32.gmra.mrb[8].mxu0 %v10407_v18 }
 0x15f   : > { %7453 = vmatprep.mubr.f32.mxu0 %v10409_v22  ;;  %8753 = vmatpush3.bf16.msra.mxu0 %v8750_v57  ;;  %v8766_v57 = vpack.c.bf16 %v1944_v47, %v1943_v53  ;;  %v1950_v53 = vld [vmem:[#allocation6 + $0x2b8] sm:$0xff] }
 0x160   : > { %8755 = vmatprep.subr.bf16.mxu0 %v8754_v51 }
 0x162   : > { %7454 = vmatmul.mubr.f32.gmra.mrb[10].mxu0 %v10413_v34 }
 0x163   : > { %7456 = vmatprep.mubr.f32.mxu0 %v10415_v40  ;;  %8757 = vmatpush3.bf16.msra.mxu0 %v8754_v51  ;;  %v1945_v51 = vld [vmem:[#allocation6 + $0x290] sm:$0xff] }
 0x164   : > { %8759 = vmatprep.subr.bf16.mxu0 %v8758_v39  ;;  %v8770_v23 = vpack.c.bf16 %v1946_v48, %v1945_v51  ;;  %v1952_v51 = vld [vmem:[#allocation6 + $0x2c8] sm:$0xff] }
 0x165   : > { %v1956_v48 = vld [vmem:[#allocation6 + $0x2e8] sm:$0xff] }
 0x166   : > { %7457 = vmatmul.mubr.f32.gmra.mrb[12].mxu0 %v10419_v54 }
 0x167   : > { %7459 = vmatprep.mubr.f32.mxu0 %v10421_v55  ;;  %8761 = vmatpush3.bf16.msra.mxu0 %v8758_v39  ;;  %v1947_v39 = vld [vmem:[#allocation6 + $0x2a0] sm:$0xff] }
 0x168   : > { %8763 = vmatprep.subr.bf16.mxu0 %v8762_v49  ;;  %v8774_v50 = vpack.c.bf16 %v1948_v41, %v1947_v39  ;;  %v2251_v39 = vld [vmem:[#allocation6 + $0x308] sm:$0xff]  ;;  %v11547_v41 = vld [vmem:[#allocation20_spill] sm:$0xff] }
 0x16a   : > { %7460 = vmatmul.mubr.f32.gmra.mrb[14].mxu0 %v10425_v59 }
 0x16b   : > { %7462 = vmatprep.mubr.f32.mxu0 %v10427_v60  ;;  %8765 = vmatpush3.bf16.msra.mxu0 %v8762_v49  ;;  %v1949_v49 = vld [vmem:[#allocation6 + $0x2b0] sm:$0xff] }
 0x16c   : > { %8767 = vmatprep.subr.bf16.mxu0 %v8766_v57  ;;  %v8778_v47 = vpack.c.bf16 %v1950_v53, %v1949_v49  ;;  %v2253_v49 = vld [vmem:[#allocation6 + $0x318] sm:$0xff] }
 0x16d   : > { %v11551_v53 = vld [vmem:[#allocation24_spill] sm:$0xff] }
 0x16e   : > { %7463 = vmatmul.mubr.f32.gmra.mrb[16].mxu0 %v10431_v61 }
 0x16f   : > { %7465 = vmatprep.mubr.f32.mxu0 %v10433_v0 }
 0x172   : > { %7466 = vmatmul.mubr.f32.gmra.mrb[18].mxu0 %v10437_v1 }
 0x173   : > { %7468 = vmatprep.mubr.f32.mxu0 %v10439_v2 }
 0x176   : > { %7469 = vmatmul.mubr.f32.gmra.mrb[20].mxu0 %v10443_v5 }
 0x177   : > { %7471 = vmatprep.mubr.f32.mxu0 %v10445_v6 }
 0x17a   : > { %7472 = vmatmul.mubr.f32.gmra.mrb[22].mxu0 %v10449_v7 }
 0x17b   : > { %7474 = vmatprep.mubr.f32.mxu0 %v10451_v10 }
 0x17e   : > { %7475 = vmatmul.mubr.f32.gmra.mrb[24].mxu0 %v10455_v11 }
 0x17f   : > { %7477 = vmatprep.mubr.f32.mxu0 %v10457_v12 }
 0x182   : > { %7478 = vmatmul.mubr.f32.gmra.mrb[26].mxu0 %v10469_v33 }
 0x183   : > { %7480 = vmatprep.mubr.f32.mxu0 %v10471_v44 }
 0x186   : > { %7481 = vmatmul.mubr.f32.gmra.mrb[28].mxu0 %v10475_v45 }
 0x187   : > { %7483 = vmatprep.mubr.f32.mxu0 %v10597_v52 }
 0x18a   : > { %7484 = vmatmul.mubr.f32.gmra.mrb[30].mxu0 %v10601_v43 }
 0x18b   : > { %7518 = vmatprep.mubr.f32.mxu0 %v10229_v13  ;;  %v1951_v13 = vld [vmem:[#allocation6 + $0x2c0] sm:$0xff] }
 0x18e   : > { %7519 = vmatmul.mubr.f32.vlgmr.msra.gmra.mrb[0].mxu0 %v10233_v14  ;;  %v8782_v14 = vpack.c.bf16 %v1952_v51, %v1951_v13  ;;  %v2254_v51 = vld [vmem:[#allocation6 + $0x320] sm:$0xff] }
 0x18f   : > { %8769 = vmatpush3.bf16.msra.mxu0 %v8766_v57  ;;  %7521 = vmatprep.mubr.f32.mxu0 %v10236_v15  ;;  %v1953_v15 = vld [vmem:[#allocation6 + $0x2d0] sm:$0xff]  ;;  %v1954_v57 = vld [vmem:[#allocation6 + $0x2d8] sm:$0xff] }
 0x190   : > { %8771 = vmatprep.subr.bf16.mxu0 %v8770_v23 }
 0x192   : > { %7522 = vmatmul.mubr.f32.gmra.mrb[2].mxu0 %v10239_v16  ;;  %v8786_v16 = vpack.c.bf16 %v1954_v57, %v1953_v15  ;;  %v11553_v15 = vld [vmem:[#allocation26_spill] sm:$0xff]  ;;  %v11554_v57 = vld [vmem:[#allocation27_spill] sm:$0xff] }
 0x193   : > { %7524 = vmatprep.mubr.f32.mxu0 %v10245_v17  ;;  %8773 = vmatpush3.bf16.msra.mxu0 %v8770_v23  ;;  %v1955_v17 = vld [vmem:[#allocation6 + $0x2e0] sm:$0xff]  ;;  %v1958_v23 = vld [vmem:[#allocation6 + $0x2f8] sm:$0xff] }
 0x194   : > { %8775 = vmatprep.subr.bf16.mxu0 %v8774_v50 }
 0x196   : > { %7525 = vmatmul.mubr.f32.gmra.mrb[4].mxu0 %v10249_v19  ;;  %v8790_v19 = vpack.c.bf16 %v1956_v48, %v1955_v17  ;;  %v2256_v17 = vld [vmem:[#allocation6 + $0x330] sm:$0xff]  ;;  %v2257_v48 = vld [vmem:[#allocation6 + $0x338] sm:$0xff] }
 0x197   : > { %7527 = vmatprep.mubr.f32.mxu0 %v10252_v20  ;;  %8777 = vmatpush3.bf16.msra.mxu0 %v8774_v50  ;;  %v1957_v20 = vld [vmem:[#allocation6 + $0x2f0] sm:$0xff] }
 0x198   : > { %8779 = vmatprep.subr.bf16.mxu0 %v8778_v47  ;;  %v2252_v50 = vld [vmem:[#allocation6 + $0x310] sm:$0xff] }
 0x199   : > { %v8802_v13 = vpack.c.bf16 %v2253_v49, %v2252_v50  ;;  %v2556_v49 = vld [vmem:[#allocation6 + $0x380] sm:$0xff] }
 0x19a   : > { %7528 = vmatmul.mubr.f32.gmra.mrb[6].mxu0 %v10255_v21  ;;  %v8794_v21 = vpack.c.bf16 %v1958_v23, %v1957_v20  ;;  %v11556_v20 = vld [vmem:[#allocation29_spill] sm:$0xff]  ;;  %v8810_v23 = vpack.c.bf16 %v2257_v48, %v2256_v17  ;;  %v11571_v17 = vld [vmem:[#allocation44_spill] sm:$0xff] }
 0x19b   : > { %7530 = vmatprep.mubr.f32.mxu0 %v10261_v24  ;;  %8781 = vmatpush3.bf16.msra.mxu0 %v8778_v47  ;;  %v2250_v24 = vld [vmem:[#allocation6 + $0x300] sm:$0xff] }
 0x19c   : > { %8783 = vmatprep.subr.bf16.mxu0 %v8782_v14  ;;  %v11552_v47 = vld [vmem:[#allocation25_spill] sm:$0xff] }
 0x19d   : > { %v11572_v48 = vld [vmem:[#allocation45_spill] sm:$0xff] }
 0x19e   : > { %7531 = vmatmul.mubr.f32.gmra.mrb[8].mxu0 %v10265_v25  ;;  %v8798_v25 = vpack.c.bf16 %v2251_v39, %v2250_v24  ;;  %v2259_v24 = vld [vmem:[#allocation6 + $0x348] sm:$0xff] }
 0x19f   : > { %7533 = vmatprep.mubr.f32.mxu0 %v10268_v26  ;;  %8785 = vmatpush3.bf16.msra.mxu0 %v8782_v14  ;;  %v11540_v26 = vld [vmem:[#allocation13_spill] sm:$0xff]  ;;  %v2255_v14 = vld [vmem:[#allocation6 + $0x328] sm:$0xff] }
 0x1a0   : > { %8787 = vmatprep.subr.bf16.mxu0 %v8786_v16  ;;  %v11557_v39 = vld [vmem:[#allocation30_spill] sm:$0xff] }
 0x1a2   : > { %7534 = vmatmul.mubr.f32.gmra.mrb[10].mxu0 %v10271_v27  ;;  %v11541_v27 = vld [vmem:[#allocation14_spill] sm:$0xff] }
 0x1a3   : > { %7536 = vmatprep.mubr.f32.mxu0 %v10277_v28  ;;  %8789 = vmatpush3.bf16.msra.mxu0 %v8786_v16  ;;  %v11542_v28 = vld [vmem:[#allocation15_spill] sm:$0xff]  ;;  %v8806_v16 = vpack.c.bf16 %v2255_v14, %v2254_v51  ;;  %v11564_v51 = vld [vmem:[#allocation37_spill] sm:$0xff]  ;;  %v11567_v14 = vld [vmem:[#allocation40_spill] sm:$0xff] }
 0x1a4   : > { %8791 = vmatprep.subr.bf16.mxu0 %v8790_v19 }
 0x1a6   : > { %7537 = vmatmul.mubr.f32.gmra.mrb[12].mxu0 %v10281_v30  ;;  %v11543_v30 = vld [vmem:[#allocation16_spill] sm:$0xff] }
 0x1a7   : > { %7539 = vmatprep.mubr.f32.mxu0 %v10284_v31  ;;  %8793 = vmatpush3.bf16.msra.mxu0 %v8790_v19  ;;  %v11544_v31 = vld [vmem:[#allocation17_spill] sm:$0xff]  ;;  %v11555_v19 = vld [vmem:[#allocation28_spill] sm:$0xff] }
 0x1a8   : > { %8795 = vmatprep.subr.bf16.mxu0 %v8794_v21 }
 0x1aa   : > { %7540 = vmatmul.mubr.f32.gmra.mrb[14].mxu0 %v10287_v32  ;;  %v11545_v32 = vld [vmem:[#allocation18_spill] sm:$0xff] }
 0x1ab   : > { %7542 = vmatprep.mubr.f32.mxu0 %v10293_v35  ;;  %8797 = vmatpush3.bf16.msra.mxu0 %v8794_v21  ;;  %v11546_v35 = vld [vmem:[#allocation19_spill] sm:$0xff]  ;;  %v2258_v21 = vld [vmem:[#allocation6 + $0x340] sm:$0xff] }
 0x1ac   : > { %8799 = vmatprep.subr.bf16.mxu0 %v8798_v25 }
 0x1ae   : > { %7543 = vmatmul.mubr.f32.gmra.mrb[16].mxu0 %v10297_v36  ;;  %v11548_v36 = vld [vmem:[#allocation21_spill] sm:$0xff] }
 0x1af   : > { %7545 = vmatprep.mubr.f32.mxu0 %v10300_v37  ;;  %v11549_v37 = vld [vmem:[#allocation22_spill] sm:$0xff] }
 0x1b2   : > { %7546 = vmatmul.mubr.f32.gmra.mrb[18].mxu0 %v10303_v38  ;;  %v11550_v38 = vld [vmem:[#allocation23_spill] sm:$0xff] }
 0x1b3   : > { %7548 = vmatprep.mubr.f32.mxu0 %v11540_v26  ;;  %v11558_v26 = vld [vmem:[#allocation31_spill] sm:$0xff] }
 0x1b6   : > { %7549 = vmatmul.mubr.f32.gmra.mrb[20].mxu0 %v11541_v27  ;;  %v2260_v27 = vld [vmem:[#allocation6 + $0x350] sm:$0xff] }
 0x1b7   : > { %7551 = vmatprep.mubr.f32.mxu0 %v11542_v28  ;;  %v2261_v28 = vld [vmem:[#allocation6 + $0x358] sm:$0xff] }
 0x1ba   : > { %7552 = vmatmul.mubr.f32.gmra.mrb[22].mxu0 %v11543_v30  ;;  %v11559_v30 = vld [vmem:[#allocation32_spill] sm:$0xff] }
 0x1bb   : > { %7554 = vmatprep.mubr.f32.mxu0 %v11544_v31  ;;  %v11560_v31 = vld [vmem:[#allocation33_spill] sm:$0xff] }
 0x1be   : > { %7555 = vmatmul.mubr.f32.gmra.mrb[24].mxu0 %v11545_v32  ;;  %v8818_v32 = vpack.c.bf16 %v2261_v28, %v2260_v27  ;;  %v2559_v27 = vld [vmem:[#allocation6 + $0x398] sm:$0xff] }
 0x1bf   : > { %7557 = vmatprep.mubr.f32.mxu0 %v11546_v35  ;;  %v2262_v35 = vld [vmem:[#allocation6 + $0x360] sm:$0xff] }
 0x1c2   : > { %7558 = vmatmul.mubr.f32.gmra.mrb[26].mxu0 %v11547_v41  ;;  %v2263_v41 = vld [vmem:[#allocation6 + $0x368] sm:$0xff] }
 0x1c3   : > { %7560 = vmatprep.mubr.f32.mxu0 %v11548_v36  ;;  %v8822_v36 = vpack.c.bf16 %v2263_v41, %v2262_v35  ;;  %v2562_v35 = vld [vmem:[#allocation6 + $0x3b0] sm:$0xff]  ;;  %v2563_v41 = vld [vmem:[#allocation6 + $0x3b8] sm:$0xff] }
 0x1c6   : > { %7561 = vmatmul.mubr.f32.gmra.mrb[28].mxu0 %v11549_v37  ;;  %v2264_v37 = vld [vmem:[#allocation6 + $0x370] sm:$0xff] }
 0x1c7   : > { %7563 = vmatprep.mubr.f32.mxu0 %v11550_v38  ;;  %v2265_v38 = vld [vmem:[#allocation6 + $0x378] sm:$0xff] }
 0x1c8   : > { %v8826_v50 = vpack.c.bf16 %v2265_v38, %v2264_v37  ;;  %v2565_v37 = vld [vmem:[#allocation6 + $0x3c8] sm:$0xff]  ;;  %v2567_v38 = vld [vmem:[#allocation6 + $0x3d8] sm:$0xff] }
 0x1ca   : > { %7564 = vmatmul.mubr.f32.gmra.mrb[30].mxu0 %v11551_v53  ;;  %v2557_v53 = vld [vmem:[#allocation6 + $0x388] sm:$0xff] }
 0x1cb   : > { %7598 = vmatprep.mubr.f32.mxu0 %v11552_v47  ;;  %v11561_v47 = vld [vmem:[#allocation34_spill] sm:$0xff] }
 0x1ce   : > { %7599 = vmatmul.mubr.f32.vlgmr.msra.gmra.mrb[0].mxu0 %v11553_v15  ;;  %v11568_v15 = vld [vmem:[#allocation41_spill] sm:$0xff] }
 0x1cf   : > { %8801 = vmatpush3.bf16.msra.mxu0 %v8798_v25  ;;  %7601 = vmatprep.mubr.f32.mxu0 %v11554_v57  ;;  %v8814_v25 = vpack.c.bf16 %v2259_v24, %v2258_v21  ;;  %v11569_v57 = vld [vmem:[#allocation42_spill] sm:$0xff]  ;;  %v11576_v21 = vld [vmem:[#allocation49_spill] sm:$0xff]  ;;  %v10665_v24 = vld [vmem:[#allocation2 + $0x182] sm:$0xff] }
 0x1d0   : > { %8803 = vmatprep.subr.bf16.mxu0 %v8802_v13 }
 0x1d2   : > { %7602 = vmatmul.mubr.f32.gmra.mrb[2].mxu0 %v11555_v19  ;;  %v11573_v19 = vld [vmem:[#allocation46_spill] sm:$0xff] }
 0x1d3   : > { %7604 = vmatprep.mubr.f32.mxu0 %v11556_v20  ;;  %8805 = vmatpush3.bf16.msra.mxu0 %v8802_v13  ;;  %v11562_v13 = vld [vmem:[#allocation35_spill] sm:$0xff] }
 0x1d4   : > { %8807 = vmatprep.subr.bf16.mxu0 %v8806_v16  ;;  %v11574_v20 = vld [vmem:[#allocation47_spill] sm:$0xff] }
 0x1d6   : > { %7605 = vmatmul.mubr.f32.gmra.mrb[4].mxu0 %v11557_v39  ;;  %v11577_v39 = vld [vmem:[#allocation50_spill] sm:$0xff] }
 0x1d7   : > { %7607 = vmatprep.mubr.f32.mxu0 %v11558_v26  ;;  %8809 = vmatpush3.bf16.msra.mxu0 %v8806_v16  ;;  %v11570_v16 = vld [vmem:[#allocation43_spill] sm:$0xff]  ;;  %v10669_v26 = vld [vmem:[#allocation2 + $0x18a] sm:$0xff] }
 0x1d8   : > { %8811 = vmatprep.subr.bf16.mxu0 %v8810_v23 }
 0x1da   : > { %7608 = vmatmul.mubr.f32.gmra.mrb[6].mxu0 %v11559_v30  ;;  %v2560_v30 = vld [vmem:[#allocation6 + $0x3a0] sm:$0xff] }
 0x1db   : > { %7610 = vmatprep.mubr.f32.mxu0 %v11560_v31  ;;  %8813 = vmatpush3.bf16.msra.mxu0 %v8810_v23  ;;  %v11575_v23 = vld [vmem:[#allocation48_spill] sm:$0xff]  ;;  %v2561_v31 = vld [vmem:[#allocation6 + $0x3a8] sm:$0xff] }
 0x1dc   : > { %8815 = vmatprep.subr.bf16.mxu0 %v8814_v25 }
 0x1de   : > { %7611 = vmatmul.mubr.f32.gmra.mrb[8].mxu0 %v10505_v42  ;;  %v8830_v42 = vpack.c.bf16 %v2557_v53, %v2556_v49  ;;  %v2571_v49 = vld [vmem:[#allocation6 + $0x3f8] sm:$0xff]  ;;  %v2863_v53 = vld [vmem:[#allocation6 + $0x408] sm:$0xff] }
 0x1df   : > { %7613 = vmatprep.mubr.f32.mxu0 %v10507_v56  ;;  %8817 = vmatpush3.bf16.msra.mxu0 %v8814_v25  ;;  %v11563_v56 = vld [vmem:[#allocation36_spill] sm:$0xff]  ;;  %v2558_v25 = vld [vmem:[#allocation6 + $0x390] sm:$0xff] }
 0x1e0   : > { %8819 = vmatprep.subr.bf16.mxu0 %v8818_v32  ;;  %v8834_v28 = vpack.c.bf16 %v2559_v27, %v2558_v25  ;;  %v2873_v25 = vld [vmem:[#allocation6 + $0x458] sm:$0xff]  ;;  %v2532_v27 = vld [vmem:[#allocation2 + $0x99] sm:$0xff] }
 0x1e2   : > { %7614 = vmatmul.mubr.f32.gmra.mrb[10].mxu0 %v10511_v46  ;;  %v11565_v46 = vld [vmem:[#allocation38_spill] sm:$0xff] }
 0x1e3   : > { %7616 = vmatprep.mubr.f32.mxu0 %v10513_v29  ;;  %8821 = vmatpush3.bf16.msra.mxu0 %v8818_v32  ;;  %v11566_v29 = vld [vmem:[#allocation39_spill] sm:$0xff]  ;;  %v8838_v32 = vpack.c.bf16 %v2561_v31, %v2560_v30  ;;  %v2874_v31 = vld [vmem:[#allocation6 + $0x460] sm:$0xff] }
 0x1e4   : > { %8823 = vmatprep.subr.bf16.mxu0 %v8822_v36 }
 0x1e6   : > { %7617 = vmatmul.mubr.f32.gmra.mrb[12].mxu0 %v11561_v47  ;;  %v2868_v47 = vld [vmem:[#allocation6 + $0x430] sm:$0xff] }
 0x1e7   : > { %7619 = vmatprep.mubr.f32.mxu0 %v11562_v13  ;;  %8825 = vmatpush3.bf16.msra.mxu0 %v8822_v36  ;;  %v8842_v36 = vpack.c.bf16 %v2563_v41, %v2562_v35  ;;  %v2534_v35 = vld [vmem:[#allocation2 + $0xb1] sm:$0xff]  ;;  %v2535_v41 = vld [vmem:[#allocation2 + $0xc1] sm:$0xff] }
 0x1e8   : > { %8827 = vmatprep.subr.bf16.mxu0 %v8826_v50 }
 0x1ea   : > { %7620 = vmatmul.mubr.f32.gmra.mrb[14].mxu0 %v11563_v56  ;;  %v3364_v56 = vld [vmem:[#allocation8 + $0xb0] sm:$0xff] }
 0x1eb   : > { %7622 = vmatprep.mubr.f32.mxu0 %v11564_v51  ;;  %8829 = vmatpush3.bf16.msra.mxu0 %v8826_v50  ;;  %v2569_v50 = vld [vmem:[#allocation6 + $0x3e8] sm:$0xff]  ;;  %v3365_v51 = vld [vmem:[#allocation8 + $0xb8] sm:$0xff] }
 0x1ec   : > { %8831 = vmatprep.subr.bf16.mxu0 %v8830_v42 }
 0x1ee   : > { %7623 = vmatmul.mubr.f32.gmra.mrb[16].mxu0 %v11565_v46  ;;  %v2528_v46 = vld [vmem:[#allocation2 + $0x69] sm:$0xff] }
 0x1ef   : > { %7625 = vmatprep.mubr.f32.mxu0 %v11566_v29  ;;  %v2529_v29 = vld [vmem:[#allocation2 + $0x79] sm:$0xff] }
 0x1f2   : > { %7626 = vmatmul.mubr.f32.gmra.mrb[18].mxu0 %v11567_v14 }
 0x1f3   : > { %7628 = vmatprep.mubr.f32.mxu0 %v11568_v15  ;;  %v2870_v15 = vld [vmem:[#allocation6 + $0x440] sm:$0xff] }
 0x1f6   : > { %7629 = vmatmul.mubr.f32.gmra.mrb[20].mxu0 %v11569_v57  ;;  %v8906_v57 = vpack.c.bf16 %v3365_v51, %v3364_v56  ;;  %v2844_v56 = vld [vmem:[#allocation2 + $0xe2] sm:$0xff]  ;;  %v2845_v51 = vld [vmem:[#allocation2 + $0xf2] sm:$0xff] }
 0x1f7   : > { %7631 = vmatprep.mubr.f32.mxu0 %v11570_v16  ;;  %v2871_v16 = vld [vmem:[#allocation6 + $0x448] sm:$0xff] }
 0x1fa   : > { %7632 = vmatmul.mubr.f32.gmra.mrb[22].mxu0 %v11571_v17  ;;  %v3366_v17 = vld [vmem:[#allocation8 + $0xc0] sm:$0xff] }
 0x1fb   : > { %7634 = vmatprep.mubr.f32.mxu0 %v11572_v48  ;;  %v3367_v48 = vld [vmem:[#allocation8 + $0xc8] sm:$0xff] }
 0x1fe   : > { %7635 = vmatmul.mubr.f32.gmra.mrb[24].mxu0 %v11573_v19  ;;  %v2530_v19 = vld [vmem:[#allocation2 + $0x81] sm:$0xff] }
 0x1ff   : > { %7637 = vmatprep.mubr.f32.mxu0 %v11574_v20  ;;  %v2531_v20 = vld [vmem:[#allocation2 + $0x91] sm:$0xff] }
 0x202   : > { %7638 = vmatmul.mubr.f32.gmra.mrb[26].mxu0 %v11575_v23  ;;  %v8878_v23 = vpack.c.bf16 %v2871_v16, %v2870_v15  ;;  %v2849_v15 = vld [vmem:[#allocation2 + $0x122] sm:$0xff]  ;;  %v2851_v16 = vld [vmem:[#allocation2 + $0x13a] sm:$0xff] }
 0x203   : > { %7640 = vmatprep.mubr.f32.mxu0 %v11576_v21  ;;  %v8910_v21 = vpack.c.bf16 %v3367_v48, %v3366_v17  ;;  %v2852_v17 = vld [vmem:[#allocation2 + $0x142] sm:$0xff]  ;;  %v2853_v48 = vld [vmem:[#allocation2 + $0x152] sm:$0xff] }
 0x206   : > { %7641 = vmatmul.mubr.f32.gmra.mrb[28].mxu0 %v11577_v39  ;;  %v2872_v39 = vld [vmem:[#allocation6 + $0x450] sm:$0xff] }
 0x207   : > { %7643 = vmatprep.mubr.f32.mxu0 %v10665_v24  ;;  %v8882_v30 = vpack.c.bf16 %v2873_v25, %v2872_v39  ;;  %v2860_v39 = vld [vmem:[#allocation2 + $0x1a2] sm:$0xff] }
 0x208   : > { %v3368_v25 = vld [vmem:[#allocation8 + $0xd0] sm:$0xff] }
 0x20a   : > { %7644 = vmatmul.mubr.f32.gmra.mrb[30].mxu0 %v10669_v26 }
 0x20b   : > { %7678 = vmatprep.mubr.f32.mxu0 %v10385_v58  ;;  %v2564_v58 = vld [vmem:[#allocation6 + $0x3c0] sm:$0xff] }
 0x20e   : > { %7679 = vmatmul.mubr.f32.vlgmr.msra.gmra.mrb[0].mxu0 %v10389_v62  ;;  %v8846_v62 = vpack.c.bf16 %v2565_v37, %v2564_v58  ;;  %v2876_v58 = vld [vmem:[#allocation6 + $0x470] sm:$0xff]  ;;  %v2877_v37 = vld [vmem:[#allocation6 + $0x478] sm:$0xff] }
 0x20f   : > { %8833 = vmatpush3.bf16.msra.mxu0 %v8830_v42  ;;  %7681 = vmatprep.mubr.f32.mxu0 %v10391_v63  ;;  %v2566_v63 = vld [vmem:[#allocation6 + $0x3d0] sm:$0xff]  ;;  %v2869_v42 = vld [vmem:[#allocation6 + $0x438] sm:$0xff] }
 0x210   : > { %8835 = vmatprep.subr.bf16.mxu0 %v8834_v28  ;;  %v8874_v14 = vpack.c.bf16 %v2869_v42, %v2868_v47  ;;  %v2841_v47 = vld [vmem:[#allocation2 + $0xc2] sm:$0xff]  ;;  %v2843_v42 = vld [vmem:[#allocation2 + $0xda] sm:$0xff] }
 0x212   : > { %7682 = vmatmul.mubr.f32.gmra.mrb[2].mxu0 %v10395_v3  ;;  %v8850_v3 = vpack.c.bf16 %v2567_v38, %v2566_v63  ;;  %v2537_v63 = vld [vmem:[#allocation2 + $0xd9] sm:$0xff]  ;;  %v8890_v38 = vpack.c.bf16 %v2877_v37, %v2876_v58  ;;  %v3309_v58 = vld [vmem:[#allocation8] sm:$0xff] }
 0x213   : > { %7684 = vmatprep.mubr.f32.mxu0 %v10397_v4  ;;  %8837 = vmatpush3.bf16.msra.mxu0 %v8834_v28  ;;  %v2568_v4 = vld [vmem:[#allocation6 + $0x3e0] sm:$0xff]  ;;  %v3310_v37 = vld [vmem:[#allocation8 + $0x8] sm:$0xff] }
 0x214   : > { %8839 = vmatprep.subr.bf16.mxu0 %v8838_v32  ;;  %v2533_v28 = vld [vmem:[#allocation2 + $0xa9] sm:$0xff] }
 0x216   : > { %7685 = vmatmul.mubr.f32.gmra.mrb[4].mxu0 %v10401_v8  ;;  %v8854_v8 = vpack.c.bf16 %v2569_v50, %v2568_v4  ;;  %v2539_v4 = vld [vmem:[#allocation2 + $0xf1] sm:$0xff]  ;;  %v2540_v50 = vld [vmem:[#allocation2 + $0xf9] sm:$0xff] }
 0x217   : > { %7687 = vmatprep.mubr.f32.mxu0 %v10403_v9  ;;  %8841 = vmatpush3.bf16.msra.mxu0 %v8838_v32  ;;  %v2570_v9 = vld [vmem:[#allocation6 + $0x3f0] sm:$0xff]  ;;  %v2875_v32 = vld [vmem:[#allocation6 + $0x468] sm:$0xff] }
 0x218   : > { %8843 = vmatprep.subr.bf16.mxu0 %v8842_v36 }
 0x21a   : > { %7688 = vmatmul.mubr.f32.gmra.mrb[6].mxu0 %v10407_v18  ;;  %v8858_v18 = vpack.c.bf16 %v2571_v49, %v2570_v9  ;;  %v2542_v9 = vld [vmem:[#allocation2 + $0x111] sm:$0xff]  ;;  %v2543_v49 = vld [vmem:[#allocation2 + $0x121] sm:$0xff] }
 0x21b   : > { %7690 = vmatprep.mubr.f32.mxu0 %v10409_v22  ;;  %8845 = vmatpush3.bf16.msra.mxu0 %v8842_v36  ;;  %v2862_v22 = vld [vmem:[#allocation6 + $0x400] sm:$0xff]  ;;  %v8886_v36 = vpack.c.bf16 %v2875_v32, %v2874_v31  ;;  %v3371_v31 = vld [vmem:[#allocation8 + $0xe8] sm:$0xff] }
 0x21c   : > { %8847 = vmatprep.subr.bf16.mxu0 %v8846_v62 }
 0x21e   : > { %7691 = vmatmul.mubr.f32.gmra.mrb[8].mxu0 %v10413_v34  ;;  %v8862_v34 = vpack.c.bf16 %v2863_v53, %v2862_v22  ;;  %v2545_v22 = vld [vmem:[#allocation2 + $0x139] sm:$0xff]  ;;  %v2546_v53 = vld [vmem:[#allocation2 + $0x141] sm:$0xff] }
 0x21f   : > { %7693 = vmatprep.mubr.f32.mxu0 %v10415_v40  ;;  %8849 = vmatpush3.bf16.msra.mxu0 %v8846_v62  ;;  %v10702_v40 = vld [vmem:[#allocation2] sm:$0xff]  ;;  %v2536_v62 = vld [vmem:[#allocation2 + $0xc9] sm:$0xff] }
 0x220   : > { %8851 = vmatprep.subr.bf16.mxu0 %v8850_v3 }
 0x222   : > { %7694 = vmatmul.mubr.f32.gmra.mrb[10].mxu0 %v10419_v54  ;;  %v2523_v54 = vld [vmem:[#allocation2 + $0x31] sm:$0xff] }
 0x223   : > { %7696 = vmatprep.mubr.f32.mxu0 %v10421_v55  ;;  %8853 = vmatpush3.bf16.msra.mxu0 %v8850_v3  ;;  %v2864_v55 = vld [vmem:[#allocation6 + $0x410] sm:$0xff] }
 0x224   : > { %8855 = vmatprep.subr.bf16.mxu0 %v8854_v8  ;;  %v2538_v3 = vld [vmem:[#allocation2 + $0xe1] sm:$0xff] }
 0x226   : > { %7697 = vmatmul.mubr.f32.gmra.mrb[12].mxu0 %v10425_v59  ;;  %v2865_v59 = vld [vmem:[#allocation6 + $0x418] sm:$0xff] }
 0x227   : > { %7699 = vmatprep.mubr.f32.mxu0 %v10427_v60  ;;  %8857 = vmatpush3.bf16.msra.mxu0 %v8854_v8  ;;  %v3358_v60 = vld [vmem:[#allocation8 + $0x80] sm:$0xff] }
 0x228   : > { %8859 = vmatprep.subr.bf16.mxu0 %v8858_v18  ;;  %v2541_v8 = vld [vmem:[#allocation2 + $0x109] sm:$0xff] }
 0x22a   : > { %7700 = vmatmul.mubr.f32.gmra.mrb[14].mxu0 %v10431_v61  ;;  %v3359_v61 = vld [vmem:[#allocation8 + $0x88] sm:$0xff] }
 0x22b   : > { %7702 = vmatprep.mubr.f32.mxu0 %v10433_v0  ;;  %8861 = vmatpush3.bf16.msra.mxu0 %v8858_v18  ;;  %v3360_v0 = vld [vmem:[#allocation8 + $0x90] sm:$0xff]  ;;  %v2544_v18 = vld [vmem:[#allocation2 + $0x129] sm:$0xff] }
 0x22c   : > { %8863 = vmatprep.subr.bf16.mxu0 %v8862_v34 }
 0x22e   : > { %7703 = vmatmul.mubr.f32.gmra.mrb[16].mxu0 %v10437_v1  ;;  %v2524_v1 = vld [vmem:[#allocation2 + $0x39] sm:$0xff] }
 0x22f   : > { %7705 = vmatprep.mubr.f32.mxu0 %v10439_v2  ;;  %v8894_v2 = vpack.c.bf16 %v3359_v61, %v3358_v60  ;;  %v9767_v60 = vld [vmem:[#allocation2 + $0x181] sm:$0xff]  ;;  %v2553_v61 = vld [vmem:[#allocation2 + $0x199] sm:$0xff] }
 0x231   : > { %8895 = vmatprep.subr.bf16.mxu1 %v8894_v2 }
 0x232   : > { %7706 = vmatmul.mubr.f32.gmra.mrb[18].mxu0 %v10443_v5  ;;  %v3361_v5 = vld [vmem:[#allocation8 + $0x98] sm:$0xff]  ;;  %8897 = vmatpush3.bf16.msra.mxu1 %v8894_v2  ;;  %v2829_v2 = vld [vmem:[#allocation2 + $0x32] sm:$0xff] }
 0x233   : > { %7708 = vmatprep.mubr.f32.mxu0 %v10445_v6  ;;  %v2525_v6 = vld [vmem:[#allocation2 + $0x49] sm:$0xff] }
 0x236   : > { %7709 = vmatmul.mubr.f32.gmra.mrb[20].mxu0 %v10449_v7  ;;  %v8866_v7 = vpack.c.bf16 %v2865_v59, %v2864_v55  ;;  %v2549_v55 = vld [vmem:[#allocation2 + $0x169] sm:$0xff]  ;;  %v2550_v59 = vld [vmem:[#allocation2 + $0x171] sm:$0xff] }
 0x237   : > { %7711 = vmatprep.mubr.f32.mxu0 %v10451_v10  ;;  %v2866_v10 = vld [vmem:[#allocation6 + $0x420] sm:$0xff] }
 0x23a   : > { %7712 = vmatmul.mubr.f32.gmra.mrb[22].mxu0 %v10455_v11  ;;  %v8898_v11 = vpack.c.bf16 %v3361_v5, %v3360_v0  ;;  %v9768_v0 = vld [vmem:[#allocation2 + $0x189] sm:$0xff]  ;;  %v2830_v5 = vld [vmem:[#allocation2 + $0x3a] sm:$0xff] }
 0x23b   : > { %7714 = vmatprep.mubr.f32.mxu0 %v10457_v12  ;;  %v2867_v12 = vld [vmem:[#allocation6 + $0x428] sm:$0xff] }
 0x23c   : > { %8899 = vmatprep.subr.bf16.mxu1 %v8898_v11 }
 0x23d   : > { %8901 = vmatpush3.bf16.msra.mxu1 %v8898_v11  ;;  %v2834_v11 = vld [vmem:[#allocation2 + $0x6a] sm:$0xff] }
 0x23e   : > { %7715 = vmatmul.mubr.f32.gmra.mrb[24].mxu0 %v10469_v33  ;;  %v3362_v33 = vld [vmem:[#allocation8 + $0xa0] sm:$0xff] }
 0x23f   : > { %7717 = vmatprep.mubr.f32.mxu0 %v10471_v44  ;;  %v3363_v44 = vld [vmem:[#allocation8 + $0xa8] sm:$0xff] }
 0x240   : > { %v8902_v13 = vpack.c.bf16 %v3363_v44, %v3362_v33  ;;  %v2836_v33 = vld [vmem:[#allocation2 + $0x82] sm:$0xff]  ;;  %v2837_v44 = vld [vmem:[#allocation2 + $0x92] sm:$0xff] }
 0x242   : > { %7718 = vmatmul.mubr.f32.gmra.mrb[26].mxu0 %v10475_v45  ;;  %v2526_v45 = vld [vmem:[#allocation2 + $0x51] sm:$0xff]  ;;  %8903 = vmatprep.subr.bf16.mxu1 %v8902_v13 }
 0x243   : > { %7720 = vmatprep.mubr.f32.mxu0 %v10597_v52  ;;  %v2527_v52 = vld [vmem:[#allocation2 + $0x61] sm:$0xff]  ;;  %8905 = vmatpush3.bf16.msra.mxu1 %v8902_v13  ;;  %v2842_v13 = vld [vmem:[#allocation2 + $0xca] sm:$0xff] }
 0x244   : > { %8907 = vmatprep.subr.bf16.mxu1 %v8906_v57 }
 0x246   : > { %7721 = vmatmul.mubr.f32.gmra.mrb[28].mxu0 %v10601_v43  ;;  %v8870_v43 = vpack.c.bf16 %v2867_v12, %v2866_v10  ;;  %v2833_v10 = vld [vmem:[#allocation2 + $0x62] sm:$0xff]  ;;  %v2835_v12 = vld [vmem:[#allocation2 + $0x7a] sm:$0xff] }
 0x247   : > { %7723 = vmatprep.mubr.f32.mxu0 %v10702_v40  ;;  %8909 = vmatpush3.bf16.msra.mxu1 %v8906_v57  ;;  %v2850_v57 = vld [vmem:[#allocation2 + $0x12a] sm:$0xff] }
 0x248   : > { %8911 = vmatprep.subr.bf16.mxu1 %v8910_v21 }
 0x24a   : > { %7724 = vmatmul.mubr.f32.gmra.mrb[30].mxu0 %v10702_v40 }
 0x24b   : > { %7758 = vmatprep.mubr.f32.mxu0 %v2523_v54  ;;  %8913 = vmatpush3.bf16.msra.mxu1 %v8910_v21  ;;  %v2548_v54 = vld [vmem:[#allocation2 + $0x159] sm:$0xff] }
 0x24c   : > { %v2859_v21 = vld [vmem:[#allocation2 + $0x19a] sm:$0xff] }
 0x24e   : > { %7759 = vmatmul.mubr.f32.vlgmr.msra.gmra.mrb[0].mxu0 %v2524_v1  ;;  %v2554_v1 = vld [vmem:[#allocation2 + $0x1a1] sm:$0xff] }
 0x24f   : > { %8865 = vmatpush3.bf16.msra.mxu0 %v8862_v34  ;;  %7761 = vmatprep.mubr.f32.mxu0 %v2525_v6  ;;  %v2547_v34 = vld [vmem:[#allocation2 + $0x151] sm:$0xff] }
 0x250   : > { %8867 = vmatprep.subr.bf16.mxu0 %v8866_v7  ;;  %v2831_v6 = vld [vmem:[#allocation2 + $0x4a] sm:$0xff] }
 0x252   : > { %7762 = vmatmul.mubr.f32.gmra.mrb[2].mxu0 %v2526_v45  ;;  %v2838_v45 = vld [vmem:[#allocation2 + $0x9a] sm:$0xff] }
 0x253   : > { %7764 = vmatprep.mubr.f32.mxu0 %v2527_v52  ;;  %8869 = vmatpush3.bf16.msra.mxu0 %v8866_v7  ;;  %v2832_v7 = vld [vmem:[#allocation2 + $0x52] sm:$0xff]  ;;  %v2839_v52 = vld [vmem:[#allocation2 + $0xaa] sm:$0xff] }
 0x254   : > { %8871 = vmatprep.subr.bf16.mxu0 %v8870_v43 }
 0x256   : > { %7765 = vmatmul.mubr.f32.gmra.mrb[4].mxu0 %v2528_v46  ;;  %v2846_v46 = vld [vmem:[#allocation2 + $0xfa] sm:$0xff] }
 0x257   : > { %7767 = vmatprep.mubr.f32.mxu0 %v2529_v29  ;;  %8873 = vmatpush3.bf16.msra.mxu0 %v8870_v43  ;;  %v2840_v43 = vld [vmem:[#allocation2 + $0xb2] sm:$0xff]  ;;  %v2847_v29 = vld [vmem:[#allocation2 + $0x10a] sm:$0xff] }
 0x258   : > { %8875 = vmatprep.subr.bf16.mxu0 %v8874_v14 }
 0x25a   : > { %7768 = vmatmul.mubr.f32.gmra.mrb[6].mxu0 %v2530_v19  ;;  %v2854_v19 = vld [vmem:[#allocation2 + $0x15a] sm:$0xff] }
 0x25b   : > { %7770 = vmatprep.mubr.f32.mxu0 %v2531_v20  ;;  %8877 = vmatpush3.bf16.msra.mxu0 %v8874_v14  ;;  %v2848_v14 = vld [vmem:[#allocation2 + $0x112] sm:$0xff]  ;;  %v2855_v20 = vld [vmem:[#allocation2 + $0x16a] sm:$0xff] }
 0x25c   : > { %8879 = vmatprep.subr.bf16.mxu0 %v8878_v23 }
 0x25e   : > { %7771 = vmatmul.mubr.f32.gmra.mrb[8].mxu0 %v2532_v27  ;;  %v3369_v27 = vld [vmem:[#allocation8 + $0xd8] sm:$0xff] }
 0x25f   : > { %7773 = vmatprep.mubr.f32.mxu0 %v2533_v28  ;;  %8881 = vmatpush3.bf16.msra.mxu0 %v8878_v23  ;;  %v2856_v23 = vld [vmem:[#allocation2 + $0x172] sm:$0xff]  ;;  %v8914_v28 = vpack.c.bf16 %v3369_v27, %v3368_v25 }
 0x260   : > { %8883 = vmatprep.subr.bf16.mxu0 %v8882_v30 }
 0x261   : > { %8915 = vmatprep.subr.bf16.mxu1 %v8914_v28 }
 0x262   : > { %7774 = vmatmul.mubr.f32.gmra.mrb[10].mxu0 %v2534_v35  ;;  %8917 = vmatpush3.bf16.msra.mxu1 %v8914_v28  ;;  %v3372_v35 = vld [vmem:[#allocation8 + $0xf0] sm:$0xff] }
 0x263   : > { %7776 = vmatprep.mubr.f32.mxu0 %v2535_v41  ;;  %8885 = vmatpush3.bf16.msra.mxu0 %v8882_v30  ;;  %v3370_v30 = vld [vmem:[#allocation8 + $0xe0] sm:$0xff]  ;;  %v3373_v41 = vld [vmem:[#allocation8 + $0xf8] sm:$0xff] }
 0x264   : > { %8887 = vmatprep.subr.bf16.mxu0 %v8886_v36  ;;  %v8918_v32 = vpack.c.bf16 %v3371_v31, %v3370_v30 }
 0x266   : > { %7777 = vmatmul.mubr.f32.gmra.mrb[12].mxu0 %v2536_v62  ;;  %8919 = vmatprep.subr.bf16.mxu1 %v8918_v32  ;;  %v8926_v62 = vpack.c.bf16 %v3310_v37, %v3309_v58 }
 0x267   : > { %7779 = vmatprep.mubr.f32.mxu0 %v2537_v63  ;;  %8889 = vmatpush3.bf16.msra.mxu0 %v8886_v36  ;;  %v8922_v36 = vpack.c.bf16 %v3373_v41, %v3372_v35  ;;  %v3311_v63 = vld [vmem:[#allocation8 + $0x10] sm:$0xff] }
 0x268   : > { %8891 = vmatprep.subr.bf16.mxu0 %v8890_v38  ;;  %8921 = vmatpush3.bf16.msra.mxu1 %v8918_v32 }
 0x269   : > { %8923 = vmatprep.subr.bf16.mxu1 %v8922_v36 }
 0x26a   : > { %7780 = vmatmul.mubr.f32.gmra.mrb[14].mxu0 %v2538_v3 }
 0x26b   : > { %7782 = vmatprep.mubr.f32.mxu0 %v2539_v4  ;;  %8893 = vmatpush3.bf16.msra.mxu0 %v8890_v38  ;;  %v3312_v38 = vld [vmem:[#allocation8 + $0x18] sm:$0xff]  ;;  %v3313_v4 = vld [vmem:[#allocation8 + $0x20] sm:$0xff] }
 0x26c   : > { %8925 = vmatpush3.bf16.msra.mxu1 %v8922_v36  ;;  %v8930_v3 = vpack.c.bf16 %v3312_v38, %v3311_v63 }
 0x26d   : > { %8927 = vmatprep.subr.bf16.mxu1 %v8926_v62 }
 0x26e   : > { %7783 = vmatmul.mubr.f32.gmra.mrb[16].mxu0 %v2540_v50  ;;  %v3314_v50 = vld [vmem:[#allocation8 + $0x28] sm:$0xff] }
 0x26f   : > { %7785 = vmatprep.mubr.f32.mxu0 %v2541_v8  ;;  %v8934_v8 = vpack.c.bf16 %v3314_v50, %v3313_v4 }
 0x272   : > { %7786 = vmatmul.mubr.f32.gmra.mrb[18].mxu0 %v2542_v9  ;;  %v3315_v9 = vld [vmem:[#allocation8 + $0x30] sm:$0xff] }
 0x273   : > { %7788 = vmatprep.mubr.f32.mxu0 %v2543_v49  ;;  %v3316_v49 = vld [vmem:[#allocation8 + $0x38] sm:$0xff] }
 0x276   : > { %7789 = vmatmul.mubr.f32.gmra.mrb[20].mxu0 %v2544_v18  ;;  %v8938_v18 = vpack.c.bf16 %v3316_v49, %v3315_v9 }
 0x277   : > { %7791 = vmatprep.mubr.f32.mxu0 %v2545_v22  ;;  %v3317_v22 = vld [vmem:[#allocation8 + $0x40] sm:$0xff] }
 0x27a   : > { %7792 = vmatmul.mubr.f32.gmra.mrb[22].mxu0 %v2546_v53  ;;  %v3318_v53 = vld [vmem:[#allocation8 + $0x48] sm:$0xff] }
 0x27b   : > { %7794 = vmatprep.mubr.f32.mxu0 %v2547_v34  ;;  %v8942_v34 = vpack.c.bf16 %v3318_v53, %v3317_v22 }
 0x27e   : > { %7795 = vmatmul.mubr.f32.gmra.mrb[24].mxu0 %v2548_v54  ;;  %v3319_v54 = vld [vmem:[#allocation8 + $0x50] sm:$0xff] }
 0x27f   : > { %7797 = vmatprep.mubr.f32.mxu0 %v2549_v55  ;;  %v3320_v55 = vld [vmem:[#allocation8 + $0x58] sm:$0xff] }
 0x282   : > { %7798 = vmatmul.mubr.f32.gmra.mrb[26].mxu0 %v2550_v59  ;;  %v8946_v59 = vpack.c.bf16 %v3320_v55, %v3319_v54 }
 0x283   : > { %7800 = vmatprep.mubr.f32.mxu0 %v9767_v60  ;;  %v3321_v60 = vld [vmem:[#allocation8 + $0x60] sm:$0xff] }
 0x286   : > { %7801 = vmatmul.mubr.f32.gmra.mrb[28].mxu0 %v9768_v0 }
 0x287   : > { %7803 = vmatprep.mubr.f32.mxu0 %v2553_v61  ;;  %v3322_v61 = vld [vmem:[#allocation8 + $0x68] sm:$0xff] }
 0x288   : > { %v8950_v0 = vpack.c.bf16 %v3322_v61, %v3321_v60 }
 0x28a   : > { %7804 = vmatmul.mubr.f32.gmra.mrb[30].mxu0 %v2554_v1  ;;  %v3323_v1 = vld [vmem:[#allocation8 + $0x70] sm:$0xff] }
 0x28b   : > { %7838 = vmatprep.mubr.f32.mxu0 %v2829_v2  ;;  %v3324_v2 = vld [vmem:[#allocation8 + $0x78] sm:$0xff] }
 0x28e   : > { %7839 = vmatmul.mubr.f32.vlgmr.msra.gmra.mrb[0].mxu0 %v2830_v5  ;;  %v8954_v5 = vpack.c.bf16 %v3324_v2, %v3323_v1 }
 0x28f   : > { %7841 = vmatprep.mubr.f32.mxu0 %v2831_v6  ;;  %v3857_v6 = vld [vmem:[#allocation8 + $0x100] sm:$0xff] }
 0x292   : > { %7842 = vmatmul.mubr.f32.gmra.mrb[2].mxu0 %v2832_v7  ;;  %v3858_v7 = vld [vmem:[#allocation8 + $0x108] sm:$0xff] }
 0x293   : > { %7844 = vmatprep.mubr.f32.mxu0 %v2833_v10  ;;  %v10708_v10 = vpack.c.bf16 %v3858_v7, %v3857_v6 }
 0x296   : > { %7845 = vmatmul.mubr.f32.gmra.mrb[4].mxu0 %v2834_v11  ;;  %v10714_v11 = vld [vmem:[%s11407_s2] ss:$0 sm:$0xff] }
 0x297   : > { %7847 = vmatprep.mubr.f32.mxu0 %v2835_v12 }
 0x29a   : > { %7848 = vmatmul.mubr.f32.gmra.mrb[6].mxu0 %v2836_v33  ;;  %v10719_v33 = vld [vmem:[%s11408_s3] ss:$0 sm:$0xff] }
 0x29b   : > { %7850 = vmatprep.mubr.f32.mxu0 %v2837_v44 }
 0x29e   : > { %7851 = vmatmul.mubr.f32.gmra.mrb[8].mxu0 %v2838_v45 }
 0x29f   : > { %7853 = vmatprep.mubr.f32.mxu0 %v2839_v52 }
 0x2a2   : > { %7854 = vmatmul.mubr.f32.gmra.mrb[10].mxu0 %v2840_v43 }
 0x2a3   : > { %7856 = vmatprep.mubr.f32.mxu0 %v2841_v47 }
 0x2a6   : > { %7857 = vmatmul.mubr.f32.gmra.mrb[12].mxu0 %v2842_v13 }
 0x2a7   : > { %7859 = vmatprep.mubr.f32.mxu0 %v2843_v42 }
 0x2aa   : > { %7860 = vmatmul.mubr.f32.gmra.mrb[14].mxu0 %v2844_v56 }
 0x2ab   : > { %7862 = vmatprep.mubr.f32.mxu0 %v2845_v51 }
 0x2ae   : > { %7863 = vmatmul.mubr.f32.gmra.mrb[16].mxu0 %v2846_v46 }
 0x2af   : > { %7865 = vmatprep.mubr.f32.mxu0 %v2847_v29 }
 0x2b2   : > { %7866 = vmatmul.mubr.f32.gmra.mrb[18].mxu0 %v2848_v14 }
 0x2b3   : > { %7868 = vmatprep.mubr.f32.mxu0 %v2849_v15 }
 0x2b6   : > { %7869 = vmatmul.mubr.f32.gmra.mrb[20].mxu0 %v2850_v57 }
 0x2b7   : > { %7871 = vmatprep.mubr.f32.mxu0 %v2851_v16 }
 0x2ba   : > { %7872 = vmatmul.mubr.f32.gmra.mrb[22].mxu0 %v2852_v17 }
 0x2bb   : > { %7874 = vmatprep.mubr.f32.mxu0 %v2853_v48 }
 0x2be   : > { %7875 = vmatmul.mubr.f32.gmra.mrb[24].mxu0 %v2854_v19 }
 0x2bf   : > { %7877 = vmatprep.mubr.f32.mxu0 %v2855_v20 }
 0x2c2   : > { %7878 = vmatmul.mubr.f32.gmra.mrb[26].mxu0 %v2856_v23 }
 0x2c3   : > { %7880 = vmatprep.mubr.f32.mxu0 %v10665_v24  ;;  %v3325_v24 = vld [vmem:[#allocation2 + $0x1] sm:$0xff] }
 0x2c4   : > { %7918 = vmatprep.mubr.f32.mxu1 %v3325_v24 }
 0x2c6   : > { %7881 = vmatmul.mubr.f32.gmra.mrb[28].mxu0 %v10669_v26  ;;  %v3326_v26 = vld [vmem:[#allocation2 + $0x9] sm:$0xff] }
 0x2c7   : > { %7883 = vmatprep.mubr.f32.mxu0 %v2859_v21  ;;  %7919 = vmatmul.mubr.f32.vlgmr.msra.gmra.mrb[0].mxu1 %v3326_v26 }
 0x2c8   : > { %8929 = vmatpush3.bf16.msra.mxu1 %v8926_v62 }
 0x2c9   : > { %8931 = vmatprep.subr.bf16.mxu1 %v8930_v3 }
 0x2ca   : > { %7884 = vmatmul.mubr.f32.gmra.mrb[30].mxu0 %v2860_v39 }
 0x2cc   : > { %8933 = vmatpush3.bf16.msra.mxu1 %v8930_v3 }
 0x2cd   : > { %8935 = vmatprep.subr.bf16.mxu1 %v8934_v8 }
 0x2d0   : > { %8937 = vmatpush3.bf16.msra.mxu1 %v8934_v8 }
 0x2d1   : > { %8939 = vmatprep.subr.bf16.mxu1 %v8938_v18 }
 0x2d4   : > { %8941 = vmatpush3.bf16.msra.mxu1 %v8938_v18 }
 0x2d5   : > { %8943 = vmatprep.subr.bf16.mxu1 %v8942_v34 }
 0x2d8   : > { %8945 = vmatpush3.bf16.msra.mxu1 %v8942_v34 }
 0x2d9   : > { %8947 = vmatprep.subr.bf16.mxu1 %v8946_v59 }
 0x2dc   : > { %8949 = vmatpush3.bf16.msra.mxu1 %v8946_v59 }
 0x2dd   : > { %8951 = vmatprep.subr.bf16.mxu1 %v8950_v0 }
 0x2e0   : > { %8953 = vmatpush3.bf16.msra.mxu1 %v8950_v0 }
 0x2e1   : > { %8955 = vmatprep.subr.bf16.mxu1 %v8954_v5 }
 0x2e4   : > { %8957 = vmatpush3.bf16.msra.mxu1 %v8954_v5 }
 0x2e5   : > { %8959 = vmatprep.subr.bf16.mxu1 %v10708_v10 }
 0x361   : > { %v7840_v12 = vpop.f32.mrb[0].mxu0 }
 0x362   : > { %v3143_v44 = vmul.f32 %v7840_v12, %v10714_v11  ;;  %v2944_v45 = vpop.f32.mrb[1].mxu0 }
 0x363   : > { %v3142_v52 = vmul.f32 %v10714_v11, %v2944_v45 }
 0x364   : > { %v3182_v43 = vadd.f32 %v10719_v33, %v3143_v44 }
 0x365   : > { %v3181_v47 = vadd.f32 %v10719_v33, %v3142_v52  ;;  %v7843_v13 = vpop.f32.mrb[2].mxu0 }
 0x366   : > { %v3214_v42 = vmax.f32 %v3182_v43, 0.0  ;;  %v3145_v56 = vmul.f32 %v7843_v13, %v10714_v11  ;;  %v2954_v51 = vpop.f32.mrb[3].mxu0 }
 0x367   : > { %v3213_v46 = vmax.f32 %v3181_v47, 0.0  ;;  %v3144_v29 = vmul.f32 %v10714_v11, %v2954_v51 }
 0x368   : > { %3246 = vst [vmem:[#allocation2 + $0x21] sm:$0xff] %v3214_v42  ;;  %v3184_v14 = vadd.f32 %v10719_v33, %v3145_v56 }
 0x369   : > { %3245 = vst [vmem:[#allocation2 + $0x19] sm:$0xff] %v3213_v46  ;;  %v3183_v15 = vadd.f32 %v10719_v33, %v3144_v29  ;;  %v7846_v57 = vpop.f32.mrb[4].mxu0  ;;  %7921 = vmatprep.mubr.f32.mxu1 %v3213_v46 }
 0x36a   : > { %v3216_v16 = vmax.f32 %v3184_v14, 0.0  ;;  %v3147_v17 = vmul.f32 %v7846_v57, %v10714_v11  ;;  %v2964_v48 = vpop.f32.mrb[5].mxu0  ;;  %7922 = vmatmul.mubr.f32.gmra.mrb[2].mxu1 %v3214_v42 }
 0x36b   : > { %v3215_v19 = vmax.f32 %v3183_v15, 0.0  ;;  %v3146_v20 = vmul.f32 %v10714_v11, %v2964_v48 }
 0x36c   : > { %3248 = vst [vmem:[#allocation2 + $0x39] sm:$0xff] %v3216_v16  ;;  %v3186_v23 = vadd.f32 %v10719_v33, %v3147_v17 }
 0x36d   : > { %3247 = vst [vmem:[#allocation2 + $0x31] sm:$0xff] %v3215_v19  ;;  %v3185_v21 = vadd.f32 %v10719_v33, %v3146_v20  ;;  %v7849_v39 = vpop.f32.mrb[6].mxu0  ;;  %7924 = vmatprep.mubr.f32.mxu1 %v3215_v19 }
 0x36e   : > { %v3218_v25 = vmax.f32 %v3186_v23, 0.0  ;;  %v3149_v27 = vmul.f32 %v7849_v39, %v10714_v11  ;;  %v2974_v28 = vpop.f32.mrb[7].mxu0  ;;  %7925 = vmatmul.mubr.f32.gmra.mrb[4].mxu1 %v3216_v16 }
 0x36f   : > { %v3217_v30 = vmax.f32 %v3185_v21, 0.0  ;;  %v3148_v31 = vmul.f32 %v10714_v11, %v2974_v28 }
 0x370   : > { %3250 = vst [vmem:[#allocation2 + $0x51] sm:$0xff] %v3218_v25  ;;  %v3188_v32 = vadd.f32 %v10719_v33, %v3149_v27 }
 0x371   : > { %3249 = vst [vmem:[#allocation2 + $0x49] sm:$0xff] %v3217_v30  ;;  %v3187_v35 = vadd.f32 %v10719_v33, %v3148_v31  ;;  %v7852_v41 = vpop.f32.mrb[8].mxu0  ;;  %7927 = vmatprep.mubr.f32.mxu1 %v3217_v30 }
 0x372   : > { %v3220_v36 = vmax.f32 %v3188_v32, 0.0  ;;  %v3151_v24 = vmul.f32 %v7852_v41, %v10714_v11  ;;  %v2984_v26 = vpop.f32.mrb[9].mxu0  ;;  %7928 = vmatmul.mubr.f32.gmra.mrb[6].mxu1 %v3218_v25 }
 0x373   : > { %v3219_v58 = vmax.f32 %v3187_v35, 0.0  ;;  %v3150_v37 = vmul.f32 %v10714_v11, %v2984_v26 }
 0x374   : > { %3252 = vst [vmem:[#allocation2 + $0x69] sm:$0xff] %v3220_v36  ;;  %v3190_v62 = vadd.f32 %v10719_v33, %v3151_v24 }
 0x375   : > { %3251 = vst [vmem:[#allocation2 + $0x61] sm:$0xff] %v3219_v58  ;;  %v3189_v63 = vadd.f32 %v10719_v33, %v3150_v37  ;;  %v7855_v38 = vpop.f32.mrb[10].mxu0  ;;  %7930 = vmatprep.mubr.f32.mxu1 %v3219_v58 }
 0x376   : > { %v3222_v3 = vmax.f32 %v3190_v62, 0.0  ;;  %v3153_v4 = vmul.f32 %v7855_v38, %v10714_v11  ;;  %v2994_v50 = vpop.f32.mrb[11].mxu0  ;;  %7931 = vmatmul.mubr.f32.gmra.mrb[8].mxu1 %v3220_v36 }
 0x377   : > { %v3221_v8 = vmax.f32 %v3189_v63, 0.0  ;;  %v3152_v9 = vmul.f32 %v10714_v11, %v2994_v50 }
 0x378   : > { %3254 = vst [vmem:[#allocation2 + $0x81] sm:$0xff] %v3222_v3  ;;  %v3192_v49 = vadd.f32 %v10719_v33, %v3153_v4 }
 0x379   : > { %3253 = vst [vmem:[#allocation2 + $0x79] sm:$0xff] %v3221_v8  ;;  %v3191_v18 = vadd.f32 %v10719_v33, %v3152_v9  ;;  %v7858_v22 = vpop.f32.mrb[12].mxu0  ;;  %7933 = vmatprep.mubr.f32.mxu1 %v3221_v8 }
 0x37a   : > { %v3224_v53 = vmax.f32 %v3192_v49, 0.0  ;;  %v3155_v34 = vmul.f32 %v7858_v22, %v10714_v11  ;;  %v3004_v54 = vpop.f32.mrb[13].mxu0  ;;  %7934 = vmatmul.mubr.f32.gmra.mrb[10].mxu1 %v3222_v3 }
 0x37b   : > { %v3223_v55 = vmax.f32 %v3191_v18, 0.0  ;;  %v3154_v59 = vmul.f32 %v10714_v11, %v3004_v54 }
 0x37c   : > { %3256 = vst [vmem:[#allocation2 + $0x99] sm:$0xff] %v3224_v53  ;;  %v3194_v60 = vadd.f32 %v10719_v33, %v3155_v34 }
 0x37d   : > { %3255 = vst [vmem:[#allocation2 + $0x91] sm:$0xff] %v3223_v55  ;;  %v3193_v61 = vadd.f32 %v10719_v33, %v3154_v59  ;;  %v7861_v0 = vpop.f32.mrb[14].mxu0  ;;  %7936 = vmatprep.mubr.f32.mxu1 %v3223_v55 }
 0x37e   : > { %v3226_v1 = vmax.f32 %v3194_v60, 0.0  ;;  %v3157_v2 = vmul.f32 %v7861_v0, %v10714_v11  ;;  %v3014_v5 = vpop.f32.mrb[15].mxu0  ;;  %7937 = vmatmul.mubr.f32.gmra.mrb[12].mxu1 %v3224_v53 }
 0x37f   : > { %v3225_v6 = vmax.f32 %v3193_v61, 0.0  ;;  %v3156_v7 = vmul.f32 %v10714_v11, %v3014_v5 }
 0x380   : > { %3258 = vst [vmem:[#allocation2 + $0xb1] sm:$0xff] %v3226_v1  ;;  %v3196_v12 = vadd.f32 %v10719_v33, %v3157_v2 }
 0x381   : > { %3257 = vst [vmem:[#allocation2 + $0xa9] sm:$0xff] %v3225_v6  ;;  %v3195_v44 = vadd.f32 %v10719_v33, %v3156_v7  ;;  %v7864_v45 = vpop.f32.mrb[16].mxu0  ;;  %7939 = vmatprep.mubr.f32.mxu1 %v3225_v6 }
 0x382   : > { %v3228_v52 = vmax.f32 %v3196_v12, 0.0  ;;  %v3159_v43 = vmul.f32 %v7864_v45, %v10714_v11  ;;  %v3024_v47 = vpop.f32.mrb[17].mxu0  ;;  %7940 = vmatmul.mubr.f32.gmra.mrb[14].mxu1 %v3226_v1 }
 0x383   : > { %v3227_v13 = vmax.f32 %v3195_v44, 0.0  ;;  %v3158_v42 = vmul.f32 %v10714_v11, %v3024_v47 }
 0x384   : > { %3260 = vst [vmem:[#allocation2 + $0xc9] sm:$0xff] %v3228_v52  ;;  %v3198_v56 = vadd.f32 %v10719_v33, %v3159_v43 }
 0x385   : > { %3259 = vst [vmem:[#allocation2 + $0xc1] sm:$0xff] %v3227_v13  ;;  %v3197_v51 = vadd.f32 %v10719_v33, %v3158_v42  ;;  %v7867_v46 = vpop.f32.mrb[18].mxu0  ;;  %7942 = vmatprep.mubr.f32.mxu1 %v3227_v13  ;;  %v3859_v13 = vld [vmem:[#allocation8 + $0x110] sm:$0xff]  ;;  %v3860_v42 = vld [vmem:[#allocation8 + $0x118] sm:$0xff] }
 0x386   : > { %v10757_v29 = vmax.f32 %v3198_v56, 0.0  ;;  %v3161_v14 = vmul.f32 %v7867_v46, %v10714_v11  ;;  %v3034_v15 = vpop.f32.mrb[19].mxu0  ;;  %7943 = vmatmul.mubr.f32.gmra.mrb[16].mxu1 %v3228_v52  ;;  %v3862_v46 = vld [vmem:[#allocation8 + $0x128] sm:$0xff] }
 0x387   : > { %v10760_v57 = vmax.f32 %v3197_v51, 0.0  ;;  %v3160_v16 = vmul.f32 %v10714_v11, %v3034_v15  ;;  %v8962_v51 = vpack.c.bf16 %v3860_v42, %v3859_v13 }
 0x388   : > { %3262 = vst [vmem:[#allocation2 + $0xe1] sm:$0xff] %v10757_v29  ;;  %v3200_v17 = vadd.f32 %v10719_v33, %v3161_v14  ;;  %v10853_v14 = vld [vmem:[#allocation2 + $0x18] sm:$0xff] }
 0x389   : > { %3261 = vst [vmem:[#allocation2 + $0xd9] sm:$0xff] %v10760_v57  ;;  %v3199_v48 = vadd.f32 %v10719_v33, %v3160_v16  ;;  %v7870_v19 = vpop.f32.mrb[20].mxu0  ;;  %7945 = vmatprep.mubr.f32.mxu1 %v10760_v57  ;;  %v10857_v16 = vld [vmem:[#allocation2 + $0x20] sm:$0xff] }
 0x38a   : > { %v10768_v20 = vmax.f32 %v3200_v17, 0.0  ;;  %v3163_v23 = vmul.f32 %v7870_v19, %v10714_v11  ;;  %v3044_v21 = vpop.f32.mrb[21].mxu0  ;;  %7946 = vmatmul.mubr.f32.gmra.mrb[18].mxu1 %v10757_v29  ;;  %v3863_v17 = vld [vmem:[#allocation8 + $0x130] sm:$0xff]  ;;  %v10860_v19 = vld [vmem:[#allocation2 + $0x30] sm:$0xff] }
 0x38b   : > { %v10772_v39 = vmax.f32 %v3199_v48, 0.0  ;;  %v3162_v25 = vmul.f32 %v10714_v11, %v3044_v21  ;;  %v3864_v48 = vld [vmem:[#allocation8 + $0x138] sm:$0xff]  ;;  %v3865_v21 = vld [vmem:[#allocation8 + $0x140] sm:$0xff] }
 0x38c   : > { %3264 = vst [vmem:[#allocation2 + $0xf9] sm:$0xff] %v10768_v20  ;;  %v3202_v27 = vadd.f32 %v10719_v33, %v3163_v23  ;;  %v10863_v23 = vld [vmem:[#allocation2 + $0x38] sm:$0xff] }
 0x38d   : > { %3263 = vst [vmem:[#allocation2 + $0xf1] sm:$0xff] %v10772_v39  ;;  %v3201_v28 = vadd.f32 %v10719_v33, %v3162_v25  ;;  %v7873_v30 = vpop.f32.mrb[22].mxu0  ;;  %7948 = vmatprep.mubr.f32.mxu1 %v10772_v39  ;;  %v3866_v25 = vld [vmem:[#allocation8 + $0x148] sm:$0xff] }
 0x38e   : > { %v10780_v31 = vmax.f32 %v3202_v27, 0.0  ;;  %v3165_v32 = vmul.f32 %v7873_v30, %v10714_v11  ;;  %v3054_v35 = vpop.f32.mrb[23].mxu0  ;;  %7949 = vmatmul.mubr.f32.gmra.mrb[20].mxu1 %v10768_v20  ;;  %v8974_v27 = vpack.c.bf16 %v3866_v25, %v3865_v21  ;;  %v3867_v30 = vld [vmem:[#allocation8 + $0x150] sm:$0xff]  ;;  %v4166_v25 = vld [vmem:[#allocation8 + $0x198] sm:$0xff] }
 0x38f   : > { %v10784_v41 = vmax.f32 %v3201_v28, 0.0  ;;  %v3164_v36 = vmul.f32 %v10714_v11, %v3054_v35  ;;  %v10869_v28 = vld [vmem:[#allocation2 + $0x50] sm:$0xff]  ;;  %v10872_v35 = vld [vmem:[#allocation2 + $0x60] sm:$0xff] }
 0x390   : > { %3266 = vst [vmem:[#allocation2 + $0x111] sm:$0xff] %v10780_v31  ;;  %v3204_v24 = vadd.f32 %v10719_v33, %v3165_v32  ;;  %v3868_v32 = vld [vmem:[#allocation8 + $0x158] sm:$0xff]  ;;  %v4165_v21 = vld [vmem:[#allocation8 + $0x190] sm:$0xff] }
 0x391   : > { %3265 = vst [vmem:[#allocation2 + $0x109] sm:$0xff] %v10784_v41  ;;  %v3203_v26 = vadd.f32 %v10719_v33, %v3164_v36  ;;  %v7876_v58 = vpop.f32.mrb[24].mxu0  ;;  %7951 = vmatprep.mubr.f32.mxu1 %v10784_v41  ;;  %v8978_v36 = vpack.c.bf16 %v3868_v32, %v3867_v30  ;;  %v8994_v30 = vpack.c.bf16 %v4166_v25, %v4165_v21  ;;  %v4167_v32 = vld [vmem:[#allocation8 + $0x1a0] sm:$0xff]  ;;  %v4172_v21 = vld [vmem:[#allocation8 + $0x1c8] sm:$0xff] }
 0x392   : > { %v10792_v37 = vmax.f32 %v3204_v24, 0.0  ;;  %v3167_v62 = vmul.f32 %v7876_v58, %v10714_v11  ;;  %v3064_v63 = vpop.f32.mrb[25].mxu0  ;;  %7952 = vmatmul.mubr.f32.gmra.mrb[22].mxu1 %v10780_v31  ;;  %v10875_v24 = vld [vmem:[#allocation2 + $0x68] sm:$0xff]  ;;  %v3870_v58 = vld [vmem:[#allocation8 + $0x168] sm:$0xff] }
 0x393   : > { %v10796_v38 = vmax.f32 %v3203_v26, 0.0  ;;  %v3166_v3 = vmul.f32 %v10714_v11, %v3064_v63  ;;  %v3869_v26 = vld [vmem:[#allocation8 + $0x160] sm:$0xff] }
 0x394   : > { %3268 = vst [vmem:[#allocation2 + $0x129] sm:$0xff] %v10792_v37  ;;  %v3206_v4 = vadd.f32 %v10719_v33, %v3167_v62  ;;  %v10878_v62 = vld [vmem:[#allocation2 + $0x78] sm:$0xff]  ;;  %v8982_v63 = vpack.c.bf16 %v3870_v58, %v3869_v26 }
 0x395   : > { %3267 = vst [vmem:[#allocation2 + $0x121] sm:$0xff] %v10796_v38  ;;  %v3205_v50 = vadd.f32 %v10719_v33, %v3166_v3  ;;  %v7879_v8 = vpop.f32.mrb[26].mxu0  ;;  %7954 = vmatprep.mubr.f32.mxu1 %v10796_v38  ;;  %v10881_v3 = vld [vmem:[#allocation2 + $0x80] sm:$0xff] }
 0x396   : > { %v10804_v9 = vmax.f32 %v3206_v4, 0.0  ;;  %v3169_v49 = vmul.f32 %v7879_v8, %v10714_v11  ;;  %v3074_v18 = vpop.f32.mrb[27].mxu0  ;;  %7955 = vmatmul.mubr.f32.gmra.mrb[24].mxu1 %v10792_v37  ;;  %v3871_v4 = vld [vmem:[#allocation8 + $0x170] sm:$0xff]  ;;  %v10884_v8 = vld [vmem:[#allocation2 + $0x90] sm:$0xff] }
 0x397   : > { %v10808_v22 = vmax.f32 %v3205_v50, 0.0  ;;  %v3168_v53 = vmul.f32 %v10714_v11, %v3074_v18  ;;  %v3872_v50 = vld [vmem:[#allocation8 + $0x178] sm:$0xff]  ;;  %v10887_v18 = vld [vmem:[#allocation2 + $0x98] sm:$0xff] }
 0x398   : > { %3270 = vst [vmem:[#allocation2 + $0x141] sm:$0xff] %v10804_v9  ;;  %v3208_v34 = vadd.f32 %v10719_v33, %v3169_v49  ;;  %v8986_v49 = vpack.c.bf16 %v3872_v50, %v3871_v4  ;;  %v10944_v26 = vld [vmem:[#allocation2 + $0x1a] sm:$0xff]  ;;  %v4170_v50 = vld [vmem:[#allocation8 + $0x1b8] sm:$0xff] }
 0x399   : > { %3269 = vst [vmem:[#allocation2 + $0x139] sm:$0xff] %v10808_v22  ;;  %v3207_v54 = vadd.f32 %v10719_v33, %v3168_v53  ;;  %v7882_v55 = vpop.f32.mrb[28].mxu0  ;;  %7957 = vmatprep.mubr.f32.mxu1 %v10808_v22  ;;  %v4163_v53 = vld [vmem:[#allocation8 + $0x180] sm:$0xff]  ;;  %v4169_v4 = vld [vmem:[#allocation8 + $0x1b0] sm:$0xff] }
 0x39a   : > { %v10816_v59 = vmax.f32 %v3208_v34, 0.0  ;;  %v3171_v60 = vmul.f32 %v7882_v55, %v10714_v11  ;;  %v3084_v61 = vpop.f32.mrb[29].mxu0  ;;  %7958 = vmatmul.mubr.f32.gmra.mrb[26].mxu1 %v10804_v9  ;;  %v4164_v34 = vld [vmem:[#allocation8 + $0x188] sm:$0xff] }
 0x39b   : > { %v10820_v0 = vmax.f32 %v3207_v54, 0.0  ;;  %v3170_v1 = vmul.f32 %v10714_v11, %v3084_v61  ;;  %v10890_v54 = vld [vmem:[#allocation2 + $0xa8] sm:$0xff]  ;;  %v8990_v55 = vpack.c.bf16 %v4164_v34, %v4163_v53  ;;  %v10896_v61 = vld [vmem:[#allocation2 + $0xc0] sm:$0xff]  ;;  %v9002_v53 = vpack.c.bf16 %v4170_v50, %v4169_v4 }
 0x39c   : > { %3272 = vst [vmem:[#allocation2 + $0x159] sm:$0xff] %v10816_v59  ;;  %v3210_v2 = vadd.f32 %v10719_v33, %v3171_v60  ;;  %v10893_v60 = vld [vmem:[#allocation2 + $0xb0] sm:$0xff]  ;;  %v10920_v13 = vld [vmem:[#allocation2 + $0x120] sm:$0xff]  ;;  %v10923_v42 = vld [vmem:[#allocation2 + $0x128] sm:$0xff] }
 0x39d   : > { %3271 = vst [vmem:[#allocation2 + $0x151] sm:$0xff] %v10820_v0  ;;  %v3209_v5 = vadd.f32 %v10719_v33, %v3170_v1  ;;  %v7885_v6 = vpop.f32.mrb[30].mxu0  ;;  %7960 = vmatprep.mubr.f32.mxu1 %v10820_v0  ;;  %v10899_v1 = vld [vmem:[#allocation2 + $0xc8] sm:$0xff]  ;;  %v10953_v34 = vld [vmem:[#allocation2 + $0x3a] sm:$0xff] }
 0x39e   : > { %v10828_v7 = vmax.f32 %v3210_v2, 0.0  ;;  %v3173_v12 = vmul.f32 %v7885_v6, %v10714_v11  ;;  %v3094_v44 = vpop.f32.mrb[31].mxu0  ;;  %7961 = vmatmul.mubr.f32.gmra.mrb[28].mxu1 %v10816_v59  ;;  %v10902_v2 = vld [vmem:[#allocation2 + $0xd8] sm:$0xff]  ;;  %v10908_v6 = vld [vmem:[#allocation2 + $0xf0] sm:$0xff] }
 0x39f   : > { %v10832_v45 = vmax.f32 %v3209_v5, 0.0  ;;  %v3172_v52 = vmul.f32 %v10714_v11, %v3094_v44  ;;  %v10905_v5 = vld [vmem:[#allocation2 + $0xe0] sm:$0xff]  ;;  %v10914_v44 = vld [vmem:[#allocation2 + $0x108] sm:$0xff] }
 0x3a0   : > { %3274 = vst [vmem:[#allocation2 + $0x171] sm:$0xff] %v10828_v7  ;;  %v10837_v43 = vadd.f32 %v10719_v33, %v3173_v12  ;;  %v10911_v12 = vld [vmem:[#allocation2 + $0xf8] sm:$0xff]  ;;  %v10965_v50 = vld [vmem:[#allocation2 + $0x6a] sm:$0xff] }
 0x3a1   : > { %3273 = vst [vmem:[#allocation2 + $0x169] sm:$0xff] %v10832_v45  ;;  %v10841_v47 = vadd.f32 %v10719_v33, %v3172_v52  ;;  %7963 = vmatprep.mubr.f32.mxu1 %v10832_v45  ;;  %v3861_v33 = vld [vmem:[#allocation8 + $0x120] sm:$0xff]  ;;  %11582 = vst [vmem:[#allocation17_spill] sm:$0xff] %v10965_v50 }
 0x3a2   : > { %v11455_v56 = vmax.f32 %v10837_v43, 0.0  ;;  %7964 = vmatmul.mubr.f32.gmra.mrb[30].mxu1 %v10828_v7  ;;  %v8966_v15 = vpack.c.bf16 %v3862_v46, %v3861_v33  ;;  %v10917_v52 = vld [vmem:[#allocation2 + $0x110] sm:$0xff]  ;;  %v10929_v33 = vld [vmem:[#allocation2 + $0x140] sm:$0xff] }
 0x3a3   : > { %v11456_v11 = vmax.f32 %v10841_v47, 0.0  ;;  %7998 = vmatprep.mubr.f32.mxu1 %v10702_v40 }
 0x3a4   : > { %3276 = vst [vmem:[#allocation2 + $0x189] sm:$0xff] %v11455_v56  ;;  %v10932_v46 = vld [vmem:[#allocation2 + $0x150] sm:$0xff] }
 0x3a5   : > { %3275 = vst [vmem:[#allocation2 + $0x181] sm:$0xff] %v11456_v11  ;;  %v4175_v56 = vld [vmem:[#allocation8 + $0x1e0] sm:$0xff]  ;;  %v4176_v11 = vld [vmem:[#allocation8 + $0x1e8] sm:$0xff] }
 0x3a6   : > { %7999 = vmatmul.mubr.f32.vlgmr.msra.gmra.mrb[0].mxu1 %v10702_v40  ;;  %v8970_v40 = vpack.c.bf16 %v3864_v48, %v3863_v17  ;;  %v3824_v48 = vld [vmem:[#allocation2 + $0x2] sm:$0xff] }
 0x3a7   : > { %8001 = vmatprep.mubr.f32.mxu1 %v10853_v14  ;;  %8961 = vmatpush3.bf16.msra.mxu1 %v10708_v10  ;;  %v10866_v10 = vld [vmem:[#allocation2 + $0x48] sm:$0xff] }
 0x3a8   : > { %8963 = vmatprep.subr.bf16.mxu1 %v8962_v51  ;;  %v10938_v17 = vld [vmem:[#allocation2 + $0x168] sm:$0xff] }
 0x3a9   : > { %11578 = vst [vmem:[#allocation13_spill] sm:$0xff] %v10938_v17 }
 0x3aa   : > { %8002 = vmatmul.mubr.f32.gmra.mrb[2].mxu1 %v10857_v16 }
 0x3ab   : > { %8004 = vmatprep.mubr.f32.mxu1 %v10860_v19  ;;  %8965 = vmatpush3.bf16.msra.mxu1 %v8962_v51  ;;  %v10926_v51 = vld [vmem:[#allocation2 + $0x138] sm:$0xff] }
 0x3ac   : > { %8967 = vmatprep.subr.bf16.mxu1 %v8966_v15 }
 0x3ae   : > { %8005 = vmatmul.mubr.f32.gmra.mrb[4].mxu1 %v10863_v23 }
 0x3af   : > { %8007 = vmatprep.mubr.f32.mxu1 %v10866_v10  ;;  %8969 = vmatpush3.bf16.msra.mxu1 %v8966_v15  ;;  %v10935_v15 = vld [vmem:[#allocation2 + $0x158] sm:$0xff] }
 0x3b0   : > { %8971 = vmatprep.subr.bf16.mxu1 %v8970_v40 }
 0x3b2   : > { %8008 = vmatmul.mubr.f32.gmra.mrb[6].mxu1 %v10869_v28 }
 0x3b3   : > { %8010 = vmatprep.mubr.f32.mxu1 %v10872_v35  ;;  %8973 = vmatpush3.bf16.msra.mxu1 %v8970_v40  ;;  %v10941_v40 = vld [vmem:[#allocation2 + $0x170] sm:$0xff] }
 0x3b4   : > { %8975 = vmatprep.subr.bf16.mxu1 %v8974_v27  ;;  %11579 = vst [vmem:[#allocation14_spill] sm:$0xff] %v10941_v40 }
 0x3b6   : > { %8011 = vmatmul.mubr.f32.gmra.mrb[8].mxu1 %v10875_v24 }
 0x3b7   : > { %8013 = vmatprep.mubr.f32.mxu1 %v10878_v62  ;;  %8977 = vmatpush3.bf16.msra.mxu1 %v8974_v27  ;;  %v3825_v27 = vld [vmem:[#allocation2 + $0xa] sm:$0xff] }
 0x3b8   : > { %8979 = vmatprep.subr.bf16.mxu1 %v8978_v36 }
 0x3ba   : > { %8014 = vmatmul.mubr.f32.gmra.mrb[10].mxu1 %v10881_v3 }
 0x3bb   : > { %8016 = vmatprep.mubr.f32.mxu1 %v10884_v8  ;;  %8981 = vmatpush3.bf16.msra.mxu1 %v8978_v36  ;;  %v4168_v36 = vld [vmem:[#allocation8 + $0x1a8] sm:$0xff] }
 0x3bc   : > { %8983 = vmatprep.subr.bf16.mxu1 %v8982_v63  ;;  %v8998_v58 = vpack.c.bf16 %v4168_v36, %v4167_v32  ;;  %v4173_v32 = vld [vmem:[#allocation8 + $0x1d0] sm:$0xff]  ;;  %v4174_v36 = vld [vmem:[#allocation8 + $0x1d8] sm:$0xff] }
 0x3bd   : > { %v9010_v4 = vpack.c.bf16 %v4174_v36, %v4173_v32  ;;  %v10977_v36 = vld [vmem:[#allocation2 + $0x9a] sm:$0xff] }
 0x3be   : > { %8017 = vmatmul.mubr.f32.gmra.mrb[12].mxu1 %v10887_v18 }
 0x3bf   : > { %8019 = vmatprep.mubr.f32.mxu1 %v10890_v54  ;;  %8985 = vmatpush3.bf16.msra.mxu1 %v8982_v63  ;;  %v10947_v63 = vld [vmem:[#allocation2 + $0x22] sm:$0xff] }
 0x3c0   : > { %8987 = vmatprep.subr.bf16.mxu1 %v8986_v49 }
 0x3c2   : > { %8020 = vmatmul.mubr.f32.gmra.mrb[14].mxu1 %v10893_v60 }
 0x3c3   : > { %8022 = vmatprep.mubr.f32.mxu1 %v10896_v61  ;;  %8989 = vmatpush3.bf16.msra.mxu1 %v8986_v49  ;;  %v10950_v49 = vld [vmem:[#allocation2 + $0x32] sm:$0xff] }
 0x3c4   : > { %8991 = vmatprep.subr.bf16.mxu1 %v8990_v55 }
 0x3c6   : > { %8023 = vmatmul.mubr.f32.gmra.mrb[16].mxu1 %v10899_v1 }
 0x3c7   : > { %8025 = vmatprep.mubr.f32.mxu1 %v10902_v2 }
 0x3ca   : > { %8026 = vmatmul.mubr.f32.gmra.mrb[18].mxu1 %v10905_v5 }
 0x3cb   : > { %8028 = vmatprep.mubr.f32.mxu1 %v10908_v6 }
 0x3ce   : > { %8029 = vmatmul.mubr.f32.gmra.mrb[20].mxu1 %v10911_v12 }
 0x3cf   : > { %8031 = vmatprep.mubr.f32.mxu1 %v10914_v44 }
 0x3d2   : > { %8032 = vmatmul.mubr.f32.gmra.mrb[22].mxu1 %v10917_v52 }
 0x3d3   : > { %8034 = vmatprep.mubr.f32.mxu1 %v10920_v13 }
 0x3d6   : > { %8035 = vmatmul.mubr.f32.gmra.mrb[24].mxu1 %v10923_v42 }
 0x3d7   : > { %8037 = vmatprep.mubr.f32.mxu1 %v10926_v51 }
 0x3da   : > { %8038 = vmatmul.mubr.f32.gmra.mrb[26].mxu1 %v10929_v33 }
 0x3db   : > { %8040 = vmatprep.mubr.f32.mxu1 %v10932_v46 }
 0x3de   : > { %8041 = vmatmul.mubr.f32.gmra.mrb[28].mxu1 %v10935_v15 }
 0x3df   : > { %8043 = vmatprep.mubr.f32.mxu1 %v10938_v17 }
 0x3e2   : > { %8044 = vmatmul.mubr.f32.gmra.mrb[30].mxu1 %v10941_v40 }
 0x3e3   : > { %8078 = vmatprep.mubr.f32.mxu1 %v3824_v48  ;;  %v4171_v48 = vld [vmem:[#allocation8 + $0x1c0] sm:$0xff] }
 0x3e4   : > { %v9006_v25 = vpack.c.bf16 %v4172_v21, %v4171_v48  ;;  %v9014_v48 = vpack.c.bf16 %v4176_v11, %v4175_v56  ;;  %v10971_v21 = vld [vmem:[#allocation2 + $0x82] sm:$0xff]  ;;  %v10980_v56 = vld [vmem:[#allocation2 + $0xaa] sm:$0xff] }
 0x3e5   : > { %11584 = vst [vmem:[#allocation19_spill] sm:$0xff] %v10980_v56 }
 0x3e6   : > { %8079 = vmatmul.mubr.f32.vlgmr.msra.gmra.mrb[0].mxu1 %v3825_v27  ;;  %v10959_v27 = vld [vmem:[#allocation2 + $0x52] sm:$0xff] }
 0x3e7   : > { %8081 = vmatprep.mubr.f32.mxu1 %v10944_v26  ;;  %8993 = vmatpush3.bf16.msra.mxu1 %v8990_v55  ;;  %v10956_v55 = vld [vmem:[#allocation2 + $0x4a] sm:$0xff]  ;;  %11580 = vst [vmem:[#allocation15_spill] sm:$0xff] %v10959_v27 }
 0x3e8   : > { %8995 = vmatprep.subr.bf16.mxu1 %v8994_v30 }
 0x3ea   : > { %8082 = vmatmul.mubr.f32.gmra.mrb[2].mxu1 %v10947_v63 }
 0x3eb   : > { %8084 = vmatprep.mubr.f32.mxu1 %v10950_v49  ;;  %8997 = vmatpush3.bf16.msra.mxu1 %v8994_v30  ;;  %v10962_v30 = vld [vmem:[#allocation2 + $0x62] sm:$0xff] }
 0x3ec   : > { %8999 = vmatprep.subr.bf16.mxu1 %v8998_v58  ;;  %11581 = vst [vmem:[#allocation16_spill] sm:$0xff] %v10962_v30 }
 0x3ee   : > { %8085 = vmatmul.mubr.f32.gmra.mrb[4].mxu1 %v10953_v34 }
 0x3ef   : > { %8087 = vmatprep.mubr.f32.mxu1 %v10956_v55  ;;  %9001 = vmatpush3.bf16.msra.mxu1 %v8998_v58  ;;  %v10968_v58 = vld [vmem:[#allocation2 + $0x7a] sm:$0xff] }
 0x3f0   : > { %9003 = vmatprep.subr.bf16.mxu1 %v9002_v53  ;;  %11583 = vst [vmem:[#allocation18_spill] sm:$0xff] %v10968_v58 }
 0x3f2   : > { %8088 = vmatmul.mubr.f32.gmra.mrb[6].mxu1 %v10959_v27  ;;  %v4177_v27 = vld [vmem:[#allocation8 + $0x1f0] sm:$0xff] }
 0x3f3   : > { %8090 = vmatprep.mubr.f32.mxu1 %v10962_v30  ;;  %9005 = vmatpush3.bf16.msra.mxu1 %v9002_v53  ;;  %v4178_v30 = vld [vmem:[#allocation8 + $0x1f8] sm:$0xff]  ;;  %v10974_v53 = vld [vmem:[#allocation2 + $0x92] sm:$0xff] }
 0x3f4   : > { %9007 = vmatprep.subr.bf16.mxu1 %v9006_v25  ;;  %v9018_v32 = vpack.c.bf16 %v4178_v30, %v4177_v27  ;;  %v10989_v27 = vld [vmem:[#allocation2 + $0xca] sm:$0xff]  ;;  %v10992_v30 = vld [vmem:[#allocation2 + $0xda] sm:$0xff] }
 0x3f5   : > { %11587 = vst [vmem:[#allocation22_spill] sm:$0xff] %v10989_v27  ;;  %11588 = vst [vmem:[#allocation23_spill] sm:$0xff] %v10992_v30 }
 0x3f6   : > { %8091 = vmatmul.mubr.f32.gmra.mrb[8].mxu1 %v10965_v50  ;;  %v4469_v50 = vld [vmem:[#allocation8 + $0x200] sm:$0xff] }
 0x3f7   : > { %8093 = vmatprep.mubr.f32.mxu1 %v10968_v58  ;;  %9009 = vmatpush3.bf16.msra.mxu1 %v9006_v25  ;;  %v4470_v58 = vld [vmem:[#allocation8 + $0x208] sm:$0xff] }
 0x3f8   : > { %9011 = vmatprep.subr.bf16.mxu1 %v9010_v4  ;;  %v9022_v11 = vpack.c.bf16 %v4470_v58, %v4469_v50  ;;  %v10983_v25 = vld [vmem:[#allocation2 + $0xb2] sm:$0xff]  ;;  %v11001_v58 = vld [vmem:[#allocation2 + $0xfa] sm:$0xff] }
 0x3f9   : > { %11585 = vst [vmem:[#allocation20_spill] sm:$0xff] %v10983_v25  ;;  %v10998_v50 = vld [vmem:[#allocation2 + $0xf2] sm:$0xff]  ;;  %11591 = vst [vmem:[#allocation26_spill] sm:$0xff] %v11001_v58 }
 0x3fa   : > { %8094 = vmatmul.mubr.f32.gmra.mrb[10].mxu1 %v10971_v21  ;;  %11590 = vst [vmem:[#allocation25_spill] sm:$0xff] %v10998_v50 }
 0x3fb   : > { %8096 = vmatprep.mubr.f32.mxu1 %v10974_v53  ;;  %9013 = vmatpush3.bf16.msra.mxu1 %v9010_v4  ;;  %v10986_v4 = vld [vmem:[#allocation2 + $0xc2] sm:$0xff] }
 0x3fc   : > { %9015 = vmatprep.subr.bf16.mxu1 %v9014_v48  ;;  %11586 = vst [vmem:[#allocation21_spill] sm:$0xff] %v10986_v4 }
 0x3fe   : > { %8097 = vmatmul.mubr.f32.gmra.mrb[12].mxu1 %v10977_v36 }
 0x3ff   : > { %8099 = vmatprep.mubr.f32.mxu1 %v10980_v56  ;;  %9017 = vmatpush3.bf16.msra.mxu1 %v9014_v48  ;;  %v10995_v48 = vld [vmem:[#allocation2 + $0xe2] sm:$0xff]  ;;  %v4474_v56 = vld [vmem:[#allocation8 + $0x228] sm:$0xff] }
 0x400   : > { %9019 = vmatprep.subr.bf16.mxu1 %v9018_v32  ;;  %11589 = vst [vmem:[#allocation24_spill] sm:$0xff] %v10995_v48 }
 0x402   : > { %8100 = vmatmul.mubr.f32.gmra.mrb[14].mxu1 %v10983_v25  ;;  %v4473_v25 = vld [vmem:[#allocation8 + $0x220] sm:$0xff] }
 0x403   : > { %8102 = vmatprep.mubr.f32.mxu1 %v10986_v4  ;;  %9021 = vmatpush3.bf16.msra.mxu1 %v9018_v32  ;;  %v11004_v32 = vld [vmem:[#allocation2 + $0x10a] sm:$0xff]  ;;  %v4471_v4 = vld [vmem:[#allocation8 + $0x210] sm:$0xff] }
 0x404   : > { %9023 = vmatprep.subr.bf16.mxu1 %v9022_v11  ;;  %11592 = vst [vmem:[#allocation27_spill] sm:$0xff] %v11004_v32 }
 0x406   : > { %8103 = vmatmul.mubr.f32.gmra.mrb[16].mxu1 %v10989_v27  ;;  %v11007_v27 = vld [vmem:[#allocation2 + $0x112] sm:$0xff] }
 0x407   : > { %8105 = vmatprep.mubr.f32.mxu1 %v10992_v30  ;;  %11593 = vst [vmem:[#allocation28_spill] sm:$0xff] %v11007_v27  ;;  %v11010_v30 = vld [vmem:[#allocation2 + $0x122] sm:$0xff] }
 0x408   : > { %11594 = vst [vmem:[#allocation29_spill] sm:$0xff] %v11010_v30 }
 0x40a   : > { %8106 = vmatmul.mubr.f32.gmra.mrb[18].mxu1 %v10995_v48  ;;  %v11013_v48 = vld [vmem:[#allocation2 + $0x12a] sm:$0xff] }
 0x40b   : > { %8108 = vmatprep.mubr.f32.mxu1 %v10998_v50  ;;  %11595 = vst [vmem:[#allocation30_spill] sm:$0xff] %v11013_v48  ;;  %v11016_v50 = vld [vmem:[#allocation2 + $0x13a] sm:$0xff] }
 0x40c   : > { %11596 = vst [vmem:[#allocation31_spill] sm:$0xff] %v11016_v50 }
 0x40e   : > { %8109 = vmatmul.mubr.f32.gmra.mrb[20].mxu1 %v11001_v58  ;;  %v11019_v58 = vld [vmem:[#allocation2 + $0x142] sm:$0xff] }
 0x40f   : > { %8111 = vmatprep.mubr.f32.mxu1 %v11004_v32  ;;  %11597 = vst [vmem:[#allocation32_spill] sm:$0xff] %v11019_v58  ;;  %v11022_v32 = vld [vmem:[#allocation2 + $0x152] sm:$0xff] }
 0x410   : > { %11598 = vst [vmem:[#allocation33_spill] sm:$0xff] %v11022_v32 }
 0x412   : > { %8112 = vmatmul.mubr.f32.gmra.mrb[22].mxu1 %v11007_v27  ;;  %v11025_v27 = vld [vmem:[#allocation2 + $0x15a] sm:$0xff] }
 0x413   : > { %8114 = vmatprep.mubr.f32.mxu1 %v11010_v30  ;;  %11599 = vst [vmem:[#allocation34_spill] sm:$0xff] %v11025_v27  ;;  %v11028_v30 = vld [vmem:[#allocation2 + $0x16a] sm:$0xff] }
 0x414   : > { %11600 = vst [vmem:[#allocation35_spill] sm:$0xff] %v11028_v30 }
 0x416   : > { %8115 = vmatmul.mubr.f32.gmra.mrb[24].mxu1 %v11013_v48  ;;  %v11031_v48 = vld [vmem:[#allocation2 + $0x172] sm:$0xff] }
 0x417   : > { %8117 = vmatprep.mubr.f32.mxu1 %v11016_v50  ;;  %11601 = vst [vmem:[#allocation36_spill] sm:$0xff] %v11031_v48  ;;  %v4472_v50 = vld [vmem:[#allocation8 + $0x218] sm:$0xff] }
 0x41a   : > { %8118 = vmatmul.mubr.f32.gmra.mrb[26].mxu1 %v11019_v58  ;;  %v9026_v58 = vpack.c.bf16 %v4472_v50, %v4471_v4  ;;  %v4478_v4 = vld [vmem:[#allocation8 + $0x248] sm:$0xff]  ;;  %v4481_v50 = vld [vmem:[#allocation8 + $0x260] sm:$0xff] }
 0x41b   : > { %8120 = vmatprep.mubr.f32.mxu1 %v11022_v32  ;;  %v4475_v32 = vld [vmem:[#allocation8 + $0x230] sm:$0xff] }
 0x41e   : > { %8121 = vmatmul.mubr.f32.gmra.mrb[28].mxu1 %v11025_v27  ;;  %v9030_v27 = vpack.c.bf16 %v4474_v56, %v4473_v25  ;;  %v4480_v56 = vld [vmem:[#allocation8 + $0x258] sm:$0xff] }
 0x41f   : > { %8123 = vmatprep.mubr.f32.mxu1 %v11028_v30  ;;  %v4476_v30 = vld [vmem:[#allocation8 + $0x238] sm:$0xff] }
 0x422   : > { %8124 = vmatmul.mubr.f32.gmra.mrb[30].mxu1 %v11031_v48  ;;  %v9034_v48 = vpack.c.bf16 %v4476_v30, %v4475_v32  ;;  %v4482_v30 = vld [vmem:[#allocation8 + $0x268] sm:$0xff]  ;;  %v4484_v32 = vld [vmem:[#allocation8 + $0x278] sm:$0xff] }
 0x423   : > { %8158 = vmatprep.mubr.f32.mxu1 %v10853_v14  ;;  %v4477_v14 = vld [vmem:[#allocation8 + $0x240] sm:$0xff] }
 0x426   : > { %8159 = vmatmul.mubr.f32.vlgmr.msra.gmra.mrb[0].mxu1 %v10857_v16  ;;  %v9038_v16 = vpack.c.bf16 %v4478_v4, %v4477_v14  ;;  %v4775_v14 = vld [vmem:[#allocation8 + $0x280] sm:$0xff]  ;;  %v4776_v4 = vld [vmem:[#allocation8 + $0x288] sm:$0xff] }
 0x427   : > { %8161 = vmatprep.mubr.f32.mxu1 %v10860_v19  ;;  %9025 = vmatpush3.bf16.msra.mxu1 %v9022_v11  ;;  %v4479_v11 = vld [vmem:[#allocation8 + $0x250] sm:$0xff] }
 0x428   : > { %9027 = vmatprep.subr.bf16.mxu1 %v9026_v58  ;;  %v9042_v25 = vpack.c.bf16 %v4480_v56, %v4479_v11  ;;  %v11064_v11 = vld [vmem:[#allocation2 + $0x180] sm:$0xff]  ;;  %v11067_v56 = vld [vmem:[#allocation2 + $0x188] sm:$0xff] }
 0x429   : > { %11602 = vst [vmem:[#allocation37_spill] sm:$0xff] %v11064_v11  ;;  %11603 = vst [vmem:[#allocation38_spill] sm:$0xff] %v11067_v56 }
 0x42a   : > { %8162 = vmatmul.mubr.f32.gmra.mrb[2].mxu1 %v10863_v23 }
 0x42b   : > { %8164 = vmatprep.mubr.f32.mxu1 %v10866_v10  ;;  %9029 = vmatpush3.bf16.msra.mxu1 %v9026_v58  ;;  %v4483_v58 = vld [vmem:[#allocation8 + $0x270] sm:$0xff] }
 0x42c   : > { %9031 = vmatprep.subr.bf16.mxu1 %v9030_v27 }
 0x42e   : > { %8165 = vmatmul.mubr.f32.gmra.mrb[4].mxu1 %v10869_v28 }
 0x42f   : > { %8167 = vmatprep.mubr.f32.mxu1 %v10872_v35  ;;  %9033 = vmatpush3.bf16.msra.mxu1 %v9030_v27  ;;  %v9046_v27 = vpack.c.bf16 %v4482_v30, %v4481_v50  ;;  %v4778_v50 = vld [vmem:[#allocation8 + $0x298] sm:$0xff]  ;;  %v4436_v30 = vld [vmem:[#allocation2 + $0x19] sm:$0xff] }
 0x430   : > { %9035 = vmatprep.subr.bf16.mxu1 %v9034_v48 }
 0x432   : > { %8168 = vmatmul.mubr.f32.gmra.mrb[6].mxu1 %v10875_v24 }
 0x433   : > { %8170 = vmatprep.mubr.f32.mxu1 %v10878_v62  ;;  %9037 = vmatpush3.bf16.msra.mxu1 %v9034_v48  ;;  %v9050_v48 = vpack.c.bf16 %v4484_v32, %v4483_v58  ;;  %v4437_v58 = vld [vmem:[#allocation2 + $0x21] sm:$0xff]  ;;  %v4779_v32 = vld [vmem:[#allocation8 + $0x2a0] sm:$0xff] }
 0x434   : > { %9039 = vmatprep.subr.bf16.mxu1 %v9038_v16 }
 0x436   : > { %8171 = vmatmul.mubr.f32.gmra.mrb[8].mxu1 %v10881_v3 }
 0x437   : > { %8173 = vmatprep.mubr.f32.mxu1 %v10884_v8  ;;  %9041 = vmatpush3.bf16.msra.mxu1 %v9038_v16  ;;  %v9054_v16 = vpack.c.bf16 %v4776_v4, %v4775_v14  ;;  %v11070_v14 = vld [vmem:[#allocation2 + $0x31] sm:$0xff] }
 0x438   : > { %9043 = vmatprep.subr.bf16.mxu1 %v9042_v25 }
 0x43a   : > { %8174 = vmatmul.mubr.f32.gmra.mrb[10].mxu1 %v10887_v18 }
 0x43b   : > { %8176 = vmatprep.mubr.f32.mxu1 %v10890_v54  ;;  %9045 = vmatpush3.bf16.msra.mxu1 %v9042_v25  ;;  %v4777_v25 = vld [vmem:[#allocation8 + $0x290] sm:$0xff] }
 0x43c   : > { %9047 = vmatprep.subr.bf16.mxu1 %v9046_v27 }
 0x43e   : > { %8177 = vmatmul.mubr.f32.gmra.mrb[12].mxu1 %v10893_v60 }
 0x43f   : > { %8179 = vmatprep.mubr.f32.mxu1 %v10896_v61  ;;  %9049 = vmatpush3.bf16.msra.mxu1 %v9046_v27  ;;  %v9058_v27 = vpack.c.bf16 %v4778_v50, %v4777_v25  ;;  %v11079_v50 = vld [vmem:[#allocation2 + $0x51] sm:$0xff] }
 0x440   : > { %9051 = vmatprep.subr.bf16.mxu1 %v9050_v48  ;;  %11606 = vst [vmem:[#allocation41_spill] sm:$0xff] %v11079_v50 }
 0x442   : > { %8180 = vmatmul.mubr.f32.gmra.mrb[14].mxu1 %v10899_v1 }
 0x443   : > { %8182 = vmatprep.mubr.f32.mxu1 %v10902_v2  ;;  %9053 = vmatpush3.bf16.msra.mxu1 %v9050_v48  ;;  %v4780_v48 = vld [vmem:[#allocation8 + $0x2a8] sm:$0xff] }
 0x444   : > { %9055 = vmatprep.subr.bf16.mxu1 %v9054_v16  ;;  %v9062_v4 = vpack.c.bf16 %v4780_v48, %v4779_v32  ;;  %v11085_v48 = vld [vmem:[#allocation2 + $0x69] sm:$0xff] }
 0x445   : > { %11608 = vst [vmem:[#allocation43_spill] sm:$0xff] %v11085_v48 }
 0x446   : > { %8183 = vmatmul.mubr.f32.gmra.mrb[16].mxu1 %v10905_v5 }
 0x447   : > { %8185 = vmatprep.mubr.f32.mxu1 %v10908_v6 }
 0x44a   : > { %8186 = vmatmul.mubr.f32.gmra.mrb[18].mxu1 %v10911_v12 }
 0x44b   : > { %8188 = vmatprep.mubr.f32.mxu1 %v10914_v44 }
 0x44e   : > { %8189 = vmatmul.mubr.f32.gmra.mrb[20].mxu1 %v10917_v52 }
 0x44f   : > { %8191 = vmatprep.mubr.f32.mxu1 %v10920_v13 }
 0x452   : > { %8192 = vmatmul.mubr.f32.gmra.mrb[22].mxu1 %v10923_v42 }
 0x453   : > { %8194 = vmatprep.mubr.f32.mxu1 %v10926_v51 }
 0x456   : > { %8195 = vmatmul.mubr.f32.gmra.mrb[24].mxu1 %v10929_v33 }
 0x457   : > { %8197 = vmatprep.mubr.f32.mxu1 %v10932_v46 }
 0x45a   : > { %8198 = vmatmul.mubr.f32.gmra.mrb[26].mxu1 %v10935_v15 }
 0x45b   : > { %8200 = vmatprep.mubr.f32.mxu1 %v10938_v17  ;;  %v4782_v17 = vld [vmem:[#allocation8 + $0x2b8] sm:$0xff] }
 0x45e   : > { %8201 = vmatmul.mubr.f32.gmra.mrb[28].mxu1 %v10941_v40  ;;  %v4781_v40 = vld [vmem:[#allocation8 + $0x2b0] sm:$0xff] }
 0x45f   : > { %8203 = vmatprep.mubr.f32.mxu1 %v11064_v11  ;;  %v11073_v11 = vld [vmem:[#allocation2 + $0x39] sm:$0xff]  ;;  %v9066_v25 = vpack.c.bf16 %v4782_v17, %v4781_v40 }
 0x460   : > { %11604 = vst [vmem:[#allocation39_spill] sm:$0xff] %v11073_v11  ;;  %v11088_v17 = vld [vmem:[#allocation2 + $0x79] sm:$0xff] }
 0x461   : > { %11609 = vst [vmem:[#allocation44_spill] sm:$0xff] %v11088_v17 }
 0x462   : > { %8204 = vmatmul.mubr.f32.gmra.mrb[30].mxu1 %v11067_v56  ;;  %v11076_v56 = vld [vmem:[#allocation2 + $0x49] sm:$0xff] }
 0x463   : > { %8238 = vmatprep.mubr.f32.mxu1 %v4436_v30  ;;  %11605 = vst [vmem:[#allocation40_spill] sm:$0xff] %v11076_v56  ;;  %v4783_v30 = vld [vmem:[#allocation8 + $0x2c0] sm:$0xff] }
 0x466   : > { %8239 = vmatmul.mubr.f32.vlgmr.msra.gmra.mrb[0].mxu1 %v4437_v58  ;;  %v4784_v58 = vld [vmem:[#allocation8 + $0x2c8] sm:$0xff] }
 0x467   : > { %8241 = vmatprep.mubr.f32.mxu1 %v11070_v14  ;;  %9057 = vmatpush3.bf16.msra.mxu1 %v9054_v16  ;;  %v11082_v16 = vld [vmem:[#allocation2 + $0x61] sm:$0xff]  ;;  %v9070_v32 = vpack.c.bf16 %v4784_v58, %v4783_v30  ;;  %v11097_v58 = vld [vmem:[#allocation2 + $0x99] sm:$0xff] }
 0x468   : > { %9059 = vmatprep.subr.bf16.mxu1 %v9058_v27  ;;  %11607 = vst [vmem:[#allocation42_spill] sm:$0xff] %v11082_v16 }
 0x46a   : > { %8242 = vmatmul.mubr.f32.gmra.mrb[2].mxu1 %v11073_v11  ;;  %v4785_v11 = vld [vmem:[#allocation8 + $0x2d0] sm:$0xff] }
 0x46b   : > { %8244 = vmatprep.mubr.f32.mxu1 %v11076_v56  ;;  %9061 = vmatpush3.bf16.msra.mxu1 %v9058_v27  ;;  %v4786_v56 = vld [vmem:[#allocation8 + $0x2d8] sm:$0xff] }
 0x46c   : > { %9063 = vmatprep.subr.bf16.mxu1 %v9062_v4  ;;  %v9074_v40 = vpack.c.bf16 %v4786_v56, %v4785_v11  ;;  %v11091_v27 = vld [vmem:[#allocation2 + $0x81] sm:$0xff]  ;;  %v11100_v11 = vld [vmem:[#allocation2 + $0xa9] sm:$0xff] }
 0x46d   : > { %11610 = vst [vmem:[#allocation45_spill] sm:$0xff] %v11091_v27 }
 0x46e   : > { %8245 = vmatmul.mubr.f32.gmra.mrb[4].mxu1 %v11079_v50  ;;  %v4787_v50 = vld [vmem:[#allocation8 + $0x2e0] sm:$0xff] }
 0x46f   : > { %8247 = vmatprep.mubr.f32.mxu1 %v11082_v16  ;;  %9065 = vmatpush3.bf16.msra.mxu1 %v9062_v4  ;;  %v4788_v16 = vld [vmem:[#allocation8 + $0x2e8] sm:$0xff] }
 0x470   : > { %9067 = vmatprep.subr.bf16.mxu1 %v9066_v25  ;;  %v11094_v4 = vld [vmem:[#allocation2 + $0x91] sm:$0xff]  ;;  %v9078_v30 = vpack.c.bf16 %v4788_v16, %v4787_v50  ;;  %v11106_v50 = vld [vmem:[#allocation2 + $0xc1] sm:$0xff] }
 0x471   : > { %11611 = vst [vmem:[#allocation46_spill] sm:$0xff] %v11094_v4 }
 0x472   : > { %8248 = vmatmul.mubr.f32.gmra.mrb[6].mxu1 %v11085_v48  ;;  %v4789_v48 = vld [vmem:[#allocation8 + $0x2f0] sm:$0xff] }
 0x473   : > { %8250 = vmatprep.mubr.f32.mxu1 %v11088_v17  ;;  %9069 = vmatpush3.bf16.msra.mxu1 %v9066_v25  ;;  %v4790_v17 = vld [vmem:[#allocation8 + $0x2f8] sm:$0xff]  ;;  %v11103_v25 = vld [vmem:[#allocation2 + $0xb1] sm:$0xff] }
 0x474   : > { %9071 = vmatprep.subr.bf16.mxu1 %v9070_v32  ;;  %v9082_v56 = vpack.c.bf16 %v4790_v17, %v4789_v48  ;;  %v11617_v48 = vld [vmem:[#allocation18_spill] sm:$0xff] }
 0x475   : > { %v5094_v17 = vld [vmem:[#allocation8 + $0x368] sm:$0xff] }
 0x476   : > { %8251 = vmatmul.mubr.f32.gmra.mrb[8].mxu1 %v11091_v27  ;;  %v5081_v27 = vld [vmem:[#allocation8 + $0x300] sm:$0xff] }
 0x477   : > { %8253 = vmatprep.mubr.f32.mxu1 %v11094_v4  ;;  %9073 = vmatpush3.bf16.msra.mxu1 %v9070_v32  ;;  %v5082_v4 = vld [vmem:[#allocation8 + $0x308] sm:$0xff]  ;;  %v11109_v32 = vld [vmem:[#allocation2 + $0xc9] sm:$0xff] }
 0x478   : > { %9075 = vmatprep.subr.bf16.mxu1 %v9074_v40  ;;  %v9086_v16 = vpack.c.bf16 %v5082_v4, %v5081_v27  ;;  %v5095_v27 = vld [vmem:[#allocation8 + $0x370] sm:$0xff]  ;;  %v5096_v4 = vld [vmem:[#allocation8 + $0x378] sm:$0xff] }
 0x47a   : > { %8254 = vmatmul.mubr.f32.gmra.mrb[10].mxu1 %v11097_v58 }
 0x47b   : > { %8256 = vmatprep.mubr.f32.mxu1 %v11100_v11  ;;  %9077 = vmatpush3.bf16.msra.mxu1 %v9074_v40 }
 0x47c   : > { %9079 = vmatprep.subr.bf16.mxu1 %v9078_v30 }
 0x47e   : > { %8257 = vmatmul.mubr.f32.gmra.mrb[12].mxu1 %v11103_v25 }
 0x47f   : > { %8259 = vmatprep.mubr.f32.mxu1 %v11106_v50  ;;  %9081 = vmatpush3.bf16.msra.mxu1 %v9078_v30  ;;  %v11618_v30 = vld [vmem:[#allocation19_spill] sm:$0xff] }
 0x480   : > { %9083 = vmatprep.subr.bf16.mxu1 %v9082_v56 }
 0x482   : > { %8260 = vmatmul.mubr.f32.gmra.mrb[14].mxu1 %v11109_v32 }
 0x483   : > { %8262 = vmatprep.mubr.f32.mxu1 %v10760_v57  ;;  %9085 = vmatpush3.bf16.msra.mxu1 %v9082_v56  ;;  %v5083_v57 = vld [vmem:[#allocation8 + $0x310] sm:$0xff]  ;;  %v9114_v56 = vpack.c.bf16 %v5096_v4, %v5095_v27  ;;  %v5394_v4 = vld [vmem:[#allocation8 + $0x3b8] sm:$0xff] }
 0x484   : > { %9087 = vmatprep.subr.bf16.mxu1 %v9086_v16  ;;  %v5393_v27 = vld [vmem:[#allocation8 + $0x3b0] sm:$0xff] }
 0x486   : > { %8263 = vmatmul.mubr.f32.gmra.mrb[16].mxu1 %v10757_v29  ;;  %v11612_v29 = vmax.f32 %v10841_v47, 0.0 }
 0x487   : > { %8265 = vmatprep.mubr.f32.mxu1 %v10772_v39  ;;  %v11613_v39 = vmax.f32 %v10837_v43, 0.0  ;;  %v11615_v43 = vld [vmem:[#allocation16_spill] sm:$0xff] }
 0x48a   : > { %8266 = vmatmul.mubr.f32.gmra.mrb[18].mxu1 %v10768_v20  ;;  %v5084_v20 = vld [vmem:[#allocation8 + $0x318] sm:$0xff] }
 0x48b   : > { %8268 = vmatprep.mubr.f32.mxu1 %v10784_v41  ;;  %v5085_v41 = vld [vmem:[#allocation8 + $0x320] sm:$0xff] }
 0x48e   : > { %8269 = vmatmul.mubr.f32.gmra.mrb[20].mxu1 %v10780_v31  ;;  %v9090_v31 = vpack.c.bf16 %v5084_v20, %v5083_v57  ;;  %v11619_v57 = vld [vmem:[#allocation20_spill] sm:$0xff]  ;;  %v11620_v20 = vld [vmem:[#allocation21_spill] sm:$0xff] }
 0x48f   : > { %8271 = vmatprep.mubr.f32.mxu1 %v10796_v38 }
 0x492   : > { %8272 = vmatmul.mubr.f32.gmra.mrb[22].mxu1 %v10792_v37  ;;  %v5086_v37 = vld [vmem:[#allocation8 + $0x328] sm:$0xff] }
 0x493   : > { %8274 = vmatprep.mubr.f32.mxu1 %v10808_v22  ;;  %v9094_v38 = vpack.c.bf16 %v5086_v37, %v5085_v41  ;;  %v5088_v22 = vld [vmem:[#allocation8 + $0x338] sm:$0xff]  ;;  %v11625_v41 = vld [vmem:[#allocation26_spill] sm:$0xff]  ;;  %v11626_v37 = vld [vmem:[#allocation27_spill] sm:$0xff] }
 0x496   : > { %8275 = vmatmul.mubr.f32.gmra.mrb[24].mxu1 %v10804_v9  ;;  %v5087_v9 = vld [vmem:[#allocation8 + $0x330] sm:$0xff] }
 0x497   : > { %8277 = vmatprep.mubr.f32.mxu1 %v10820_v0  ;;  %v5089_v0 = vld [vmem:[#allocation8 + $0x340] sm:$0xff] }
 0x49a   : > { %8278 = vmatmul.mubr.f32.gmra.mrb[26].mxu1 %v10816_v59  ;;  %v9098_v59 = vpack.c.bf16 %v5088_v22, %v5087_v9  ;;  %v11628_v9 = vld [vmem:[#allocation29_spill] sm:$0xff]  ;;  %v11629_v22 = vld [vmem:[#allocation30_spill] sm:$0xff] }
 0x49b   : > { %8280 = vmatprep.mubr.f32.mxu1 %v10832_v45  ;;  %v11614_v45 = vld [vmem:[#allocation15_spill] sm:$0xff] }
 0x49e   : > { %8281 = vmatmul.mubr.f32.gmra.mrb[28].mxu1 %v10828_v7  ;;  %v5090_v7 = vld [vmem:[#allocation8 + $0x348] sm:$0xff] }
 0x49f   : > { %8283 = vmatprep.mubr.f32.mxu1 %v11612_v29  ;;  %v9102_v47 = vpack.c.bf16 %v5090_v7, %v5089_v0  ;;  %v5388_v29 = vld [vmem:[#allocation8 + $0x388] sm:$0xff]  ;;  %v11631_v0 = vld [vmem:[#allocation32_spill] sm:$0xff]  ;;  %v11632_v7 = vld [vmem:[#allocation33_spill] sm:$0xff] }
 0x4a2   : > { %8284 = vmatmul.mubr.f32.gmra.mrb[30].mxu1 %v11613_v39  ;;  %v11622_v39 = vld [vmem:[#allocation23_spill] sm:$0xff] }
 0x4a3   : > { %8318 = vmatprep.mubr.f32.mxu1 %v10944_v26  ;;  %v5091_v26 = vld [vmem:[#allocation8 + $0x350] sm:$0xff] }
 0x4a6   : > { %8319 = vmatmul.mubr.f32.vlgmr.msra.gmra.mrb[0].mxu1 %v10947_v63  ;;  %v5092_v63 = vld [vmem:[#allocation8 + $0x358] sm:$0xff] }
 0x4a7   : > { %8321 = vmatprep.mubr.f32.mxu1 %v10950_v49  ;;  %9089 = vmatpush3.bf16.msra.mxu1 %v9086_v16  ;;  %v11616_v49 = vld [vmem:[#allocation17_spill] sm:$0xff] }
 0x4a8   : > { %9091 = vmatprep.subr.bf16.mxu1 %v9090_v31  ;;  %v5387_v16 = vld [vmem:[#allocation8 + $0x380] sm:$0xff] }
 0x4aa   : > { %8322 = vmatmul.mubr.f32.gmra.mrb[2].mxu1 %v10953_v34  ;;  %v9106_v34 = vpack.c.bf16 %v5092_v63, %v5091_v26  ;;  %v11160_v26 = vld [vmem:[#allocation2 + $0x182] sm:$0xff]  ;;  %v11163_v63 = vld [vmem:[#allocation2 + $0x18a] sm:$0xff] }
 0x4ab   : > { %8324 = vmatprep.mubr.f32.mxu1 %v10956_v55  ;;  %9093 = vmatpush3.bf16.msra.mxu1 %v9090_v31  ;;  %v5093_v55 = vld [vmem:[#allocation8 + $0x360] sm:$0xff] }
 0x4ac   : > { %9095 = vmatprep.subr.bf16.mxu1 %v9094_v38  ;;  %v9110_v40 = vpack.c.bf16 %v5094_v17, %v5093_v55  ;;  %v11624_v31 = vld [vmem:[#allocation25_spill] sm:$0xff]  ;;  %v5392_v17 = vld [vmem:[#allocation8 + $0x3a8] sm:$0xff] }
 0x4ad   : > { %v5391_v55 = vld [vmem:[#allocation8 + $0x3a0] sm:$0xff] }
 0x4ae   : > { %8325 = vmatmul.mubr.f32.gmra.mrb[4].mxu1 %v11614_v45  ;;  %v11633_v45 = vld [vmem:[#allocation34_spill] sm:$0xff] }
 0x4af   : > { %8327 = vmatprep.mubr.f32.mxu1 %v11615_v43  ;;  %9097 = vmatpush3.bf16.msra.mxu1 %v9094_v38  ;;  %v11627_v38 = vld [vmem:[#allocation28_spill] sm:$0xff]  ;;  %v11634_v43 = vld [vmem:[#allocation35_spill] sm:$0xff] }
 0x4b0   : > { %9099 = vmatprep.subr.bf16.mxu1 %v9098_v59 }
 0x4b2   : > { %8328 = vmatmul.mubr.f32.gmra.mrb[6].mxu1 %v11616_v49  ;;  %v5389_v49 = vld [vmem:[#allocation8 + $0x390] sm:$0xff] }
 0x4b3   : > { %8330 = vmatprep.mubr.f32.mxu1 %v11617_v48  ;;  %9101 = vmatpush3.bf16.msra.mxu1 %v9098_v59  ;;  %v11630_v59 = vld [vmem:[#allocation31_spill] sm:$0xff]  ;;  %v5390_v48 = vld [vmem:[#allocation8 + $0x398] sm:$0xff] }
 0x4b4   : > { %9103 = vmatprep.subr.bf16.mxu1 %v9102_v47 }
 0x4b6   : > { %8331 = vmatmul.mubr.f32.gmra.mrb[8].mxu1 %v10971_v21  ;;  %v9118_v21 = vpack.c.bf16 %v5388_v29, %v5387_v16  ;;  %v5398_v16 = vld [vmem:[#allocation8 + $0x3d8] sm:$0xff]  ;;  %v5400_v29 = vld [vmem:[#allocation8 + $0x3e8] sm:$0xff] }
 0x4b7   : > { %8333 = vmatprep.mubr.f32.mxu1 %v10974_v53  ;;  %9105 = vmatpush3.bf16.msra.mxu1 %v9102_v47  ;;  %v11621_v53 = vld [vmem:[#allocation22_spill] sm:$0xff]  ;;  %v11635_v47 = vld [vmem:[#allocation36_spill] sm:$0xff] }
 0x4b8   : > { %9107 = vmatprep.subr.bf16.mxu1 %v9106_v34 }
 0x4ba   : > { %8334 = vmatmul.mubr.f32.gmra.mrb[10].mxu1 %v10977_v36  ;;  %v11623_v36 = vld [vmem:[#allocation24_spill] sm:$0xff] }
 0x4bb   : > { %8336 = vmatprep.mubr.f32.mxu1 %v11618_v30  ;;  %9109 = vmatpush3.bf16.msra.mxu1 %v9106_v34  ;;  %v9122_v34 = vpack.c.bf16 %v5390_v48, %v5389_v49  ;;  %v9130_v30 = vpack.c.bf16 %v5394_v4, %v5393_v27  ;;  %v5368_v48 = vld [vmem:[#allocation2 + $0xd9] sm:$0xff]  ;;  %v5378_v27 = vld [vmem:[#allocation2 + $0x151] sm:$0xff] }
 0x4bc   : > { %9111 = vmatprep.subr.bf16.mxu1 %v9110_v40  ;;  %v5379_v4 = vld [vmem:[#allocation2 + $0x159] sm:$0xff] }
 0x4be   : > { %8337 = vmatmul.mubr.f32.gmra.mrb[12].mxu1 %v11619_v57  ;;  %v5402_v57 = vld [vmem:[#allocation8 + $0x3f8] sm:$0xff] }
 0x4bf   : > { %8339 = vmatprep.mubr.f32.mxu1 %v11620_v20  ;;  %9113 = vmatpush3.bf16.msra.mxu1 %v9110_v40  ;;  %v9126_v40 = vpack.c.bf16 %v5392_v17, %v5391_v55  ;;  %v5694_v20 = vld [vmem:[#allocation8 + $0x408] sm:$0xff]  ;;  %v5372_v55 = vld [vmem:[#allocation2 + $0x109] sm:$0xff] }
 0x4c0   : > { %9115 = vmatprep.subr.bf16.mxu1 %v9114_v56  ;;  %v5375_v17 = vld [vmem:[#allocation2 + $0x129] sm:$0xff] }
 0x4c2   : > { %8340 = vmatmul.mubr.f32.gmra.mrb[14].mxu1 %v11621_v53 }
 0x4c3   : > { %8342 = vmatprep.mubr.f32.mxu1 %v11622_v39  ;;  %9117 = vmatpush3.bf16.msra.mxu1 %v9114_v56  ;;  %v5396_v56 = vld [vmem:[#allocation8 + $0x3c8] sm:$0xff] }
 0x4c4   : > { %9119 = vmatprep.subr.bf16.mxu1 %v9118_v21  ;;  %v5702_v39 = vld [vmem:[#allocation8 + $0x448] sm:$0xff] }
 0x4c6   : > { %8343 = vmatmul.mubr.f32.gmra.mrb[16].mxu1 %v11623_v36  ;;  %v11644_v36 = vld [vmem:[#allocation43_spill] sm:$0xff] }
 0x4c7   : > { %8345 = vmatprep.mubr.f32.mxu1 %v11624_v31  ;;  %v11645_v31 = vld [vmem:[#allocation44_spill] sm:$0xff] }
 0x4ca   : > { %8346 = vmatmul.mubr.f32.gmra.mrb[18].mxu1 %v11625_v41 }
 0x4cb   : > { %8348 = vmatprep.mubr.f32.mxu1 %v11626_v37  ;;  %v5703_v37 = vld [vmem:[#allocation8 + $0x450] sm:$0xff] }
 0x4ce   : > { %8349 = vmatmul.mubr.f32.gmra.mrb[20].mxu1 %v11627_v38  ;;  %v5704_v38 = vld [vmem:[#allocation8 + $0x458] sm:$0xff] }
 0x4cf   : > { %8351 = vmatprep.mubr.f32.mxu1 %v11628_v9  ;;  %v11646_v9 = vld [vmem:[#allocation45_spill] sm:$0xff] }
 0x4d2   : > { %8352 = vmatmul.mubr.f32.gmra.mrb[22].mxu1 %v11629_v22  ;;  %v11647_v22 = vld [vmem:[#allocation46_spill] sm:$0xff] }
 0x4d3   : > { %8354 = vmatprep.mubr.f32.mxu1 %v11630_v59  ;;  %v9170_v59 = vpack.c.bf16 %v5704_v38, %v5703_v37 }
 0x4d6   : > { %8355 = vmatmul.mubr.f32.gmra.mrb[24].mxu1 %v11631_v0  ;;  %v5705_v0 = vld [vmem:[#allocation8 + $0x460] sm:$0xff] }
 0x4d7   : > { %8357 = vmatprep.mubr.f32.mxu1 %v11632_v7  ;;  %v5706_v7 = vld [vmem:[#allocation8 + $0x468] sm:$0xff] }
 0x4da   : > { %8358 = vmatmul.mubr.f32.gmra.mrb[26].mxu1 %v11633_v45  ;;  %v9174_v45 = vpack.c.bf16 %v5706_v7, %v5705_v0 }
 0x4db   : > { %8360 = vmatprep.mubr.f32.mxu1 %v11634_v43  ;;  %v5707_v43 = vld [vmem:[#allocation8 + $0x470] sm:$0xff] }
 0x4de   : > { %8361 = vmatmul.mubr.f32.gmra.mrb[28].mxu1 %v11635_v47  ;;  %v5708_v47 = vld [vmem:[#allocation8 + $0x478] sm:$0xff] }
 0x4df   : > { %8363 = vmatprep.mubr.f32.mxu1 %v11160_v26  ;;  %v9178_v49 = vpack.c.bf16 %v5708_v47, %v5707_v43 }
 0x4e2   : > { %8364 = vmatmul.mubr.f32.gmra.mrb[30].mxu1 %v11163_v63 }
 0x4e3   : > { %8398 = vmatprep.mubr.f32.mxu1 %v10860_v19  ;;  %v5395_v19 = vld [vmem:[#allocation8 + $0x3c0] sm:$0xff] }
 0x4e6   : > { %8399 = vmatmul.mubr.f32.vlgmr.msra.gmra.mrb[0].mxu1 %v10863_v23  ;;  %v9134_v23 = vpack.c.bf16 %v5396_v56, %v5395_v19  ;;  %v5381_v19 = vld [vmem:[#allocation2 + $0x171] sm:$0xff]  ;;  %v5382_v56 = vld [vmem:[#allocation2 + $0x181] sm:$0xff] }
 0x4e7   : > { %8401 = vmatprep.mubr.f32.mxu1 %v10866_v10  ;;  %9121 = vmatpush3.bf16.msra.mxu1 %v9118_v21  ;;  %v5397_v10 = vld [vmem:[#allocation8 + $0x3d0] sm:$0xff]  ;;  %v11643_v21 = vld [vmem:[#allocation42_spill] sm:$0xff] }
 0x4e8   : > { %9123 = vmatprep.subr.bf16.mxu1 %v9122_v34 }
 0x4ea   : > { %8402 = vmatmul.mubr.f32.gmra.mrb[2].mxu1 %v10869_v28  ;;  %v9138_v28 = vpack.c.bf16 %v5398_v16, %v5397_v10  ;;  %v5383_v10 = vld [vmem:[#allocation2 + $0x189] sm:$0xff]  ;;  %v5385_v16 = vld [vmem:[#allocation2 + $0x1a1] sm:$0xff] }
 0x4eb   : > { %8404 = vmatprep.mubr.f32.mxu1 %v10872_v35  ;;  %9125 = vmatpush3.bf16.msra.mxu1 %v9122_v34  ;;  %v5399_v35 = vld [vmem:[#allocation8 + $0x3e0] sm:$0xff]  ;;  %v5371_v34 = vld [vmem:[#allocation2 + $0xf9] sm:$0xff] }
 0x4ec   : > { %9127 = vmatprep.subr.bf16.mxu1 %v9126_v40 }
 0x4ee   : > { %8405 = vmatmul.mubr.f32.gmra.mrb[4].mxu1 %v10875_v24  ;;  %v9142_v24 = vpack.c.bf16 %v5400_v29, %v5399_v35  ;;  %v5661_v35 = vld [vmem:[#allocation2 + $0x3a] sm:$0xff]  ;;  %v5662_v29 = vld [vmem:[#allocation2 + $0x4a] sm:$0xff] }
 0x4ef   : > { %8407 = vmatprep.mubr.f32.mxu1 %v10878_v62  ;;  %9129 = vmatpush3.bf16.msra.mxu1 %v9126_v40  ;;  %v5401_v62 = vld [vmem:[#allocation8 + $0x3f0] sm:$0xff] }
 0x4f0   : > { %9131 = vmatprep.subr.bf16.mxu1 %v9130_v30  ;;  %v5377_v40 = vld [vmem:[#allocation2 + $0x141] sm:$0xff] }
 0x4f2   : > { %8408 = vmatmul.mubr.f32.gmra.mrb[6].mxu1 %v10881_v3  ;;  %v9146_v3 = vpack.c.bf16 %v5402_v57, %v5401_v62  ;;  %v5664_v62 = vld [vmem:[#allocation2 + $0x62] sm:$0xff]  ;;  %v5665_v57 = vld [vmem:[#allocation2 + $0x6a] sm:$0xff] }
 0x4f3   : > { %8410 = vmatprep.mubr.f32.mxu1 %v10884_v8  ;;  %9133 = vmatpush3.bf16.msra.mxu1 %v9130_v30  ;;  %v5693_v8 = vld [vmem:[#allocation8 + $0x400] sm:$0xff] }
 0x4f4   : > { %9135 = vmatprep.subr.bf16.mxu1 %v9134_v23  ;;  %v5380_v30 = vld [vmem:[#allocation2 + $0x169] sm:$0xff] }
 0x4f6   : > { %8411 = vmatmul.mubr.f32.gmra.mrb[8].mxu1 %v10887_v18  ;;  %v9150_v18 = vpack.c.bf16 %v5694_v20, %v5693_v8  ;;  %v5667_v8 = vld [vmem:[#allocation2 + $0x82] sm:$0xff]  ;;  %v5668_v20 = vld [vmem:[#allocation2 + $0x92] sm:$0xff] }
 0x4f7   : > { %8413 = vmatprep.mubr.f32.mxu1 %v10890_v54  ;;  %9137 = vmatpush3.bf16.msra.mxu1 %v9134_v23  ;;  %v11636_v54 = vld [vmem:[#allocation13_spill] sm:$0xff]  ;;  %v5384_v23 = vld [vmem:[#allocation2 + $0x199] sm:$0xff] }
 0x4f8   : > { %9139 = vmatprep.subr.bf16.mxu1 %v9138_v28 }
 0x4fa   : > { %8414 = vmatmul.mubr.f32.gmra.mrb[10].mxu1 %v10893_v60  ;;  %v11637_v60 = vld [vmem:[#allocation14_spill] sm:$0xff] }
 0x4fb   : > { %8416 = vmatprep.mubr.f32.mxu1 %v10896_v61  ;;  %9141 = vmatpush3.bf16.msra.mxu1 %v9138_v28  ;;  %v11638_v61 = vld [vmem:[#allocation37_spill] sm:$0xff] }
 0x4fc   : > { %9143 = vmatprep.subr.bf16.mxu1 %v9142_v24  ;;  %v5660_v28 = vld [vmem:[#allocation2 + $0x32] sm:$0xff] }
 0x4fe   : > { %8417 = vmatmul.mubr.f32.gmra.mrb[12].mxu1 %v10899_v1  ;;  %v11639_v1 = vld [vmem:[#allocation38_spill] sm:$0xff] }
 0x4ff   : > { %8419 = vmatprep.mubr.f32.mxu1 %v10902_v2  ;;  %9145 = vmatpush3.bf16.msra.mxu1 %v9142_v24  ;;  %v9769_v2 = vld [vmem:[#allocation2] sm:$0xff]  ;;  %v5663_v24 = vld [vmem:[#allocation2 + $0x52] sm:$0xff] }
 0x500   : > { %9147 = vmatprep.subr.bf16.mxu1 %v9146_v3 }
 0x502   : > { %8420 = vmatmul.mubr.f32.gmra.mrb[14].mxu1 %v10905_v5  ;;  %v5695_v5 = vld [vmem:[#allocation8 + $0x410] sm:$0xff] }
 0x503   : > { %8422 = vmatprep.mubr.f32.mxu1 %v10908_v6  ;;  %9149 = vmatpush3.bf16.msra.mxu1 %v9146_v3  ;;  %v5696_v6 = vld [vmem:[#allocation8 + $0x418] sm:$0xff]  ;;  %v5666_v3 = vld [vmem:[#allocation2 + $0x7a] sm:$0xff] }
 0x504   : > { %9151 = vmatprep.subr.bf16.mxu1 %v9150_v18 }
 0x506   : > { %8423 = vmatmul.mubr.f32.gmra.mrb[16].mxu1 %v10911_v12  ;;  %v9154_v12 = vpack.c.bf16 %v5696_v6, %v5695_v5  ;;  %v5675_v5 = vld [vmem:[#allocation2 + $0xe2] sm:$0xff]  ;;  %v5676_v6 = vld [vmem:[#allocation2 + $0xf2] sm:$0xff] }
 0x507   : > { %8425 = vmatprep.mubr.f32.mxu1 %v10914_v44  ;;  %v5697_v44 = vld [vmem:[#allocation8 + $0x420] sm:$0xff] }
 0x50a   : > { %8426 = vmatmul.mubr.f32.gmra.mrb[18].mxu1 %v10917_v52  ;;  %v5698_v52 = vld [vmem:[#allocation8 + $0x428] sm:$0xff] }
 0x50b   : > { %8428 = vmatprep.mubr.f32.mxu1 %v10920_v13  ;;  %v11640_v13 = vld [vmem:[#allocation39_spill] sm:$0xff] }
 0x50e   : > { %8429 = vmatmul.mubr.f32.gmra.mrb[20].mxu1 %v10923_v42  ;;  %v11641_v42 = vld [vmem:[#allocation40_spill] sm:$0xff] }
 0x50f   : > { %8431 = vmatprep.mubr.f32.mxu1 %v10926_v51  ;;  %v9158_v51 = vpack.c.bf16 %v5698_v52, %v5697_v44  ;;  %v5678_v44 = vld [vmem:[#allocation2 + $0x10a] sm:$0xff]  ;;  %v5679_v52 = vld [vmem:[#allocation2 + $0x112] sm:$0xff] }
 0x512   : > { %8432 = vmatmul.mubr.f32.gmra.mrb[22].mxu1 %v10929_v33  ;;  %v5699_v33 = vld [vmem:[#allocation8 + $0x430] sm:$0xff] }
 0x513   : > { %8434 = vmatprep.mubr.f32.mxu1 %v10932_v46  ;;  %v5700_v46 = vld [vmem:[#allocation8 + $0x438] sm:$0xff] }
 0x514   : > { %v9162_v53 = vpack.c.bf16 %v5700_v46, %v5699_v33  ;;  %v5683_v33 = vld [vmem:[#allocation2 + $0x142] sm:$0xff]  ;;  %v5684_v46 = vld [vmem:[#allocation2 + $0x152] sm:$0xff] }
 0x516   : > { %8435 = vmatmul.mubr.f32.gmra.mrb[24].mxu1 %v10935_v15  ;;  %v11642_v15 = vld [vmem:[#allocation41_spill] sm:$0xff] }
 0x517   : > { %8437 = vmatprep.mubr.f32.mxu1 %v11636_v54  ;;  %v5670_v54 = vld [vmem:[#allocation2 + $0xaa] sm:$0xff] }
 0x51a   : > { %8438 = vmatmul.mubr.f32.gmra.mrb[26].mxu1 %v11637_v60  ;;  %v5671_v60 = vld [vmem:[#allocation2 + $0xb2] sm:$0xff] }
 0x51b   : > { %8440 = vmatprep.mubr.f32.mxu1 %v11638_v61  ;;  %v5672_v61 = vld [vmem:[#allocation2 + $0xc2] sm:$0xff] }
 0x51e   : > { %8441 = vmatmul.mubr.f32.gmra.mrb[28].mxu1 %v11639_v1  ;;  %v5673_v1 = vld [vmem:[#allocation2 + $0xca] sm:$0xff] }
 0x51f   : > { %8443 = vmatprep.mubr.f32.mxu1 %v9769_v2 }
 0x522   : > { %8444 = vmatmul.mubr.f32.gmra.mrb[30].mxu1 %v9769_v2  ;;  %v5674_v2 = vld [vmem:[#allocation2 + $0xda] sm:$0xff] }
 0x523   : > { %8478 = vmatprep.mubr.f32.mxu1 %v11070_v14  ;;  %v5701_v14 = vld [vmem:[#allocation8 + $0x440] sm:$0xff] }
 0x524   : > { %v9166_v41 = vpack.c.bf16 %v5702_v39, %v5701_v14  ;;  %v5690_v14 = vld [vmem:[#allocation2 + $0x19a] sm:$0xff]  ;;  %v5691_v39 = vld [vmem:[#allocation2 + $0x1a2] sm:$0xff] }
 0x526   : > { %8479 = vmatmul.mubr.f32.vlgmr.msra.gmra.mrb[0].mxu1 %v11640_v13  ;;  %v5680_v13 = vld [vmem:[#allocation2 + $0x122] sm:$0xff] }
 0x527   : > { %8481 = vmatprep.mubr.f32.mxu1 %v11641_v42  ;;  %9153 = vmatpush3.bf16.msra.mxu1 %v9150_v18  ;;  %v5669_v18 = vld [vmem:[#allocation2 + $0x9a] sm:$0xff]  ;;  %v5681_v42 = vld [vmem:[#allocation2 + $0x12a] sm:$0xff] }
 0x528   : > { %9155 = vmatprep.subr.bf16.mxu1 %v9154_v12 }
 0x52a   : > { %8482 = vmatmul.mubr.f32.gmra.mrb[2].mxu1 %v11642_v15  ;;  %v5685_v15 = vld [vmem:[#allocation2 + $0x15a] sm:$0xff] }
 0x52b   : > { %8484 = vmatprep.mubr.f32.mxu1 %v11643_v21  ;;  %9157 = vmatpush3.bf16.msra.mxu1 %v9154_v12  ;;  %v5677_v12 = vld [vmem:[#allocation2 + $0xfa] sm:$0xff]  ;;  %v5686_v21 = vld [vmem:[#allocation2 + $0x16a] sm:$0xff] }
 0x52c   : > { %9159 = vmatprep.subr.bf16.mxu1 %v9158_v51 }
 0x52e   : > { %8485 = vmatmul.mubr.f32.gmra.mrb[4].mxu1 %v11644_v36  ;;  %v11215_v36 = vld [vmem:[%s11410_s5] ss:$0 sm:$0xff] }
 0x52f   : > { %8487 = vmatprep.mubr.f32.mxu1 %v11645_v31  ;;  %9161 = vmatpush3.bf16.msra.mxu1 %v9158_v51  ;;  %v5682_v51 = vld [vmem:[#allocation2 + $0x13a] sm:$0xff] }
 0x530   : > { %9163 = vmatprep.subr.bf16.mxu1 %v9162_v53 }
 0x532   : > { %8488 = vmatmul.mubr.f32.gmra.mrb[6].mxu1 %v11646_v9 }
 0x533   : > { %8490 = vmatprep.mubr.f32.mxu1 %v11647_v22  ;;  %9165 = vmatpush3.bf16.msra.mxu1 %v9162_v53  ;;  %v5687_v53 = vld [vmem:[#allocation2 + $0x172] sm:$0xff] }
 0x534   : > { %9167 = vmatprep.subr.bf16.mxu1 %v9166_v41  ;;  %v6044_v22 = vld [vmem:[%s10164_s13] sm:$0xff] }
 0x536   : > { %8491 = vmatmul.mubr.f32.gmra.mrb[8].mxu1 %v11097_v58  ;;  %v5369_v58 = vld [vmem:[#allocation2 + $0xe1] sm:$0xff] }
 0x537   : > { %8493 = vmatprep.mubr.f32.mxu1 %v11100_v11  ;;  %9169 = vmatpush3.bf16.msra.mxu1 %v9166_v41  ;;  %v5370_v11 = vld [vmem:[#allocation2 + $0xf1] sm:$0xff]  ;;  %v11220_v41 = vld [vmem:[%s11411_s6] ss:$0 sm:$0xff] }
 0x538   : > { %9171 = vmatprep.subr.bf16.mxu1 %v9170_v59 }
 0x53a   : > { %8494 = vmatmul.mubr.f32.gmra.mrb[10].mxu1 %v11103_v25  ;;  %v5373_v25 = vld [vmem:[#allocation2 + $0x111] sm:$0xff] }
 0x53b   : > { %8496 = vmatprep.mubr.f32.mxu1 %v11106_v50  ;;  %9173 = vmatpush3.bf16.msra.mxu1 %v9170_v59  ;;  %v5374_v50 = vld [vmem:[#allocation2 + $0x121] sm:$0xff] }
 0x53c   : > { %9175 = vmatprep.subr.bf16.mxu1 %v9174_v45 }
 0x53e   : > { %8497 = vmatmul.mubr.f32.gmra.mrb[12].mxu1 %v11109_v32  ;;  %v5376_v32 = vld [vmem:[#allocation2 + $0x139] sm:$0xff] }
 0x53f   : > { %8499 = vmatprep.mubr.f32.mxu1 %v5368_v48  ;;  %9177 = vmatpush3.bf16.msra.mxu1 %v9174_v45 }
 0x540   : > { %9179 = vmatprep.subr.bf16.mxu1 %v9178_v49 }
 0x542   : > { %8500 = vmatmul.mubr.f32.gmra.mrb[14].mxu1 %v5369_v58 }
 0x543   : > { %8502 = vmatprep.mubr.f32.mxu1 %v5370_v11  ;;  %9181 = vmatpush3.bf16.msra.mxu1 %v9178_v49  ;;  %v6047_v49 = vld [vmem:[%s10164_s13 + $0x18] sm:$0xff] }
 0x546   : > { %8503 = vmatmul.mubr.f32.gmra.mrb[16].mxu1 %v5371_v34  ;;  %v6046_v34 = vld [vmem:[%s10164_s13 + $0x10] sm:$0xff] }
 0x547   : > { %8505 = vmatprep.mubr.f32.mxu1 %v5372_v55 }
 0x54a   : > { %8506 = vmatmul.mubr.f32.gmra.mrb[18].mxu1 %v5373_v25 }
 0x54b   : > { %8508 = vmatprep.mubr.f32.mxu1 %v5374_v50 }
 0x54e   : > { %8509 = vmatmul.mubr.f32.gmra.mrb[20].mxu1 %v5375_v17 }
 0x54f   : > { %8511 = vmatprep.mubr.f32.mxu1 %v5376_v32 }
 0x552   : > { %8512 = vmatmul.mubr.f32.gmra.mrb[22].mxu1 %v5377_v40 }
 0x553   : > { %8514 = vmatprep.mubr.f32.mxu1 %v5378_v27 }
 0x556   : > { %8515 = vmatmul.mubr.f32.gmra.mrb[24].mxu1 %v5379_v4  ;;  %v6049_v4 = vld [vmem:[%s10164_s13 + $0x28] sm:$0xff] }
 0x557   : > { %8517 = vmatprep.mubr.f32.mxu1 %v5380_v30 }
 0x55a   : > { %8518 = vmatmul.mubr.f32.gmra.mrb[26].mxu1 %v5381_v19 }
 0x55b   : > { %8520 = vmatprep.mubr.f32.mxu1 %v5382_v56 }
 0x55e   : > { %8521 = vmatmul.mubr.f32.gmra.mrb[28].mxu1 %v5383_v10 }
 0x55f   : > { %8523 = vmatprep.mubr.f32.mxu1 %v5384_v23  ;;  %v6048_v23 = vld [vmem:[%s10164_s13 + $0x20] sm:$0xff] }
 0x562   : > { %8524 = vmatmul.mubr.f32.gmra.mrb[30].mxu1 %v5385_v16 }
 0x563   : > { %8558 = vmatprep.mubr.f32.mxu1 %v5660_v28 }
 0x566   : > { %8559 = vmatmul.mubr.f32.vlgmr.msra.gmra.mrb[0].mxu1 %v5661_v35 }
 0x567   : > { %8561 = vmatprep.mubr.f32.mxu1 %v5662_v29 }
 0x56a   : > { %8562 = vmatmul.mubr.f32.gmra.mrb[2].mxu1 %v5663_v24 }
 0x56b   : > { %8564 = vmatprep.mubr.f32.mxu1 %v5664_v62 }
 0x56e   : > { %8565 = vmatmul.mubr.f32.gmra.mrb[4].mxu1 %v5665_v57  ;;  %v6051_v57 = vld [vmem:[%s10164_s13 + $0x38] sm:$0xff] }
 0x56f   : > { %8567 = vmatprep.mubr.f32.mxu1 %v5666_v3 }
 0x572   : > { %8568 = vmatmul.mubr.f32.gmra.mrb[6].mxu1 %v5667_v8 }
 0x573   : > { %8570 = vmatprep.mubr.f32.mxu1 %v5668_v20 }
 0x576   : > { %8571 = vmatmul.mubr.f32.gmra.mrb[8].mxu1 %v5669_v18  ;;  %v6050_v18 = vld [vmem:[%s10164_s13 + $0x30] sm:$0xff] }
 0x577   : > { %8573 = vmatprep.mubr.f32.mxu1 %v5670_v54 }
 0x57a   : > { %8574 = vmatmul.mubr.f32.gmra.mrb[10].mxu1 %v5671_v60 }
 0x57b   : > { %8576 = vmatprep.mubr.f32.mxu1 %v5672_v61 }
 0x57e   : > { %8577 = vmatmul.mubr.f32.gmra.mrb[12].mxu1 %v5673_v1 }
 0x57f   : > { %8579 = vmatprep.mubr.f32.mxu1 %v5674_v2 }
 0x582   : > { %8580 = vmatmul.mubr.f32.gmra.mrb[14].mxu1 %v5675_v5 }
 0x583   : > { %8582 = vmatprep.mubr.f32.mxu1 %v5676_v6 }
 0x586   : > { %8583 = vmatmul.mubr.f32.gmra.mrb[16].mxu1 %v5677_v12  ;;  %v6053_v12 = vld [vmem:[%s10164_s13 + $0x48] sm:$0xff] }
 0x587   : > { %8585 = vmatprep.mubr.f32.mxu1 %v5678_v44 }
 0x58a   : > { %8586 = vmatmul.mubr.f32.gmra.mrb[18].mxu1 %v5679_v52 }
 0x58b   : > { %8588 = vmatprep.mubr.f32.mxu1 %v5680_v13 }
 0x58e   : > { %8589 = vmatmul.mubr.f32.gmra.mrb[20].mxu1 %v5681_v42  ;;  %v6052_v42 = vld [vmem:[%s10164_s13 + $0x40] sm:$0xff] }
 0x58f   : > { %8591 = vmatprep.mubr.f32.mxu1 %v5682_v51 }
 0x592   : > { %8592 = vmatmul.mubr.f32.gmra.mrb[22].mxu1 %v5683_v33 }
 0x593   : > { %8594 = vmatprep.mubr.f32.mxu1 %v5684_v46 }
 0x596   : > { %8595 = vmatmul.mubr.f32.gmra.mrb[24].mxu1 %v5685_v15 }
 0x597   : > { %8597 = vmatprep.mubr.f32.mxu1 %v5686_v21 }
 0x59a   : > { %8598 = vmatmul.mubr.f32.gmra.mrb[26].mxu1 %v5687_v53 }
 0x59b   : > { %8600 = vmatprep.mubr.f32.mxu1 %v11160_v26 }
 0x59e   : > { %8601 = vmatmul.mubr.f32.gmra.mrb[28].mxu1 %v11163_v63  ;;  %v6045_v63 = vld [vmem:[%s10164_s13 + $0x8] sm:$0xff] }
 0x59f   : > { %8603 = vmatprep.mubr.f32.mxu1 %v5690_v14 }
 0x5a2   : > { %8604 = vmatmul.mubr.f32.gmra.mrb[30].mxu1 %v5691_v39  ;;  %v6055_v39 = vld [vmem:[%s10164_s13 + $0x58] sm:$0xff] }
 0x639   : > { %v8560_v31 = vpop.f32.mrb[0].mxu1 }
 0x63a   : > { %v5974_v26 = vmul.f32 %v8560_v31, %v11215_v36  ;;  %v5775_v37 = vpop.f32.mrb[1].mxu1 }
 0x63b   : > { %v5973_v38 = vmul.f32 %v11215_v36, %v5775_v37 }
 0x63c   : > { %v6013_v9 = vadd.f32 %v11220_v41, %v5974_v26 }
 0x63d   : > { %v6012_v59 = vadd.f32 %v11220_v41, %v5973_v38  ;;  %v8563_v0 = vpop.f32.mrb[2].mxu1 }
 0x63e   : > { %v6077_v7 = vadd.f32 %v6045_v63, %v6013_v9  ;;  %v5976_v45 = vmul.f32 %v8563_v0, %v11215_v36  ;;  %v5785_v43 = vpop.f32.mrb[3].mxu1  ;;  %v6054_v63 = vld [vmem:[%s10164_s13 + $0x50] sm:$0xff] }
 0x63f   : > { %v6076_v47 = vadd.f32 %v6044_v22, %v6012_v59  ;;  %v5975_v48 = vmul.f32 %v11215_v36, %v5785_v43  ;;  %v6057_v43 = vld [vmem:[%s10164_s13 + $0x68] sm:$0xff] }
 0x640   : > { %v6109_v58 = vmax.f32 %v6077_v7, 0.0  ;;  %v6015_v11 = vadd.f32 %v11220_v41, %v5976_v45 }
 0x641   : > { %v6108_v55 = vmax.f32 %v6076_v47, 0.0  ;;  %v6014_v25 = vadd.f32 %v11220_v41, %v5975_v48  ;;  %v8566_v50 = vpop.f32.mrb[4].mxu1 }
 0x642   : > { %6141 = vst [vmem:[%s11236_s21 + $0x8] sm:$0xff] %v6109_v58  ;;  %v6079_v17 = vadd.f32 %v6047_v49, %v6015_v11  ;;  %v5978_v32 = vmul.f32 %v8566_v50, %v11215_v36  ;;  %v5795_v40 = vpop.f32.mrb[5].mxu1  ;;  %v6056_v58 = vld [vmem:[%s10164_s13 + $0x60] sm:$0xff] }
 0x643   : > { %6140 = vst [vmem:[%s11236_s21] sm:$0xff] %v6108_v55  ;;  %v6078_v27 = vadd.f32 %v6046_v34, %v6014_v25  ;;  %v5977_v30 = vmul.f32 %v11215_v36, %v5795_v40  ;;  %v6059_v40 = vld [vmem:[%s10164_s13 + $0x78] sm:$0xff] }
 0x644   : > { %v6111_v19 = vmax.f32 %v6079_v17, 0.0  ;;  %v6017_v56 = vadd.f32 %v11220_v41, %v5978_v32 }
 0x645   : > { %v6110_v10 = vmax.f32 %v6078_v27, 0.0  ;;  %v6016_v16 = vadd.f32 %v11220_v41, %v5977_v30  ;;  %v8569_v28 = vpop.f32.mrb[6].mxu1 }
 0x646   : > { %6143 = vst [vmem:[%s11236_s21 + $0x18] sm:$0xff] %v6111_v19  ;;  %v6081_v35 = vadd.f32 %v6049_v4, %v6017_v56  ;;  %v5980_v29 = vmul.f32 %v8569_v28, %v11215_v36  ;;  %v5805_v24 = vpop.f32.mrb[7].mxu1  ;;  %v6058_v19 = vld [vmem:[%s10164_s13 + $0x70] sm:$0xff] }
 0x647   : > { %6142 = vst [vmem:[%s11236_s21 + $0x10] sm:$0xff] %v6110_v10  ;;  %v6080_v62 = vadd.f32 %v6048_v23, %v6016_v16  ;;  %v5979_v3 = vmul.f32 %v11215_v36, %v5805_v24  ;;  %v6061_v24 = vld [vmem:[%s10164_s13 + $0x88] sm:$0xff] }
 0x648   : > { %v6113_v8 = vmax.f32 %v6081_v35, 0.0  ;;  %v6019_v20 = vadd.f32 %v11220_v41, %v5980_v29 }
 0x649   : > { %v6112_v54 = vmax.f32 %v6080_v62, 0.0  ;;  %v6018_v60 = vadd.f32 %v11220_v41, %v5979_v3  ;;  %v8572_v61 = vpop.f32.mrb[8].mxu1 }
 0x64a   : > { %6145 = vst [vmem:[%s11236_s21 + $0x28] sm:$0xff] %v6113_v8  ;;  %v6083_v1 = vadd.f32 %v6051_v57, %v6019_v20  ;;  %v5982_v2 = vmul.f32 %v8572_v61, %v11215_v36  ;;  %v5815_v5 = vpop.f32.mrb[9].mxu1  ;;  %v6060_v8 = vld [vmem:[%s10164_s13 + $0x80] sm:$0xff] }
 0x64b   : > { %6144 = vst [vmem:[%s11236_s21 + $0x20] sm:$0xff] %v6112_v54  ;;  %v6082_v6 = vadd.f32 %v6050_v18, %v6018_v60  ;;  %v5981_v44 = vmul.f32 %v11215_v36, %v5815_v5  ;;  %v6063_v5 = vld [vmem:[%s10164_s13 + $0x98] sm:$0xff] }
 0x64c   : > { %v6115_v52 = vmax.f32 %v6083_v1, 0.0  ;;  %v6021_v13 = vadd.f32 %v11220_v41, %v5982_v2 }
 0x64d   : > { %v6114_v51 = vmax.f32 %v6082_v6, 0.0  ;;  %v6020_v33 = vadd.f32 %v11220_v41, %v5981_v44  ;;  %v8575_v46 = vpop.f32.mrb[10].mxu1 }
 0x64e   : > { %6147 = vst [vmem:[%s11236_s21 + $0x38] sm:$0xff] %v6115_v52  ;;  %v6085_v15 = vadd.f32 %v6053_v12, %v6021_v13  ;;  %v5984_v21 = vmul.f32 %v8575_v46, %v11215_v36  ;;  %v5825_v53 = vpop.f32.mrb[11].mxu1  ;;  %v6062_v52 = vld [vmem:[%s10164_s13 + $0x90] sm:$0xff] }
 0x64f   : > { %6146 = vst [vmem:[%s11236_s21 + $0x30] sm:$0xff] %v6114_v51  ;;  %v6084_v14 = vadd.f32 %v6052_v42, %v6020_v33  ;;  %v5983_v31 = vmul.f32 %v11215_v36, %v5825_v53  ;;  %v6065_v53 = vld [vmem:[%s10164_s13 + $0xa8] sm:$0xff] }
 0x650   : > { %v6117_v26 = vmax.f32 %v6085_v15, 0.0  ;;  %v6023_v37 = vadd.f32 %v11220_v41, %v5984_v21 }
 0x651   : > { %v6116_v38 = vmax.f32 %v6084_v14, 0.0  ;;  %v6022_v9 = vadd.f32 %v11220_v41, %v5983_v31  ;;  %v8578_v22 = vpop.f32.mrb[12].mxu1 }
 0x652   : > { %6149 = vst [vmem:[%s11236_s21 + $0x48] sm:$0xff] %v6117_v26  ;;  %v6087_v59 = vadd.f32 %v6055_v39, %v6023_v37  ;;  %v5986_v0 = vmul.f32 %v8578_v22, %v11215_v36  ;;  %v5835_v7 = vpop.f32.mrb[13].mxu1  ;;  %v6064_v26 = vld [vmem:[%s10164_s13 + $0xa0] sm:$0xff] }
 0x653   : > { %6148 = vst [vmem:[%s11236_s21 + $0x40] sm:$0xff] %v6116_v38  ;;  %v6086_v45 = vadd.f32 %v6054_v63, %v6022_v9  ;;  %v5985_v47 = vmul.f32 %v11215_v36, %v5835_v7  ;;  %v6067_v7 = vld [vmem:[%s10164_s13 + $0xb8] sm:$0xff] }
 0x654   : > { %v6119_v49 = vmax.f32 %v6087_v59, 0.0  ;;  %v6025_v48 = vadd.f32 %v11220_v41, %v5986_v0 }
 0x655   : > { %v6118_v11 = vmax.f32 %v6086_v45, 0.0  ;;  %v6024_v34 = vadd.f32 %v11220_v41, %v5985_v47  ;;  %v8581_v55 = vpop.f32.mrb[14].mxu1 }
 0x656   : > { %6151 = vst [vmem:[%s11236_s21 + $0x58] sm:$0xff] %v6119_v49  ;;  %v6089_v25 = vadd.f32 %v6057_v43, %v6025_v48  ;;  %v5988_v50 = vmul.f32 %v8581_v55, %v11215_v36  ;;  %v5845_v17 = vpop.f32.mrb[15].mxu1  ;;  %v6066_v49 = vld [vmem:[%s10164_s13 + $0xb0] sm:$0xff] }
 0x657   : > { %6150 = vst [vmem:[%s11236_s21 + $0x50] sm:$0xff] %v6118_v11  ;;  %v6088_v32 = vadd.f32 %v6056_v58, %v6024_v34  ;;  %v5987_v27 = vmul.f32 %v11215_v36, %v5845_v17  ;;  %v6069_v17 = vld [vmem:[%s10164_s13 + $0xc8] sm:$0xff] }
 0x658   : > { %v6121_v4 = vmax.f32 %v6089_v25, 0.0  ;;  %v6027_v30 = vadd.f32 %v11220_v41, %v5988_v50 }
 0x659   : > { %v6120_v56 = vmax.f32 %v6088_v32, 0.0  ;;  %v6026_v23 = vadd.f32 %v11220_v41, %v5987_v27  ;;  %v8584_v10 = vpop.f32.mrb[16].mxu1 }
 0x65a   : > { %6153 = vst [vmem:[%s11236_s21 + $0x68] sm:$0xff] %v6121_v4  ;;  %v6091_v16 = vadd.f32 %v6059_v40, %v6027_v30  ;;  %v5990_v28 = vmul.f32 %v8584_v10, %v11215_v36  ;;  %v5855_v35 = vpop.f32.mrb[17].mxu1  ;;  %v6068_v4 = vld [vmem:[%s10164_s13 + $0xc0] sm:$0xff] }
 0x65b   : > { %6152 = vst [vmem:[%s11236_s21 + $0x60] sm:$0xff] %v6120_v56  ;;  %v6090_v29 = vadd.f32 %v6058_v19, %v6026_v23  ;;  %v5989_v62 = vmul.f32 %v11215_v36, %v5855_v35  ;;  %v6071_v35 = vld [vmem:[%s10164_s13 + $0xd8] sm:$0xff] }
 0x65c   : > { %v6123_v57 = vmax.f32 %v6091_v16, 0.0  ;;  %v6029_v3 = vadd.f32 %v11220_v41, %v5990_v28 }
 0x65d   : > { %v6122_v20 = vmax.f32 %v6090_v29, 0.0  ;;  %v6028_v18 = vadd.f32 %v11220_v41, %v5989_v62  ;;  %v8587_v54 = vpop.f32.mrb[18].mxu1 }
 0x65e   : > { %6155 = vst [vmem:[%s11236_s21 + $0x78] sm:$0xff] %v6123_v57  ;;  %v6093_v60 = vadd.f32 %v6061_v24, %v6029_v3  ;;  %v5992_v61 = vmul.f32 %v8587_v54, %v11215_v36  ;;  %v5865_v1 = vpop.f32.mrb[19].mxu1  ;;  %v6070_v57 = vld [vmem:[%s10164_s13 + $0xd0] sm:$0xff] }
 0x65f   : > { %6154 = vst [vmem:[%s11236_s21 + $0x70] sm:$0xff] %v6122_v20  ;;  %v6092_v2 = vadd.f32 %v6060_v8, %v6028_v18  ;;  %v5991_v6 = vmul.f32 %v11215_v36, %v5865_v1  ;;  %v6073_v1 = vld [vmem:[%s10164_s13 + $0xe8] sm:$0xff] }
 0x660   : > { %v6125_v12 = vmax.f32 %v6093_v60, 0.0  ;;  %v6031_v44 = vadd.f32 %v11220_v41, %v5992_v61 }
 0x661   : > { %v6124_v13 = vmax.f32 %v6092_v2, 0.0  ;;  %v6030_v42 = vadd.f32 %v11220_v41, %v5991_v6  ;;  %v8590_v51 = vpop.f32.mrb[20].mxu1 }
 0x662   : > { %6157 = vst [vmem:[%s11236_s21 + $0x88] sm:$0xff] %v6125_v12  ;;  %v6095_v33 = vadd.f32 %v6063_v5, %v6031_v44  ;;  %v5994_v46 = vmul.f32 %v8590_v51, %v11215_v36  ;;  %v5875_v15 = vpop.f32.mrb[21].mxu1  ;;  %v6072_v12 = vld [vmem:[%s10164_s13 + $0xe0] sm:$0xff] }
 0x663   : > { %6156 = vst [vmem:[%s11236_s21 + $0x80] sm:$0xff] %v6124_v13  ;;  %v6094_v21 = vadd.f32 %v6062_v52, %v6030_v42  ;;  %v5993_v14 = vmul.f32 %v11215_v36, %v5875_v15  ;;  %v6075_v15 = vld [vmem:[%s10164_s13 + $0xf8] sm:$0xff] }
 0x664   : > { %v6127_v39 = vmax.f32 %v6095_v33, 0.0  ;;  %v6033_v31 = vadd.f32 %v11220_v41, %v5994_v46 }
 0x665   : > { %v6126_v37 = vmax.f32 %v6094_v21, 0.0  ;;  %v6032_v63 = vadd.f32 %v11220_v41, %v5993_v14  ;;  %v8593_v38 = vpop.f32.mrb[22].mxu1 }
 0x666   : > { %6159 = vst [vmem:[%s11236_s21 + $0x98] sm:$0xff] %v6127_v39  ;;  %v6097_v9 = vadd.f32 %v6065_v53, %v6033_v31  ;;  %v5996_v22 = vmul.f32 %v8593_v38, %v11215_v36  ;;  %v5885_v59 = vpop.f32.mrb[23].mxu1  ;;  %v6074_v39 = vld [vmem:[%s10164_s13 + $0xf0] sm:$0xff]  ;;  %s9856_s13 = scalar_lea.vmem %s11359_s22, 4096 }
 0x667   : > { %6158 = vst [vmem:[%s11236_s21 + $0x90] sm:$0xff] %v6126_v37  ;;  %v6096_v0 = vadd.f32 %v6064_v26, %v6032_v63  ;;  %v5995_v45 = vmul.f32 %v11215_v36, %v5885_v59  ;;  %p9857_p11 = scmp.ne.s32.totalorder %s11359_s22, %s9856_s13  ;;  %p9864_p9 = scmp.lt.s32.totalorder %s9862_s10, %s9856_s13 }
 0x668   : > { %v6129_v43 = vmax.f32 %v6097_v9, 0.0  ;;  %v6035_v47 = vadd.f32 %v11220_v41, %v5996_v22 }
 0x669   : > { %v6128_v48 = vmax.f32 %v6096_v0, 0.0  ;;  %v6034_v58 = vadd.f32 %v11220_v41, %v5995_v45  ;;  %v8596_v11 = vpop.f32.mrb[24].mxu1  ;;  %p9858_p2 = pnand %p9857_p11, %p11648_p0  ;;  %p9865_p12 = por %p9864_p9, %p9863_p7 }
 0x66a   : > { %6161 = vst [vmem:[%s11236_s21 + $0xa8] sm:$0xff] %v6129_v43  ;;  %v6099_v34 = vadd.f32 %v6067_v7, %v6035_v47  ;;  %v5998_v55 = vmul.f32 %v8596_v11, %v11215_v36  ;;  %v5895_v25 = vpop.f32.mrb[25].mxu1 }
 0x66b   : > { %6160 = vst [vmem:[%s11236_s21 + $0xa0] sm:$0xff] %v6128_v48  ;;  %v6098_v50 = vadd.f32 %v6066_v49, %v6034_v58  ;;  %v5997_v32 = vmul.f32 %v11215_v36, %v5895_v25  ;;  %p9859_p3 = pneg %p9858_p2 }
 0x66c   : > { %v6131_v40 = vmax.f32 %v6099_v34, 0.0  ;;  %v6037_v27 = vadd.f32 %v11220_v41, %v5998_v55 }
 0x66d   : > { %v6130_v30 = vmax.f32 %v6098_v50, 0.0  ;;  %v6036_v19 = vadd.f32 %v11220_v41, %v5997_v32  ;;  %v8599_v56 = vpop.f32.mrb[26].mxu1  ;;  %p9866_p1 = pnand %p9865_p12, %p9859_p3 }
 0x66e   : > { %6163 = vst [vmem:[%s11236_s21 + $0xb8] sm:$0xff] %v6131_v40  ;;  %v6101_v23 = vadd.f32 %v6069_v17, %v6037_v27  ;;  %v6000_v10 = vmul.f32 %v8599_v56, %v11215_v36  ;;  %v5905_v16 = vpop.f32.mrb[27].mxu1 }
 0x66f   : > { %6162 = vst [vmem:[%s11236_s21 + $0xb0] sm:$0xff] %v6130_v30  ;;  %v6100_v28 = vadd.f32 %v6068_v4, %v6036_v19  ;;  %v5999_v29 = vmul.f32 %v11215_v36, %v5905_v16 }
 0x670   : > { %v6133_v24 = vmax.f32 %v6101_v23, 0.0  ;;  %v6039_v62 = vadd.f32 %v11220_v41, %v6000_v10 }
 0x671   : > { %v6132_v3 = vmax.f32 %v6100_v28, 0.0  ;;  %v6038_v8 = vadd.f32 %v11220_v41, %v5999_v29  ;;  %v8602_v20 = vpop.f32.mrb[28].mxu1 }
 0x672   : > { %6165 = vst [vmem:[%s11236_s21 + $0xc8] sm:$0xff] %v6133_v24  ;;  %v6103_v18 = vadd.f32 %v6071_v35, %v6039_v62  ;;  %v6002_v54 = vmul.f32 %v8602_v20, %v11215_v36  ;;  %v5915_v60 = vpop.f32.mrb[29].mxu1 }
 0x673   : > { %6164 = vst [vmem:[%s11236_s21 + $0xc0] sm:$0xff] %v6132_v3  ;;  %v6102_v61 = vadd.f32 %v6070_v57, %v6038_v8  ;;  %v6001_v2 = vmul.f32 %v11215_v36, %v5915_v60 }
 0x674   : > { %v6135_v5 = vmax.f32 %v6103_v18, 0.0  ;;  %v6041_v6 = vadd.f32 %v11220_v41, %v6002_v54 }
 0x675   : > { %v6134_v44 = vmax.f32 %v6102_v61, 0.0  ;;  %v6040_v52 = vadd.f32 %v11220_v41, %v6001_v2  ;;  %v8605_v13 = vpop.f32.mrb[30].mxu1 }
 0x676   : > { %6167 = vst [vmem:[%s11236_s21 + $0xd8] sm:$0xff] %v6135_v5  ;;  %v6105_v42 = vadd.f32 %v6073_v1, %v6041_v6  ;;  %v6004_v51 = vmul.f32 %v8605_v13, %v11215_v36  ;;  %v5925_v33 = vpop.f32.mrb[31].mxu1 }
 0x677   : > { %6166 = vst [vmem:[%s11236_s21 + $0xd0] sm:$0xff] %v6134_v44  ;;  %v6104_v46 = vadd.f32 %v6072_v12, %v6040_v52  ;;  %v6003_v21 = vmul.f32 %v11215_v36, %v5925_v33 }
 0x678   : > { %v6137_v53 = vmax.f32 %v6105_v42, 0.0  ;;  %v6043_v14 = vadd.f32 %v11220_v41, %v6004_v51 }
 0x679   : > { %v6136_v31 = vmax.f32 %v6104_v46, 0.0  ;;  %v6042_v26 = vadd.f32 %v11220_v41, %v6003_v21 }
 0x67a   : > { %6169 = vst [vmem:[%s11236_s21 + $0xe8] sm:$0xff] %v6137_v53  ;;  %v6107_v37 = vadd.f32 %v6075_v15, %v6043_v14 }
 0x67b   : > { %6168 = vst [vmem:[%s11236_s21 + $0xe0] sm:$0xff] %v6136_v31  ;;  %v6106_v63 = vadd.f32 %v6074_v39, %v6042_v26 }
 0x67c   : > { %v6139_v38 = vmax.f32 %v6107_v37, 0.0 }
 0x67d   : > { %v6138_v36 = vmax.f32 %v6106_v63, 0.0 }
 0x67e   : > { %6171 = vst [vmem:[%s11236_s21 + $0xf8] sm:$0xff] %v6139_v38 }
 0x67f   : > { %6170 = vst [vmem:[%s11236_s21 + $0xf0] sm:$0xff] %v6138_v36 }
 0x680   : > { %9869 = shalt.err (!%p9866_p1)
}
 0x681   : > { %s9870_s15 = scalar_lea.hbm %s11357_s9, 4096  ;;  %s9874_s21 = scalar_lea.hbm %s11412_s7, 8192 }
 0x682   : > { %p9871_p13 = scmp.ne.s32.totalorder %s11357_s9, %s9870_s15  ;;  %p9875_p4 = scmp.lt.u32.totalorder %s11357_s9, %s11412_s7 }
 0x683   : > { %p9876_p5 = scmp.lt.u32.totalorder %s9874_s21, %s9870_s15  ;;  %p9878_p11 = scmp.lt.u32.totalorder %s9870_s15, %s11357_s9 }
 0x684   : > { %p9872_p6 = pnand %p9871_p13, %p11648_p0 }
 0x685   : > { %p9877_p8 = por %p9876_p5, %p9875_p4 }
 0x686   : > { %p9873_p10 = pneg %p9872_p6 }
 0x687   : > { %p9879_p2 = por %p9878_p11, %p9877_p8 }
 0x689   : > { %p9880_p3 = pnand %p9879_p2, %p9873_p10 }
 0x68b   : > { %9883 = shalt.err (!%p9880_p3)
}
 0x68c   : > { %s9935_s30 = smov 128   ;;  %s9936_s13 = smov 8  }
 0x68d   : > { %9704 = dma.vmem_to_hbm [thread:$0]  (%p11648_p0), %s11359_s22, 4096, %s11357_s9, %s6173_s28, %s9935_s30, %s9935_s30, %s9936_s13  }
 0x68e PF: > { %s6201_s29 = sand.u32 1, %s9914_s24   ;;  %p11649_p7 = scmp.ne.s32.totalorder %s11492_s8, 0 }
 0x68f   : > { %p11650_p9 = scmp.ge.s32.totalorder %s9926_s27, 2  ;;  %s6202_s11 = scalar_lea.sflag [#allocation5], %s6201_s29 }
 0x691   : > { %p9718_p12 = pnand %p11650_p9, %p11649_p7 }
 0x693   : > { %9909 = dma.done.wait (!%p9718_p12), %s6202_s11, 4096  }
 0x694   : > { %9911 = vsyncadd (!%p9718_p12), %s6202_s11, 4294963200  ;;  %p21_p1 = scmp.ge.s32.totalorder %s10093_s12, 4   ;;  %s11651_s24 = smov %s9918_s25 }
 0x695   : > { %s11652_s25 = smov %s9922_s26  ;;  %s11653_s26 = smov %s10109_s17 }
 0x696   : > { %s11654_s27 = smov %s10093_s12  ;;  %23 = sbr.rel (!%p21_p1) target bundleno = 6 (0x6), region = 119 }
 0x69d   :  { %6207 = vsyncpa [#allocation4], 1 }
 0x69e   :  { %6209 = vsyncpa [#allocation4 + $0x1], 1 }
 0x69f   :  { %6210 = vsyncpa [#allocation7], 1 }
 0x6a0   :  { %6211 = vsyncpa [#allocation5], 1 }
 0x6a1   :  { %6213 = vsyncpa [#allocation5 + $0x1], 1 }

</bundles_post_ra>
